<compile_context>
chip_gen: v7x
topology: tpu7x:2x2x1
jax: 0.10.0
libtpu: 0.0.40
codegen_flags: <defaults>
</compile_context>

<pallas_src>
import functools

import numpy as np
import jax
import jax.numpy as jnp
from jax import lax
from jax.experimental import pallas as pl
from jax.experimental.pallas import tpu as pltpu


# ------------------------------ Pallas kernel ------------------------------ #

def _cnn_fused_kernel(l1_ref, t1_ref, b1_ref, t2_ref, b2_ref, wo_ref, bo_ref,
                      out_ref, l2a_ref, l2b_ref, *, bb):
    """Fused conv1+pool -> conv2+pool -> linear for a block of `bb` images.

    l1_ref : (1, 4, 7*bb, 160) bf16  conv1 im2col LHS, one slab per
                                     (pooled-row parity q, H-pool tap di);
                                     rows are (pooled_row mq)*bb + image
    t1_ref : (160, 512)  bf16        conv1 weights, K = 5 kh * 32 padded cols,
                                     lanes = 256*Wtap + 16*col + out_ch
    t2_ref : (1280, 512) bf16        conv2 weights, K = 5 kh * 256 (14*16 + pad)
    wo_ref : (7, 256, 128) bf16      per-output-row linear weights (CHW folded)
    b*_ref : f32 bias tiles matching the matmul lane layouts
    out_ref: (bb, 128) f32           logits (lanes 10.. are zero padding)
    l2a/l2b: (7*bb, 1280) bf16       conv2 im2col slabs (H-pool taps 0 / 1)
    """
    M = 7 * bb
    t1 = t1_ref[...]                       # (160, 512)
    b1 = b1_ref[...]                       # (1, 256)
    b2 = b2_ref[...]                       # (1, 512)
    l2_refs = (l2a_ref, l2b_ref)

    # ---------------- conv1 + ReLU + 2x2 max-pool (per row parity q) --------
    for q in range(2):
        a0 = jnp.dot(l1_ref[0, 2 * q + 0], t1, preferred_element_type=jnp.float32)
        a1 = jnp.dot(l1_ref[0, 2 * q + 1], t1, preferred_element_type=jnp.float32)
        m = jnp.maximum(a0, a1)                        # max over the 2 H taps
        m = jnp.maximum(m[:, :256], m[:, 256:])        # max over the 2 W taps
        h1q = jnp.maximum(m + b1, 0.0).astype(jnp.bfloat16)        # (M, 256)

        # Scatter h1 (parity q) into the conv2 im2col slabs.  For H tap di2 and
        # kernel row kh2 the whole (M,256) block is shifted by delta pooled
        # rows (= delta*bb sublanes, identical for every image); target rows
        # that correspond to conv2's zero padding are written as zeros.
        for di2 in range(2):
            ref = l2_refs[di2]
            for kh2 in range(5):
                if (di2 + kh2) % 2 != q:
                    continue
                delta = (q + 2 - di2 - kh2) // 2       # in {-1, 0, 1}
                c0 = kh2 * 256
                if delta == 0:
                    ref[:, c0:c0 + 256] = h1q
                elif delta == 1:
                    ref[0:bb, c0:c0 + 256] = jnp.zeros((bb, 256), jnp.bfloat16)
                    ref[bb:M, c0:c0 + 256] = h1q[0:6 * bb, :]
                else:  # delta == -1
                    ref[0:6 * bb, c0:c0 + 256] = h1q[bb:M, :]
                    ref[6 * bb:M, c0:c0 + 256] = jnp.zeros((bb, 256), jnp.bfloat16)

    # ---------------- conv2 + ReLU + 2x2 avg-pool (kh folded into K) --------
    t2 = t2_ref[...]                       # (1280, 512)
    y0 = jnp.maximum(
        jnp.dot(l2a_ref[...], t2, preferred_element_type=jnp.float32) + b2, 0.0)
    u = y0[:, :256] + y0[:, 256:]                      # sum over W taps (H tap 0)
    y1 = jnp.maximum(
        jnp.dot(l2b_ref[...], t2, preferred_element_type=jnp.float32) + b2, 0.0)
    u = u + y1[:, :256] + y1[:, 256:]                  # + H tap 1
    h2 = (u * 0.25).astype(jnp.bfloat16)               # (M, 256)

    # ---------------- linear (PyTorch CHW flatten folded into wo) -----------
    acc = None
    for h in range(7):
        p = jnp.dot(h2[h * bb:(h + 1) * bb, :], wo_ref[h],
                    preferred_element_type=jnp.float32)            # (bb, 128)
        acc = p if acc is None else acc + p
    out_ref[...] = acc + bo_ref[...]


# --------------------------------- wrapper ---------------------------------- #

def cnn_forward(x_nchw, kp, *, batch_block=16):
    """Pallas forward pass. x_nchw: (B, 1, 28, 28) f32 -> (B, 10) f32."""
    B = x_nchw.shape[0]
    assert x_nchw.shape[1:] == (1, 28, 28), x_nchw.shape
    bb = batch_block
    assert bb % 8 == 0 and bb > 0          # 16/32 preferred (bf16 tile aligned)

    nb = (B + bb - 1) // bb
    Bp = nb * bb

    # 'same' padding for the 5x5 conv + pad the batch to a multiple of bb.
    xp = jnp.pad(x_nchw.reshape(B, 28, 28), ((0, Bp - B), (2, 2), (2, 2)))

    # conv1 im2col LHS: l1[g, 2*q+di, mq*bb+i, kh*32+s] = xp[g*bb+i, 4*mq+2*q+di+kh, s]
    q = np.arange(2); di = np.arange(2); mq = np.arange(7); kh = np.arange(5)
    rows = (4 * mq[None, None, :, None] + 2 * q[:, None, None, None]
            + di[None, :, None, None] + kh[None, None, None, :])       # (2,2,7,5)
    rows = rows.reshape(4, 7, 5)
    l1 = xp[:, rows, :]                                # (Bp, 4, 7, 5, 32)
    l1 = l1.transpose(1, 2, 0, 3, 4)                   # (4, 7, Bp, 5, 32)
    l1 = l1.reshape(4, 7, nb, bb, 160)
    l1 = l1.transpose(2, 0, 1, 3, 4).reshape(nb, 4, 7 * bb, 160)
    l1 = l1.astype(jnp.bfloat16)

    out = pl.pallas_call(
        functools.partial(_cnn_fused_kernel, bb=bb),
        out_shape=jax.ShapeDtypeStruct((Bp, 128), jnp.float32),
        grid_spec=pltpu.PrefetchScalarGridSpec(
            num_scalar_prefetch=0,
            grid=(nb,),
            in_specs=[
                pl.BlockSpec((1, 4, 7 * bb, 160), lambda g: (g, 0, 0, 0)),  # l1
                pl.BlockSpec((160, 512), lambda g: (0, 0)),                 # t1
                pl.BlockSpec((1, 256), lambda g: (0, 0)),                   # b1
                pl.BlockSpec((1280, 512), lambda g: (0, 0)),                # t2
                pl.BlockSpec((1, 512), lambda g: (0, 0)),                   # b2
                pl.BlockSpec((7, 256, 128), lambda g: (0, 0, 0)),           # wo
                pl.BlockSpec((1, 128), lambda g: (0, 0)),                   # bo
            ],
            out_specs=pl.BlockSpec((bb, 128), lambda g: (g, 0)),
            scratch_shapes=[pltpu.VMEM((7 * bb, 1280), jnp.bfloat16),
                            pltpu.VMEM((7 * bb, 1280), jnp.bfloat16)],
        ),
        compiler_params=pltpu.CompilerParams(
            dimension_semantics=("parallel",)),
    )(l1, kp["t1"], kp["b1"], kp["t2"], kp["b2"], kp["wo"], kp["bo"])

    return out[:B, :10]


# ------------------------ parameters & weight prep -------------------------- #

def init_params(key):
    k = jax.random.split(key, 6)
    w1 = jax.random.normal(k[0], (16, 1, 5, 5), jnp.float32) * 0.05   # OIHW
    b1 = jax.random.normal(k[1], (16,), jnp.float32) * 0.05
    w2 = jax.random.normal(k[2], (32, 16, 5, 5), jnp.float32) * 0.05  # OIHW
    b2 = jax.random.normal(k[3], (32,), jnp.float32) * 0.05
    wo = jax.random.normal(k[4], (10, 32 * 7 * 7), jnp.float32) * 0.02
    bo = jax.random.normal(k[5], (10,), jnp.float32) * 0.02
    return dict(w1=w1, b1=b1, w2=w2, b2=b2, wo=wo, bo=bo)


def prepare_kernel_params(p):
    """Host-side (one-time) build of the matmul-form weights used by the kernel."""
    w1 = np.asarray(p["w1"], np.float32)
    b1 = np.asarray(p["b1"], np.float32)
    w2 = np.asarray(p["w2"], np.float32)
    b2 = np.asarray(p["b2"], np.float32)
    wo = np.asarray(p["wo"], np.float32)
    bo = np.asarray(p["bo"], np.float32)

    # conv1: t1[32*kh + s, 256*dj + 16*jp + co] = w1[co, 0, kh, kw],
    #        s = padded input column = 2*jp + dj + kw  (lanes 224..255 / 480..511 zero)
    t1 = np.zeros((160, 512), np.float32)
    for kh in range(5):
        for kw in range(5):
            for dj in range(2):
                for jp in range(14):
                    s = 2 * jp + dj + kw
                    t1[32 * kh + s,
                       256 * dj + 16 * jp:256 * dj + 16 * (jp + 1)] = w1[:, 0, kh, kw]
    b1h = np.zeros((1, 256), np.float32)
    b1h[0, :224] = np.tile(b1, 14)

    # conv2: t2[256*kh + 16*w + c, 256*dj + 32*jp + d] = w2[d, c, kh, kw],
    #        w = h1 column = 2*jp + dj + kw - 2 (taps into zero padding dropped)
    t2 = np.zeros((1280, 512), np.float32)
    for kh in range(5):
        for kw in range(5):
            for dj in range(2):
                for jp in range(7):
                    w = 2 * jp + dj + kw - 2
                    if 0 <= w <= 13:
                        t2[256 * kh + 16 * w:256 * kh + 16 * (w + 1),
                           256 * dj + 32 * jp:256 * dj + 32 * (jp + 1)] = \
                            w2[:, :, kh, kw].T
    b2t = np.zeros((1, 512), np.float32)
    b2t[0, :224] = np.tile(b2, 7)
    b2t[0, 256:480] = np.tile(b2, 7)

    # linear with the PyTorch (C,H,W) flatten order folded into the weight:
    # wop[h, 32*w + c, n] = wo[n, c*49 + h*7 + w]; rows 224..255 / cols 10.. zero.
    wop = np.zeros((7, 256, 128), np.float32)
    for h in range(7):
        for w in range(7):
            for c in range(32):
                wop[h, 32 * w + c, :10] = wo[:, c * 49 + h * 7 + w]
    bop = np.zeros((1, 128), np.float32)
    bop[0, :10] = bo

    return dict(
        t1=jnp.asarray(t1, jnp.bfloat16),
        b1=jnp.asarray(b1h, jnp.float32),
        t2=jnp.asarray(t2, jnp.bfloat16),
        b2=jnp.asarray(b2t, jnp.float32),
        wo=jnp.asarray(wop, jnp.bfloat16),
        bo=jnp.asarray(bop, jnp.float32),
    )


# ------------------------------ reference ----------------------------------- #

def cnn_reference(x, p):
    """Pure-JAX reference mirroring the PyTorch module (NCHW)."""
    dn1 = lax.conv_dimension_numbers(x.shape, p["w1"].shape, ("NCHW", "OIHW", "NCHW"))
    y = lax.conv_general_dilated(x, p["w1"], (1, 1), ((2, 2), (2, 2)),
                                 dimension_numbers=dn1)
    y = jnp.maximum(y + p["b1"][None, :, None, None], 0.0)
    y = lax.reduce_window(y, -jnp.inf, lax.max, (1, 1, 2, 2), (1, 1, 2, 2), "VALID")

    dn2 = lax.conv_dimension_numbers(y.shape, p["w2"].shape, ("NCHW", "OIHW", "NCHW"))
    y = lax.conv_general_dilated(y, p["w2"], (1, 1), ((2, 2), (2, 2)),
                                 dimension_numbers=dn2)
    y = jnp.maximum(y + p["b2"][None, :, None, None], 0.0)
    y = lax.reduce_window(y, 0.0, lax.add, (1, 1, 2, 2), (1, 1, 2, 2), "VALID") / 4.0

    flat = y.reshape(y.shape[0], -1)
    return flat @ p["wo"].T + p["bo"][None, :]


# ---------------------------------- main ------------------------------------ #

if __name__ == "__main__":
    key = jax.random.PRNGKey(0)
    kx, kw_key = jax.random.split(key)

    params = init_params(kw_key)
    kparams = prepare_kernel_params(params)
    fwd = jax.jit(functools.partial(cnn_forward, batch_block=16))

    # small batch (single grid step)
    x = jax.random.normal(kx, (2, 1, 28, 28), jnp.float32)
    out = jax.block_until_ready(fwd(x, kparams))
    ref = cnn_reference(x, params)
    assert out.shape == (2, 10), out.shape
    # bf16 matmul operands (f32 accumulation) -> slightly looser tolerance.
    assert jnp.allclose(out, ref, rtol=2e-2, atol=2e-2), (out, ref)

    # larger batch: exercises multiple grid steps + batch padding
    x2 = jax.random.normal(jax.random.PRNGKey(1), (33, 1, 28, 28), jnp.float32)
    out2 = jax.block_until_ready(fwd(x2, kparams))
    ref2 = cnn_reference(x2, params)
    assert out2.shape == (33, 10), out2.shape
    assert jnp.allclose(out2, ref2, rtol=2e-2, atol=2e-2)

    print("KERNEL_OK")
</pallas_src>

<mosaic_0001>
module attributes {stable_mosaic.version = 11 : i64} {
  func.func @_cnn_fused_kernel(%arg0: i32, %arg1: memref<1x4x112x160xbf16, #tpu.memory_space<vmem>>, %arg2: memref<160x512xbf16, #tpu.memory_space<vmem>>, %arg3: memref<1x256xf32, #tpu.memory_space<vmem>>, %arg4: memref<1280x512xbf16, #tpu.memory_space<vmem>>, %arg5: memref<1x512xf32, #tpu.memory_space<vmem>>, %arg6: memref<7x256x128xbf16, #tpu.memory_space<vmem>>, %arg7: memref<1x128xf32, #tpu.memory_space<vmem>>, %arg8: memref<16x128xf32, #tpu.memory_space<vmem>>, %arg9: memref<112x1280xbf16, #tpu.memory_space<vmem>>, %arg10: memref<112x1280xbf16, #tpu.memory_space<vmem>>) attributes {dimension_semantics = [#tpu.dimension_semantics<parallel>], iteration_bounds = array<i64: 1>, scalar_prefetch = 0 : i64, scratch_operands = 2 : i64, tpu.core_type = #tpu.core_type<tc>, window_params = [{transform_indices = @transform_0, window_bounds = array<i64: 1, 4, 112, 160>}, {pipeline_mode = #tpu.pipeline_mode<synchronous>, transform_indices = @transform_1, window_bounds = array<i64: 160, 512>}, {pipeline_mode = #tpu.pipeline_mode<synchronous>, transform_indices = @transform_2, window_bounds = array<i64: 1, 256>}, {pipeline_mode = #tpu.pipeline_mode<synchronous>, transform_indices = @transform_3, window_bounds = array<i64: 1280, 512>}, {pipeline_mode = #tpu.pipeline_mode<synchronous>, transform_indices = @transform_4, window_bounds = array<i64: 1, 512>}, {pipeline_mode = #tpu.pipeline_mode<synchronous>, transform_indices = @transform_5, window_bounds = array<i64: 7, 256, 128>}, {pipeline_mode = #tpu.pipeline_mode<synchronous>, transform_indices = @transform_6, window_bounds = array<i64: 1, 128>}, {transform_indices = @transform_7, window_bounds = array<i64: 16, 128>}]} {
    %c0 = arith.constant 0 : index
    %c0_0 = arith.constant 0 : index
    %0 = vector.load %arg2[%c0, %c0_0] : memref<160x512xbf16, #tpu.memory_space<vmem>>, vector<160x512xbf16>
    %c0_1 = arith.constant 0 : index
    %c0_2 = arith.constant 0 : index
    %1 = vector.load %arg3[%c0_1, %c0_2] : memref<1x256xf32, #tpu.memory_space<vmem>>, vector<1x256xf32>
    %c0_3 = arith.constant 0 : index
    %c0_4 = arith.constant 0 : index
    %2 = vector.load %arg5[%c0_3, %c0_4] : memref<1x512xf32, #tpu.memory_space<vmem>>, vector<1x512xf32>
    %c0_5 = arith.constant 0 : index
    %c0_6 = arith.constant 0 : index
    %c0_7 = arith.constant 0 : index
    %c0_8 = arith.constant 0 : index
    %3 = vector.load %arg1[%c0_5, %c0_6, %c0_7, %c0_8] : memref<1x4x112x160xbf16, #tpu.memory_space<vmem>>, vector<1x1x112x160xbf16>
    %4 = vector.shape_cast %3 : vector<1x1x112x160xbf16> to vector<112x160xbf16>
    %cst = arith.constant dense<0.000000e+00> : vector<112x512xf32>
    %5 = tpu.matmul %4, %0, %cst {dimension_numbers = #tpu.dot_dimension_numbers<[1], [0], [0], [1], [0, 0, 1, 1], [], []>} : vector<112x160xbf16>, vector<160x512xbf16>, vector<112x512xf32> -> vector<112x512xf32>
    %c0_9 = arith.constant 0 : index
    %c1 = arith.constant 1 : index
    %c0_10 = arith.constant 0 : index
    %c0_11 = arith.constant 0 : index
    %6 = vector.load %arg1[%c0_9, %c1, %c0_10, %c0_11] : memref<1x4x112x160xbf16, #tpu.memory_space<vmem>>, vector<1x1x112x160xbf16>
    %7 = vector.shape_cast %6 : vector<1x1x112x160xbf16> to vector<112x160xbf16>
    %cst_12 = arith.constant dense<0.000000e+00> : vector<112x512xf32>
    %8 = tpu.matmul %7, %0, %cst_12 {dimension_numbers = #tpu.dot_dimension_numbers<[1], [0], [0], [1], [0, 0, 1, 1], [], []>} : vector<112x160xbf16>, vector<160x512xbf16>, vector<112x512xf32> -> vector<112x512xf32>
    %9 = arith.maximumf %5, %8 : vector<112x512xf32>
    %10 = vector.extract_strided_slice %9 {offsets = [0, 0], sizes = [112, 256], strides = [1, 1]} : vector<112x512xf32> to vector<112x256xf32>
    %11 = vector.extract_strided_slice %9 {offsets = [0, 256], sizes = [112, 256], strides = [1, 1]} : vector<112x512xf32> to vector<112x256xf32>
    %12 = arith.maximumf %10, %11 : vector<112x256xf32>
    %13 = vector.broadcast %1 : vector<1x256xf32> to vector<112x256xf32>
    %14 = arith.addf %12, %13 : vector<112x256xf32>
    %cst_13 = arith.constant 0.000000e+00 : f32
    %15 = vector.broadcast %cst_13 : f32 to vector<112x256xf32>
    %16 = arith.maximumf %14, %15 : vector<112x256xf32>
    %17 = arith.truncf %16 : vector<112x256xf32> to vector<112x256xbf16>
    %cst_14 = arith.constant 0.000000e+00 : bf16
    %18 = vector.broadcast %cst_14 : bf16 to vector<16x256xbf16>
    %c0_15 = arith.constant 0 : index
    %c0_16 = arith.constant 0 : index
    %19 = vector.load %arg9[%c0_15, %c0_16] : memref<112x1280xbf16, #tpu.memory_space<vmem>>, vector<16x256xbf16>
    tpu.vector_store %arg9[%c0_15, %c0_16], %18 {strides = array<i32>} : memref<112x1280xbf16, #tpu.memory_space<vmem>>, vector<16x256xbf16>,
    %20 = vector.extract_strided_slice %17 {offsets = [0, 0], sizes = [96, 256], strides = [1, 1]} : vector<112x256xbf16> to vector<96x256xbf16>
    %c16 = arith.constant 16 : index
    %c0_17 = arith.constant 0 : index
    %21 = vector.load %arg9[%c16, %c0_17] : memref<112x1280xbf16, #tpu.memory_space<vmem>>, vector<96x256xbf16>
    tpu.vector_store %arg9[%c16, %c0_17], %20 {strides = array<i32>} : memref<112x1280xbf16, #tpu.memory_space<vmem>>, vector<96x256xbf16>,
    %c0_18 = arith.constant 0 : index
    %c512 = arith.constant 512 : index
    %22 = vector.load %arg9[%c0_18, %c512] : memref<112x1280xbf16, #tpu.memory_space<vmem>>, vector<112x256xbf16>
    tpu.vector_store %arg9[%c0_18, %c512], %17 {strides = array<i32>} : memref<112x1280xbf16, #tpu.memory_space<vmem>>, vector<112x256xbf16>,
    %23 = vector.extract_strided_slice %17 {offsets = [16, 0], sizes = [96, 256], strides = [1, 1]} : vector<112x256xbf16> to vector<96x256xbf16>
    %c0_19 = arith.constant 0 : index
    %c1024 = arith.constant 1024 : index
    %24 = vector.load %arg9[%c0_19, %c1024] : memref<112x1280xbf16, #tpu.memory_space<vmem>>, vector<96x256xbf16>
    tpu.vector_store %arg9[%c0_19, %c1024], %23 {strides = array<i32>} : memref<112x1280xbf16, #tpu.memory_space<vmem>>, vector<96x256xbf16>,
    %cst_20 = arith.constant 0.000000e+00 : bf16
    %25 = vector.broadcast %cst_20 : bf16 to vector<16x256xbf16>
    %c96 = arith.constant 96 : index
    %c1024_21 = arith.constant 1024 : index
    %26 = vector.load %arg9[%c96, %c1024_21] : memref<112x1280xbf16, #tpu.memory_space<vmem>>, vector<16x256xbf16>
    tpu.vector_store %arg9[%c96, %c1024_21], %25 {strides = array<i32>} : memref<112x1280xbf16, #tpu.memory_space<vmem>>, vector<16x256xbf16>,
    %c0_22 = arith.constant 0 : index
    %c256 = arith.constant 256 : index
    %27 = vector.load %arg10[%c0_22, %c256] : memref<112x1280xbf16, #tpu.memory_space<vmem>>, vector<112x256xbf16>
    tpu.vector_store %arg10[%c0_22, %c256], %17 {strides = array<i32>} : memref<112x1280xbf16, #tpu.memory_space<vmem>>, vector<112x256xbf16>,
    %28 = vector.extract_strided_slice %17 {offsets = [16, 0], sizes = [96, 256], strides = [1, 1]} : vector<112x256xbf16> to vector<96x256xbf16>
    %c0_23 = arith.constant 0 : index
    %c768 = arith.constant 768 : index
    %29 = vector.load %arg10[%c0_23, %c768] : memref<112x1280xbf16, #tpu.memory_space<vmem>>, vector<96x256xbf16>
    tpu.vector_store %arg10[%c0_23, %c768], %28 {strides = array<i32>} : memref<112x1280xbf16, #tpu.memory_space<vmem>>, vector<96x256xbf16>,
    %cst_24 = arith.constant 0.000000e+00 : bf16
    %30 = vector.broadcast %cst_24 : bf16 to vector<16x256xbf16>
    %c96_25 = arith.constant 96 : index
    %c768_26 = arith.constant 768 : index
    %31 = vector.load %arg10[%c96_25, %c768_26] : memref<112x1280xbf16, #tpu.memory_space<vmem>>, vector<16x256xbf16>
    tpu.vector_store %arg10[%c96_25, %c768_26], %30 {strides = array<i32>} : memref<112x1280xbf16, #tpu.memory_space<vmem>>, vector<16x256xbf16>,
    %c0_27 = arith.constant 0 : index
    %c2 = arith.constant 2 : index
    %c0_28 = arith.constant 0 : index
    %c0_29 = arith.constant 0 : index
    %32 = vector.load %arg1[%c0_27, %c2, %c0_28, %c0_29] : memref<1x4x112x160xbf16, #tpu.memory_space<vmem>>, vector<1x1x112x160xbf16>
    %33 = vector.shape_cast %32 : vector<1x1x112x160xbf16> to vector<112x160xbf16>
    %cst_30 = arith.constant dense<0.000000e+00> : vector<112x512xf32>
    %34 = tpu.matmul %33, %0, %cst_30 {dimension_numbers = #tpu.dot_dimension_numbers<[1], [0], [0], [1], [0, 0, 1, 1], [], []>} : vector<112x160xbf16>, vector<160x512xbf16>, vector<112x512xf32> -> vector<112x512xf32>
    %c0_31 = arith.constant 0 : index
    %c3 = arith.constant 3 : index
    %c0_32 = arith.constant 0 : index
    %c0_33 = arith.constant 0 : index
    %35 = vector.load %arg1[%c0_31, %c3, %c0_32, %c0_33] : memref<1x4x112x160xbf16, #tpu.memory_space<vmem>>, vector<1x1x112x160xbf16>
    %36 = vector.shape_cast %35 : vector<1x1x112x160xbf16> to vector<112x160xbf16>
    %cst_34 = arith.constant dense<0.000000e+00> : vector<112x512xf32>
    %37 = tpu.matmul %36, %0, %cst_34 {dimension_numbers = #tpu.dot_dimension_numbers<[1], [0], [0], [1], [0, 0, 1, 1], [], []>} : vector<112x160xbf16>, vector<160x512xbf16>, vector<112x512xf32> -> vector<112x512xf32>
    %38 = arith.maximumf %34, %37 : vector<112x512xf32>
    %39 = vector.extract_strided_slice %38 {offsets = [0, 0], sizes = [112, 256], strides = [1, 1]} : vector<112x512xf32> to vector<112x256xf32>
    %40 = vector.extract_strided_slice %38 {offsets = [0, 256], sizes = [112, 256], strides = [1, 1]} : vector<112x512xf32> to vector<112x256xf32>
    %41 = arith.maximumf %39, %40 : vector<112x256xf32>
    %42 = vector.broadcast %1 : vector<1x256xf32> to vector<112x256xf32>
    %43 = arith.addf %41, %42 : vector<112x256xf32>
    %cst_35 = arith.constant 0.000000e+00 : f32
    %44 = vector.broadcast %cst_35 : f32 to vector<112x256xf32>
    %45 = arith.maximumf %43, %44 : vector<112x256xf32>
    %46 = arith.truncf %45 : vector<112x256xf32> to vector<112x256xbf16>
    %cst_36 = arith.constant 0.000000e+00 : bf16
    %47 = vector.broadcast %cst_36 : bf16 to vector<16x256xbf16>
    %c0_37 = arith.constant 0 : index
    %c256_38 = arith.constant 256 : index
    %48 = vector.load %arg9[%c0_37, %c256_38] : memref<112x1280xbf16, #tpu.memory_space<vmem>>, vector<16x256xbf16>
    tpu.vector_store %arg9[%c0_37, %c256_38], %47 {strides = array<i32>} : memref<112x1280xbf16, #tpu.memory_space<vmem>>, vector<16x256xbf16>,
    %49 = vector.extract_strided_slice %46 {offsets = [0, 0], sizes = [96, 256], strides = [1, 1]} : vector<112x256xbf16> to vector<96x256xbf16>
    %c16_39 = arith.constant 16 : index
    %c256_40 = arith.constant 256 : index
    %50 = vector.load %arg9[%c16_39, %c256_40] : memref<112x1280xbf16, #tpu.memory_space<vmem>>, vector<96x256xbf16>
    tpu.vector_store %arg9[%c16_39, %c256_40], %49 {strides = array<i32>} : memref<112x1280xbf16, #tpu.memory_space<vmem>>, vector<96x256xbf16>,
    %c0_41 = arith.constant 0 : index
    %c768_42 = arith.constant 768 : index
    %51 = vector.load %arg9[%c0_41, %c768_42] : memref<112x1280xbf16, #tpu.memory_space<vmem>>, vector<112x256xbf16>
    tpu.vector_store %arg9[%c0_41, %c768_42], %46 {strides = array<i32>} : memref<112x1280xbf16, #tpu.memory_space<vmem>>, vector<112x256xbf16>,
    %cst_43 = arith.constant 0.000000e+00 : bf16
    %52 = vector.broadcast %cst_43 : bf16 to vector<16x256xbf16>
    %c0_44 = arith.constant 0 : index
    %c0_45 = arith.constant 0 : index
    %53 = vector.load %arg10[%c0_44, %c0_45] : memref<112x1280xbf16, #tpu.memory_space<vmem>>, vector<16x256xbf16>
    tpu.vector_store %arg10[%c0_44, %c0_45], %52 {strides = array<i32>} : memref<112x1280xbf16, #tpu.memory_space<vmem>>, vector<16x256xbf16>,
    %54 = vector.extract_strided_slice %46 {offsets = [0, 0], sizes = [96, 256], strides = [1, 1]} : vector<112x256xbf16> to vector<96x256xbf16>
    %c16_46 = arith.constant 16 : index
    %c0_47 = arith.constant 0 : index
    %55 = vector.load %arg10[%c16_46, %c0_47] : memref<112x1280xbf16, #tpu.memory_space<vmem>>, vector<96x256xbf16>
    tpu.vector_store %arg10[%c16_46, %c0_47], %54 {strides = array<i32>} : memref<112x1280xbf16, #tpu.memory_space<vmem>>, vector<96x256xbf16>,
    %c0_48 = arith.constant 0 : index
    %c512_49 = arith.constant 512 : index
    %56 = vector.load %arg10[%c0_48, %c512_49] : memref<112x1280xbf16, #tpu.memory_space<vmem>>, vector<112x256xbf16>
    tpu.vector_store %arg10[%c0_48, %c512_49], %46 {strides = array<i32>} : memref<112x1280xbf16, #tpu.memory_space<vmem>>, vector<112x256xbf16>,
    %57 = vector.extract_strided_slice %46 {offsets = [16, 0], sizes = [96, 256], strides = [1, 1]} : vector<112x256xbf16> to vector<96x256xbf16>
    %c0_50 = arith.constant 0 : index
    %c1024_51 = arith.constant 1024 : index
    %58 = vector.load %arg10[%c0_50, %c1024_51] : memref<112x1280xbf16, #tpu.memory_space<vmem>>, vector<96x256xbf16>
    tpu.vector_store %arg10[%c0_50, %c1024_51], %57 {strides = array<i32>} : memref<112x1280xbf16, #tpu.memory_space<vmem>>, vector<96x256xbf16>,
    %cst_52 = arith.constant 0.000000e+00 : bf16
    %59 = vector.broadcast %cst_52 : bf16 to vector<16x256xbf16>
    %c96_53 = arith.constant 96 : index
    %c1024_54 = arith.constant 1024 : index
    %60 = vector.load %arg10[%c96_53, %c1024_54] : memref<112x1280xbf16, #tpu.memory_space<vmem>>, vector<16x256xbf16>
    tpu.vector_store %arg10[%c96_53, %c1024_54], %59 {strides = array<i32>} : memref<112x1280xbf16, #tpu.memory_space<vmem>>, vector<16x256xbf16>,
    %c0_55 = arith.constant 0 : index
    %c0_56 = arith.constant 0 : index
    %61 = vector.load %arg4[%c0_55, %c0_56] : memref<1280x512xbf16, #tpu.memory_space<vmem>>, vector<1280x512xbf16>
    %c0_57 = arith.constant 0 : index
    %c0_58 = arith.constant 0 : index
    %62 = vector.load %arg9[%c0_57, %c0_58] : memref<112x1280xbf16, #tpu.memory_space<vmem>>, vector<112x1280xbf16>
    %cst_59 = arith.constant dense<0.000000e+00> : vector<112x512xf32>
    %63 = tpu.matmul %62, %61, %cst_59 {dimension_numbers = #tpu.dot_dimension_numbers<[1], [0], [0], [1], [0, 0, 1, 1], [], []>} : vector<112x1280xbf16>, vector<1280x512xbf16>, vector<112x512xf32> -> vector<112x512xf32>
    %64 = vector.broadcast %2 : vector<1x512xf32> to vector<112x512xf32>
    %65 = arith.addf %63, %64 : vector<112x512xf32>
    %cst_60 = arith.constant 0.000000e+00 : f32
    %66 = vector.broadcast %cst_60 : f32 to vector<112x512xf32>
    %67 = arith.maximumf %65, %66 : vector<112x512xf32>
    %68 = vector.extract_strided_slice %67 {offsets = [0, 0], sizes = [112, 256], strides = [1, 1]} : vector<112x512xf32> to vector<112x256xf32>
    %69 = vector.extract_strided_slice %67 {offsets = [0, 256], sizes = [112, 256], strides = [1, 1]} : vector<112x512xf32> to vector<112x256xf32>
    %70 = arith.addf %68, %69 : vector<112x256xf32>
    %c0_61 = arith.constant 0 : index
    %c0_62 = arith.constant 0 : index
    %71 = vector.load %arg10[%c0_61, %c0_62] : memref<112x1280xbf16, #tpu.memory_space<vmem>>, vector<112x1280xbf16>
    %cst_63 = arith.constant dense<0.000000e+00> : vector<112x512xf32>
    %72 = tpu.matmul %71, %61, %cst_63 {dimension_numbers = #tpu.dot_dimension_numbers<[1], [0], [0], [1], [0, 0, 1, 1], [], []>} : vector<112x1280xbf16>, vector<1280x512xbf16>, vector<112x512xf32> -> vector<112x512xf32>
    %73 = vector.broadcast %2 : vector<1x512xf32> to vector<112x512xf32>
    %74 = arith.addf %72, %73 : vector<112x512xf32>
    %cst_64 = arith.constant 0.000000e+00 : f32
    %75 = vector.broadcast %cst_64 : f32 to vector<112x512xf32>
    %76 = arith.maximumf %74, %75 : vector<112x512xf32>
    %77 = vector.extract_strided_slice %76 {offsets = [0, 0], sizes = [112, 256], strides = [1, 1]} : vector<112x512xf32> to vector<112x256xf32>
    %78 = arith.addf %70, %77 : vector<112x256xf32>
    %79 = vector.extract_strided_slice %76 {offsets = [0, 256], sizes = [112, 256], strides = [1, 1]} : vector<112x512xf32> to vector<112x256xf32>
    %80 = arith.addf %78, %79 : vector<112x256xf32>
    %cst_65 = arith.constant 2.500000e-01 : f32
    %81 = vector.broadcast %cst_65 : f32 to vector<112x256xf32>
    %82 = arith.mulf %80, %81 : vector<112x256xf32>
    %83 = arith.truncf %82 : vector<112x256xf32> to vector<112x256xbf16>
    %84 = vector.extract_strided_slice %83 {offsets = [0, 0], sizes = [16, 256], strides = [1, 1]} : vector<112x256xbf16> to vector<16x256xbf16>
    %c0_66 = arith.constant 0 : index
    %c0_67 = arith.constant 0 : index
    %c0_68 = arith.constant 0 : index
    %85 = vector.load %arg6[%c0_66, %c0_67, %c0_68] : memref<7x256x128xbf16, #tpu.memory_space<vmem>>, vector<1x256x128xbf16>
    %86 = vector.shape_cast %85 : vector<1x256x128xbf16> to vector<256x128xbf16>
    %cst_69 = arith.constant dense<0.000000e+00> : vector<16x128xf32>
    %87 = tpu.matmul %84, %86, %cst_69 {dimension_numbers = #tpu.dot_dimension_numbers<[1], [0], [0], [1], [0, 0, 1, 1], [], []>} : vector<16x256xbf16>, vector<256x128xbf16>, vector<16x128xf32> -> vector<16x128xf32>
    %88 = vector.extract_strided_slice %83 {offsets = [16, 0], sizes = [16, 256], strides = [1, 1]} : vector<112x256xbf16> to vector<16x256xbf16>
    %c1_70 = arith.constant 1 : index
    %c0_71 = arith.constant 0 : index
    %c0_72 = arith.constant 0 : index
    %89 = vector.load %arg6[%c1_70, %c0_71, %c0_72] : memref<7x256x128xbf16, #tpu.memory_space<vmem>>, vector<1x256x128xbf16>
    %90 = vector.shape_cast %89 : vector<1x256x128xbf16> to vector<256x128xbf16>
    %cst_73 = arith.constant dense<0.000000e+00> : vector<16x128xf32>
    %91 = tpu.matmul %88, %90, %cst_73 {dimension_numbers = #tpu.dot_dimension_numbers<[1], [0], [0], [1], [0, 0, 1, 1], [], []>} : vector<16x256xbf16>, vector<256x128xbf16>, vector<16x128xf32> -> vector<16x128xf32>
    %92 = arith.addf %87, %91 : vector<16x128xf32>
    %93 = vector.extract_strided_slice %83 {offsets = [32, 0], sizes = [16, 256], strides = [1, 1]} : vector<112x256xbf16> to vector<16x256xbf16>
    %c2_74 = arith.constant 2 : index
    %c0_75 = arith.constant 0 : index
    %c0_76 = arith.constant 0 : index
    %94 = vector.load %arg6[%c2_74, %c0_75, %c0_76] : memref<7x256x128xbf16, #tpu.memory_space<vmem>>, vector<1x256x128xbf16>
    %95 = vector.shape_cast %94 : vector<1x256x128xbf16> to vector<256x128xbf16>
    %cst_77 = arith.constant dense<0.000000e+00> : vector<16x128xf32>
    %96 = tpu.matmul %93, %95, %cst_77 {dimension_numbers = #tpu.dot_dimension_numbers<[1], [0], [0], [1], [0, 0, 1, 1], [], []>} : vector<16x256xbf16>, vector<256x128xbf16>, vector<16x128xf32> -> vector<16x128xf32>
    %97 = arith.addf %92, %96 : vector<16x128xf32>
    %98 = vector.extract_strided_slice %83 {offsets = [48, 0], sizes = [16, 256], strides = [1, 1]} : vector<112x256xbf16> to vector<16x256xbf16>
    %c3_78 = arith.constant 3 : index
    %c0_79 = arith.constant 0 : index
    %c0_80 = arith.constant 0 : index
    %99 = vector.load %arg6[%c3_78, %c0_79, %c0_80] : memref<7x256x128xbf16, #tpu.memory_space<vmem>>, vector<1x256x128xbf16>
    %100 = vector.shape_cast %99 : vector<1x256x128xbf16> to vector<256x128xbf16>
    %cst_81 = arith.constant dense<0.000000e+00> : vector<16x128xf32>
    %101 = tpu.matmul %98, %100, %cst_81 {dimension_numbers = #tpu.dot_dimension_numbers<[1], [0], [0], [1], [0, 0, 1, 1], [], []>} : vector<16x256xbf16>, vector<256x128xbf16>, vector<16x128xf32> -> vector<16x128xf32>
    %102 = arith.addf %97, %101 : vector<16x128xf32>
    %103 = vector.extract_strided_slice %83 {offsets = [64, 0], sizes = [16, 256], strides = [1, 1]} : vector<112x256xbf16> to vector<16x256xbf16>
    %c4 = arith.constant 4 : index
    %c0_82 = arith.constant 0 : index
    %c0_83 = arith.constant 0 : index
    %104 = vector.load %arg6[%c4, %c0_82, %c0_83] : memref<7x256x128xbf16, #tpu.memory_space<vmem>>, vector<1x256x128xbf16>
    %105 = vector.shape_cast %104 : vector<1x256x128xbf16> to vector<256x128xbf16>
    %cst_84 = arith.constant dense<0.000000e+00> : vector<16x128xf32>
    %106 = tpu.matmul %103, %105, %cst_84 {dimension_numbers = #tpu.dot_dimension_numbers<[1], [0], [0], [1], [0, 0, 1, 1], [], []>} : vector<16x256xbf16>, vector<256x128xbf16>, vector<16x128xf32> -> vector<16x128xf32>
    %107 = arith.addf %102, %106 : vector<16x128xf32>
    %108 = vector.extract_strided_slice %83 {offsets = [80, 0], sizes = [16, 256], strides = [1, 1]} : vector<112x256xbf16> to vector<16x256xbf16>
    %c5 = arith.constant 5 : index
    %c0_85 = arith.constant 0 : index
    %c0_86 = arith.constant 0 : index
    %109 = vector.load %arg6[%c5, %c0_85, %c0_86] : memref<7x256x128xbf16, #tpu.memory_space<vmem>>, vector<1x256x128xbf16>
    %110 = vector.shape_cast %109 : vector<1x256x128xbf16> to vector<256x128xbf16>
    %cst_87 = arith.constant dense<0.000000e+00> : vector<16x128xf32>
    %111 = tpu.matmul %108, %110, %cst_87 {dimension_numbers = #tpu.dot_dimension_numbers<[1], [0], [0], [1], [0, 0, 1, 1], [], []>} : vector<16x256xbf16>, vector<256x128xbf16>, vector<16x128xf32> -> vector<16x128xf32>
    %112 = arith.addf %107, %111 : vector<16x128xf32>
    %113 = vector.extract_strided_slice %83 {offsets = [96, 0], sizes = [16, 256], strides = [1, 1]} : vector<112x256xbf16> to vector<16x256xbf16>
    %c6 = arith.constant 6 : index
    %c0_88 = arith.constant 0 : index
    %c0_89 = arith.constant 0 : index
    %114 = vector.load %arg6[%c6, %c0_88, %c0_89] : memref<7x256x128xbf16, #tpu.memory_space<vmem>>, vector<1x256x128xbf16>
    %115 = vector.shape_cast %114 : vector<1x256x128xbf16> to vector<256x128xbf16>
    %cst_90 = arith.constant dense<0.000000e+00> : vector<16x128xf32>
    %116 = tpu.matmul %113, %115, %cst_90 {dimension_numbers = #tpu.dot_dimension_numbers<[1], [0], [0], [1], [0, 0, 1, 1], [], []>} : vector<16x256xbf16>, vector<256x128xbf16>, vector<16x128xf32> -> vector<16x128xf32>
    %117 = arith.addf %112, %116 : vector<16x128xf32>
    %c0_91 = arith.constant 0 : index
    %c0_92 = arith.constant 0 : index
    %118 = vector.load %arg7[%c0_91, %c0_92] : memref<1x128xf32, #tpu.memory_space<vmem>>, vector<1x128xf32>
    %119 = vector.broadcast %118 : vector<1x128xf32> to vector<16x128xf32>
    %120 = arith.addf %117, %119 : vector<16x128xf32>
    %c0_93 = arith.constant 0 : index
    %c0_94 = arith.constant 0 : index
    %121 = vector.load %arg8[%c0_93, %c0_94] : memref<16x128xf32, #tpu.memory_space<vmem>>, vector<16x128xf32>
    tpu.vector_store %arg8[%c0_93, %c0_94], %120 {strides = array<i32>} : memref<16x128xf32, #tpu.memory_space<vmem>>, vector<16x128xf32>,
    return
  }
  func.func @transform_0(%arg0: i32) -> (i32, i32, i32, i32) {
    %c0_i32 = arith.constant 0 : i32
    %c0_i32_0 = arith.constant 0 : i32
    %c0_i32_1 = arith.constant 0 : i32
    %c0_i32_2 = arith.constant 0 : i32
    return %arg0, %c0_i32, %c0_i32_0, %c0_i32_1 : i32, i32, i32, i32
  }
  func.func @transform_1(%arg0: i32) -> (i32, i32) {
    %c0_i32 = arith.constant 0 : i32
    %c0_i32_0 = arith.constant 0 : i32
    %c0_i32_1 = arith.constant 0 : i32
    return %c0_i32, %c0_i32_0 : i32, i32
  }
  func.func @transform_2(%arg0: i32) -> (i32, i32) {
    %c0_i32 = arith.constant 0 : i32
    %c0_i32_0 = arith.constant 0 : i32
    %c0_i32_1 = arith.constant 0 : i32
    return %c0_i32, %c0_i32_0 : i32, i32
  }
  func.func @transform_3(%arg0: i32) -> (i32, i32) {
    %c0_i32 = arith.constant 0 : i32
    %c0_i32_0 = arith.constant 0 : i32
    %c0_i32_1 = arith.constant 0 : i32
    return %c0_i32, %c0_i32_0 : i32, i32
  }
  func.func @transform_4(%arg0: i32) -> (i32, i32) {
    %c0_i32 = arith.constant 0 : i32
    %c0_i32_0 = arith.constant 0 : i32
    %c0_i32_1 = arith.constant 0 : i32
    return %c0_i32, %c0_i32_0 : i32, i32
  }
  func.func @transform_5(%arg0: i32) -> (i32, i32, i32) {
    %c0_i32 = arith.constant 0 : i32
    %c0_i32_0 = arith.constant 0 : i32
    %c0_i32_1 = arith.constant 0 : i32
    %c0_i32_2 = arith.constant 0 : i32
    return %c0_i32, %c0_i32_0, %c0_i32_1 : i32, i32, i32
  }
  func.func @transform_6(%arg0: i32) -> (i32, i32) {
    %c0_i32 = arith.constant 0 : i32
    %c0_i32_0 = arith.constant 0 : i32
    %c0_i32_1 = arith.constant 0 : i32
    return %c0_i32, %c0_i32_0 : i32, i32
  }
  func.func @transform_7(%arg0: i32) -> (i32, i32) {
    %c0_i32 = arith.constant 0 : i32
    %c0_i32_0 = arith.constant 0 : i32
    return %arg0, %c0_i32 : i32, i32
  }
}

</mosaic_0001>

<bundles_post_ra>
// kernel: cnn_forward.1
= control target key start
LH: loop header
LB: loop body
LE: loop exit
PB: predicated region body
PF: predicated region fallthrough
CT: control target
= control target key end

     0   :  { %vm346_vm0 = vcmask 261120   ;;  %s14031_s1 = inlined_call_operand.vmem [shape: bf16[160,512], index: 1, kind: input, shape index: {}]   ;;  %s14032_s0 = inlined_call_operand.vmem [shape: bf16[1,4,112,160], index: 0, kind: input, shape index: {}]   ;;  %s14033_s3 = inlined_call_operand.vmem [shape: bf16[1280,512], index: 3, kind: input, shape index: {}]   ;;  %s14034_s2 = inlined_call_operand.vmem [shape: f32[1,256], index: 2, kind: input, shape index: {}]   ;;  %s14035_s4 = inlined_call_operand.vmem [shape: f32[1,512], index: 4, kind: input, shape index: {}]   ;;  %s14036_s5 = inlined_call_operand.vmem [shape: bf16[7,256,128], index: 5, kind: input, shape index: {}]   ;;  %s14037_s6 = inlined_call_operand.vmem [shape: f32[1,128], index: 6, kind: input, shape index: {}]   ;;  %s14038_s7 = inlined_call_operand.vmem [shape: f32[16,128], index: 7, kind: output, shape index: {}]  }
   0x1   :  { %v10175_v0 = vld [vmem:[%s14031_s1 + $0x4] ss:$16 sps:$4 sm:$0xff]   ;;  %v10180_v1 = vld [vmem:[%s14031_s1 + $0xc] ss:$16 sps:$4 sm:$0xff]   ;;  %v10186_v2 = vld [vmem:[%s14031_s1] ss:$16 sps:$4 sm:$0xff]  }
   0x2   :  { %368 = vmatprep.subr.bf16.mxu0 %v10175_v0  ;;  %v10191_v3 = vld [vmem:[%s14031_s1 + $0x8] ss:$16 sps:$4 sm:$0xff]   ;;  %471 = vmatprep.subr.bf16.mxu1 %v10180_v1  ;;  %v10197_v4 = vld [vmem:[%s14031_s1 + $0x24] ss:$16 sps:$4 sm:$0xff]   ;;  %v10204_v5 = vld [vmem:[%s14031_s1 + $0x2c] ss:$16 sps:$4 sm:$0xff]  }
   0x3   :  { %369 = vmatpush1.bf16.msra.mxu0 %v10186_v2  ;;  %472 = vmatpush1.bf16.msra.mxu1 %v10191_v3  ;;  %v10209_v6 = vld [vmem:[%s14031_s1 + $0x20] ss:$16 sps:$4 sm:$0xff]   ;;  %v10215_v7 = vld [vmem:[%s14031_s1 + $0x28] ss:$16 sps:$4 sm:$0xff]   ;;  %v10221_v8 = vld [vmem:[%s14031_s1 + $0x44] ss:$16 sps:$4 sm:$0xff]  }
   0x4   :  { %370 = vmatprep.subr.bf16.mxu0 %v10197_v4  ;;  %473 = vmatprep.subr.bf16.mxu1 %v10204_v5  ;;  %v10226_v9 = vld [vmem:[%s14031_s1 + $0x4c] ss:$16 sps:$4 sm:$0xff]   ;;  %v10231_v10 = vld [vmem:[%s14031_s1 + $0x40] ss:$16 sps:$4 sm:$0xff]   ;;  %v10236_v11 = vld [vmem:[%s14031_s1 + $0x48] ss:$16 sps:$4 sm:$0xff]  }
   0x5   :  { %v10243_v12 = vld [vmem:[%s14031_s1 + $0x64] ss:$16 sps:$4 sm:$0xff]   ;;  %v10250_v13 = vld [vmem:[%s14031_s1 + $0x6c] ss:$16 sps:$4 sm:$0xff]   ;;  %v10255_v14 = vld [vmem:[%s14031_s1 + $0x60] ss:$16 sps:$4 sm:$0xff]  }
   0x6   :  { %v10262_v15 = vld [vmem:[%s14031_s1 + $0x68] ss:$16 sps:$4 sm:$0xff]   ;;  %v10267_v16 = vld [vmem:[%s14031_s1 + $0x84] ss:$16 sps:$4 sm:$0xff]   ;;  %v10274_v17 = vld [vmem:[%s14031_s1 + $0x8c] ss:$16 sps:$4 sm:$0xff]  }
   0x7   :  { %371 = vmatpush1.bf16.msra.mxu0 %v10209_v6  ;;  %474 = vmatpush1.bf16.msra.mxu1 %v10215_v7  ;;  %v10279_v18 = vld [vmem:[%s14031_s1 + $0x80] ss:$16 sps:$4 sm:$0xff]   ;;  %v10284_v19 = vld [vmem:[%s14031_s1 + $0x88] ss:$16 sps:$4 sm:$0xff]   ;;  %v10291_v20 = vld [vmem:[%s14031_s1 + $0xa4] ss:$16 sps:$4 sm:$0xff]  }
   0x8   :  { %372 = vmatprep.subr.bf16.mxu0 %v10221_v8  ;;  %475 = vmatprep.subr.bf16.mxu1 %v10226_v9  ;;  %v10298_v21 = vld [vmem:[%s14031_s1 + $0xac] ss:$16 sps:$4 sm:$0xff]   ;;  %v10303_v22 = vld [vmem:[%s14031_s1 + $0xa0] ss:$16 sps:$4 sm:$0xff]   ;;  %v10310_v23 = vld [vmem:[%s14031_s1 + $0xa8] ss:$16 sps:$4 sm:$0xff]  }
   0x9   :  { %v10315_v24 = vld [vmem:[%s14031_s1 + $0xc4] ss:$16 sps:$4 sm:$0xff]   ;;  %v10322_v25 = vld [vmem:[%s14031_s1 + $0xcc] ss:$16 sps:$4 sm:$0xff]   ;;  %v10327_v26 = vld [vmem:[%s14031_s1 + $0xc0] ss:$16 sps:$4 sm:$0xff]  }
   0xa   :  { %v10332_v27 = vld [vmem:[%s14031_s1 + $0xc8] ss:$16 sps:$4 sm:$0xff]   ;;  %v10339_v28 = vld [vmem:[%s14031_s1 + $0xe4] ss:$16 sps:$4 sm:$0xff]   ;;  %v10346_v29 = vld [vmem:[%s14031_s1 + $0xec] ss:$16 sps:$4 sm:$0xff]  }
   0xb   :  { %373 = vmatpush1.bf16.msra.mxu0 %v10231_v10  ;;  %476 = vmatpush1.bf16.msra.mxu1 %v10236_v11  ;;  %v10351_v30 = vld [vmem:[%s14031_s1 + $0xe0] ss:$16 sps:$4 sm:$0xff]   ;;  %v10356_v31 = vld [vmem:[%s14031_s1 + $0xe8] ss:$16 sps:$4 sm:$0xff]   ;;  %v9137_v32 = vld [vmem:[%s14032_s0 + $0x4] ss:$8 sps:$4 sm:$0xff]  }
   0xc   :  { %374 = vmatprep.subr.bf16.mxu0 %v10243_v12  ;;  %477 = vmatprep.subr.bf16.mxu1 %v10250_v13  ;;  %v10366_v33 = vld [vmem:[%s14031_s1 + $0x104] ss:$16 sps:$4 sm:$0xff]   ;;  %v10373_v34 = vld [vmem:[%s14031_s1 + $0x10c] ss:$16 sps:$4 sm:$0xff]   ;;  %v10380_v35 = vld [vmem:[%s14031_s1 + $0x100] ss:$16 sps:$4 sm:$0xff]  }
   0xd   :  { %7595 = vmatprep.mubr.msk.bf16.mxu0 %vm346_vm0, %v9137_v32  ;;  %7602 = vmatprep.mubr.msk.bf16.mxu1 %vm346_vm0, %v9137_v32  ;;  %v10385_v36 = vld [vmem:[%s14031_s1 + $0x108] ss:$16 sps:$4 sm:$0xff]   ;;  %v10392_v37 = vld [vmem:[%s14031_s1 + $0x124] ss:$16 sps:$4 sm:$0xff]   ;;  %v10399_v38 = vld [vmem:[%s14031_s1 + $0x12c] ss:$16 sps:$4 sm:$0xff]  }
   0xe   :  { %v10404_v39 = vld [vmem:[%s14031_s1 + $0x120] ss:$16 sps:$4 sm:$0xff]   ;;  %v10411_v40 = vld [vmem:[%s14031_s1 + $0x128] ss:$16 sps:$4 sm:$0xff]   ;;  %v9138_v42 = vld [vmem:[%s14032_s0 + $0x14] ss:$8 sps:$4 sm:$0xff]  }
   0xf   :  { %375 = vmatpush1.bf16.msra.mxu0 %v10255_v14  ;;  %478 = vmatpush1.bf16.msra.mxu1 %v10262_v15  ;;  %v9135_v41 = vld [vmem:[%s14032_s0] ss:$8 sps:$4 sm:$0xff]   ;;  %v9140_v43 = vld [vmem:[%s14032_s0 + $0x10] ss:$8 sps:$4 sm:$0xff]   ;;  %v9141_v44 = vld [vmem:[%s14032_s0 + $0x24] ss:$8 sps:$4 sm:$0xff]  }
  0x10   :  { %376 = vmatprep.subr.bf16.mxu0 %v10267_v16  ;;  %479 = vmatprep.subr.bf16.mxu1 %v10274_v17  ;;  %v9143_v45 = vld [vmem:[%s14032_s0 + $0x20] ss:$8 sps:$4 sm:$0xff]   ;;  %v9144_v46 = vld [vmem:[%s14032_s0 + $0x34] ss:$8 sps:$4 sm:$0xff]   ;;  %v9146_v47 = vld [vmem:[%s14032_s0 + $0x30] ss:$8 sps:$4 sm:$0xff]  }
  0x11   :  { %v9147_v48 = vld [vmem:[%s14032_s0 + $0x44] ss:$8 sps:$4 sm:$0xff]   ;;  %v9149_v49 = vld [vmem:[%s14032_s0 + $0x40] ss:$8 sps:$4 sm:$0xff]   ;;  %v9150_v50 = vld [vmem:[%s14032_s0 + $0x54] ss:$8 sps:$4 sm:$0xff]  }
  0x12   :  { %v9152_v51 = vld [vmem:[%s14032_s0 + $0x50] ss:$8 sps:$4 sm:$0xff]   ;;  %v9153_v52 = vld [vmem:[%s14032_s0 + $0x64] ss:$8 sps:$4 sm:$0xff]   ;;  %v9155_v53 = vld [vmem:[%s14032_s0 + $0x60] ss:$8 sps:$4 sm:$0xff]  }
  0x13   :  { %377 = vmatpush1.bf16.msra.mxu0 %v10279_v18  ;;  %480 = vmatpush1.bf16.msra.mxu1 %v10284_v19  ;;  %v9158_v54 = vld [vmem:[%s14032_s0 + $0x74] ss:$8 sps:$4 sm:$0xff]   ;;  %v9156_v55 = vld [vmem:[%s14032_s0 + $0x70] ss:$8 sps:$4 sm:$0xff]   ;;  %v9159_v56 = vld [vmem:[%s14032_s0 + $0x84] ss:$8 sps:$4 sm:$0xff]  }
  0x14   :  { %378 = vmatprep.subr.bf16.mxu0 %v10291_v20  ;;  %481 = vmatprep.subr.bf16.mxu1 %v10298_v21  ;;  %v9161_v57 = vld [vmem:[%s14032_s0 + $0x80] ss:$8 sps:$4 sm:$0xff]   ;;  %v9162_v58 = vld [vmem:[%s14032_s0 + $0x94] ss:$8 sps:$4 sm:$0xff]   ;;  %v9164_v59 = vld [vmem:[%s14032_s0 + $0x90] ss:$8 sps:$4 sm:$0xff]  }
  0x15   :  { %v9165_v60 = vld [vmem:[%s14032_s0 + $0xa4] ss:$8 sps:$4 sm:$0xff]   ;;  %v9167_v61 = vld [vmem:[%s14032_s0 + $0xa0] ss:$8 sps:$4 sm:$0xff]   ;;  %v9168_v62 = vld [vmem:[%s14032_s0 + $0xb4] ss:$8 sps:$4 sm:$0xff]  }
  0x16   :  { %v9170_v63 = vld [vmem:[%s14032_s0 + $0xb0] ss:$8 sps:$4 sm:$0xff]   ;;  %v9171_v32 = vld [vmem:[%s14032_s0 + $0xc4] ss:$8 sps:$4 sm:$0xff]  }
  0x17   :  { %379 = vmatpush1.bf16.msra.mxu0 %v10303_v22  ;;  %482 = vmatpush1.bf16.msra.mxu1 %v10310_v23 }
  0x18   :  { %380 = vmatprep.subr.bf16.mxu0 %v10315_v24  ;;  %483 = vmatprep.subr.bf16.mxu1 %v10322_v25 }
  0x1b   :  { %381 = vmatpush1.bf16.msra.mxu0 %v10327_v26  ;;  %484 = vmatpush1.bf16.msra.mxu1 %v10332_v27 }
  0x1c   :  { %382 = vmatprep.subr.bf16.mxu0 %v10339_v28  ;;  %485 = vmatprep.subr.bf16.mxu1 %v10346_v29 }
  0x1f   :  { %383 = vmatpush1.bf16.msra.mxu0 %v10351_v30  ;;  %486 = vmatpush1.bf16.msra.mxu1 %v10356_v31 }
  0x20   :  { %384 = vmatprep.subr.bf16.mxu0 %v10366_v33  ;;  %487 = vmatprep.subr.bf16.mxu1 %v10373_v34 }
  0x23   :  { %385 = vmatpush1.bf16.msra.mxu0 %v10380_v35  ;;  %488 = vmatpush1.bf16.msra.mxu1 %v10385_v36 }
  0x24   :  { %386 = vmatprep.subr.bf16.mxu0 %v10392_v37  ;;  %489 = vmatprep.subr.bf16.mxu1 %v10399_v38 }
  0x27   :  { %387 = vmatpush1.bf16.msra.mxu0 %v10404_v39  ;;  %490 = vmatpush1.bf16.msra.mxu1 %v10411_v40 }
  0x28   :  { %673 = vmatprep.subr.bf16.mxu0 %v10175_v0  ;;  %776 = vmatprep.subr.bf16.mxu1 %v10180_v1 }
  0x2a   :  { %401 = vmatmul.mubr.bf16.vlgmr.msra.gmra.mrb[0].mxu0 %v9135_v41  ;;  %504 = vmatmul.mubr.bf16.vlgmr.msra.gmra.mrb[0].mxu1 %v9135_v41  ;;  %v9173_v41 = vld [vmem:[%s14032_s0 + $0xc0] ss:$8 sps:$4 sm:$0xff]  }
  0x2b   :  { %674 = vmatpush1.bf16.msra.mxu0 %v10186_v2  ;;  %777 = vmatpush1.bf16.msra.mxu1 %v10191_v3 }
  0x2c   :  { %675 = vmatprep.subr.bf16.mxu0 %v10197_v4  ;;  %778 = vmatprep.subr.bf16.mxu1 %v10204_v5 }
  0x2d   :  { %7596 = vmatprep.mubr.msk.bf16.mxu0 %vm346_vm0, %v9138_v42  ;;  %7603 = vmatprep.mubr.msk.bf16.mxu1 %vm346_vm0, %v9138_v42  ;;  %v9174_v42 = vld [vmem:[%s14032_s0 + $0xd4] ss:$8 sps:$4 sm:$0xff]  }
  0x2f   :  { %676 = vmatpush1.bf16.msra.mxu0 %v10209_v6  ;;  %779 = vmatpush1.bf16.msra.mxu1 %v10215_v7 }
  0x30   :  { %677 = vmatprep.subr.bf16.mxu0 %v10221_v8  ;;  %780 = vmatprep.subr.bf16.mxu1 %v10226_v9 }
  0x32   :  { %411 = vmatmul.mubr.bf16.gmra.mrb[4].mxu0 %v9140_v43  ;;  %514 = vmatmul.mubr.bf16.gmra.mrb[4].mxu1 %v9140_v43  ;;  %v9176_v43 = vld [vmem:[%s14032_s0 + $0xd0] ss:$8 sps:$4 sm:$0xff]  }
  0x33   :  { %678 = vmatpush1.bf16.msra.mxu0 %v10231_v10  ;;  %781 = vmatpush1.bf16.msra.mxu1 %v10236_v11 }
  0x34   :  { %7597 = vmatprep.mubr.msk.bf16.mxu0 %vm346_vm0, %v9141_v44  ;;  %7604 = vmatprep.mubr.msk.bf16.mxu1 %vm346_vm0, %v9141_v44  ;;  %v9179_v44 = vld [vmem:[%s14032_s0 + $0xe4] ss:$8 sps:$4 sm:$0xff]  }
  0x35   :  { %679 = vmatprep.subr.bf16.mxu0 %v10243_v12  ;;  %782 = vmatprep.subr.bf16.mxu1 %v10250_v13 }
  0x37   :  { %680 = vmatpush1.bf16.msra.mxu0 %v10255_v14  ;;  %783 = vmatpush1.bf16.msra.mxu1 %v10262_v15 }
  0x38   :  { %681 = vmatprep.subr.bf16.mxu0 %v10267_v16  ;;  %784 = vmatprep.subr.bf16.mxu1 %v10274_v17 }
  0x3a   :  { %421 = vmatmul.mubr.bf16.gmra.mrb[8].mxu0 %v9143_v45  ;;  %524 = vmatmul.mubr.bf16.gmra.mrb[8].mxu1 %v9143_v45  ;;  %v9182_v45 = vld [vmem:[%s14032_s0 + $0xf0] ss:$8 sps:$4 sm:$0xff]  }
  0x3b   :  { %7598 = vmatprep.mubr.msk.bf16.mxu0 %vm346_vm0, %v9144_v46  ;;  %7605 = vmatprep.mubr.msk.bf16.mxu1 %vm346_vm0, %v9144_v46  ;;  %v9254_v46 = vld [vmem:[%s14033_s3 + $0xac] ss:$16 sps:$4 sm:$0xff]  }
  0x3c   :  { %682 = vmatpush1.bf16.msra.mxu0 %v10279_v18  ;;  %785 = vmatpush1.bf16.msra.mxu1 %v10284_v19 }
  0x3d   :  { %683 = vmatprep.subr.bf16.mxu0 %v10291_v20  ;;  %786 = vmatprep.subr.bf16.mxu1 %v10298_v21 }
  0x40   :  { %684 = vmatpush1.bf16.msra.mxu0 %v10303_v22  ;;  %787 = vmatpush1.bf16.msra.mxu1 %v10310_v23 }
  0x41   :  { %685 = vmatprep.subr.bf16.mxu0 %v10315_v24  ;;  %788 = vmatprep.subr.bf16.mxu1 %v10322_v25 }
  0x42   :  { %431 = vmatmul.mubr.bf16.gmra.mrb[12].mxu0 %v9146_v47  ;;  %534 = vmatmul.mubr.bf16.gmra.mrb[12].mxu1 %v9146_v47  ;;  %v9249_v47 = vld [vmem:[%s14033_s3 + $0xa0] ss:$16 sps:$4 sm:$0xff]  }
  0x43   :  { %7599 = vmatprep.mubr.msk.bf16.mxu0 %vm346_vm0, %v9147_v48  ;;  %7606 = vmatprep.mubr.msk.bf16.mxu1 %vm346_vm0, %v9147_v48  ;;  %v9252_v48 = vld [vmem:[%s14033_s3 + $0xa8] ss:$16 sps:$4 sm:$0xff]  }
  0x44   :  { %686 = vmatpush1.bf16.msra.mxu0 %v10327_v26  ;;  %789 = vmatpush1.bf16.msra.mxu1 %v10332_v27 }
  0x45   :  { %687 = vmatprep.subr.bf16.mxu0 %v10339_v28  ;;  %790 = vmatprep.subr.bf16.mxu1 %v10346_v29 }
  0x48   :  { %688 = vmatpush1.bf16.msra.mxu0 %v10351_v30  ;;  %791 = vmatpush1.bf16.msra.mxu1 %v10356_v31 }
  0x49   :  { %689 = vmatprep.subr.bf16.mxu0 %v10366_v33  ;;  %792 = vmatprep.subr.bf16.mxu1 %v10373_v34 }
  0x4a   :  { %441 = vmatmul.mubr.bf16.gmra.mrb[16].mxu0 %v9149_v49  ;;  %544 = vmatmul.mubr.bf16.gmra.mrb[16].mxu1 %v9149_v49  ;;  %v9209_v49 = vld [vmem:[%s14032_s0 + $0x180] ss:$8 sps:$4 sm:$0xff]  }
  0x4b   :  { %7600 = vmatprep.mubr.msk.bf16.mxu0 %vm346_vm0, %v9150_v50  ;;  %7607 = vmatprep.mubr.msk.bf16.mxu1 %vm346_vm0, %v9150_v50  ;;  %v9210_v50 = vld [vmem:[%s14032_s0 + $0x194] ss:$8 sps:$4 sm:$0xff]  }
  0x4c   :  { %690 = vmatpush1.bf16.msra.mxu0 %v10380_v35  ;;  %793 = vmatpush1.bf16.msra.mxu1 %v10385_v36 }
  0x4d   :  { %691 = vmatprep.subr.bf16.mxu0 %v10392_v37  ;;  %794 = vmatprep.subr.bf16.mxu1 %v10399_v38 }
  0x50   :  { %692 = vmatpush1.bf16.msra.mxu0 %v10404_v39  ;;  %795 = vmatpush1.bf16.msra.mxu1 %v10411_v40 }
  0x51   :  { %1213 = vmatprep.subr.bf16.mxu0 %v10175_v0  ;;  %1316 = vmatprep.subr.bf16.mxu1 %v10180_v1 }
  0x52   :  { %451 = vmatmul.mubr.bf16.gmra.mrb[20].mxu0 %v9152_v51  ;;  %554 = vmatmul.mubr.bf16.gmra.mrb[20].mxu1 %v9152_v51  ;;  %v9257_v51 = vld [vmem:[%s14033_s3 + $0xc4] ss:$16 sps:$4 sm:$0xff]  }
  0x53   :  { %7601 = vmatprep.mubr.msk.bf16.mxu0 %vm346_vm0, %v9153_v52  ;;  %7608 = vmatprep.mubr.msk.bf16.mxu1 %vm346_vm0, %v9153_v52  ;;  %v9260_v52 = vld [vmem:[%s14033_s3 + $0xcc] ss:$16 sps:$4 sm:$0xff]  }
  0x5a   :  { %461 = vmatmul.mubr.bf16.gmra.mrb[24].mxu0 %v9155_v53  ;;  %564 = vmatmul.mubr.bf16.gmra.mrb[24].mxu1 %v9155_v53  ;;  %v9255_v53 = vld [vmem:[%s14033_s3 + $0xc0] ss:$16 sps:$4 sm:$0xff]  }
  0x5b   :  { %7637 = vmatprep.mubr.msk.bf16.mxu0 %vm346_vm0, %v9158_v54  ;;  %7644 = vmatprep.mubr.msk.bf16.mxu1 %vm346_vm0, %v9158_v54  ;;  %v9258_v54 = vld [vmem:[%s14033_s3 + $0xc8] ss:$16 sps:$4 sm:$0xff]  }
  0x62   :  { %706 = vmatmul.mubr.bf16.vlgmr.msra.gmra.mrb[28].mxu0 %v9156_v55  ;;  %809 = vmatmul.mubr.bf16.vlgmr.msra.gmra.mrb[28].mxu1 %v9156_v55  ;;  %v9263_v55 = vld [vmem:[%s14033_s3 + $0xe4] ss:$16 sps:$4 sm:$0xff]  }
  0x63   :  { %1214 = vmatpush1.bf16.msra.mxu0 %v10186_v2  ;;  %1317 = vmatpush1.bf16.msra.mxu1 %v10191_v3 }
  0x64   :  { %1215 = vmatprep.subr.bf16.mxu0 %v10197_v4  ;;  %1318 = vmatprep.subr.bf16.mxu1 %v10204_v5 }
  0x65   :  { %7638 = vmatprep.mubr.msk.bf16.mxu0 %vm346_vm0, %v9159_v56  ;;  %7645 = vmatprep.mubr.msk.bf16.mxu1 %vm346_vm0, %v9159_v56  ;;  %v9266_v56 = vld [vmem:[%s14033_s3 + $0xec] ss:$16 sps:$4 sm:$0xff]  }
  0x67   :  { %1216 = vmatpush1.bf16.msra.mxu0 %v10209_v6  ;;  %1319 = vmatpush1.bf16.msra.mxu1 %v10215_v7 }
  0x68   :  { %1217 = vmatprep.subr.bf16.mxu0 %v10221_v8  ;;  %1320 = vmatprep.subr.bf16.mxu1 %v10226_v9 }
  0x6a   :  { %716 = vmatmul.mubr.bf16.gmra.mrb[32].mxu0 %v9161_v57  ;;  %819 = vmatmul.mubr.bf16.gmra.mrb[32].mxu1 %v9161_v57  ;;  %v9261_v57 = vld [vmem:[%s14033_s3 + $0xe0] ss:$16 sps:$4 sm:$0xff]  }
  0x6b   :  { %1218 = vmatpush1.bf16.msra.mxu0 %v10231_v10  ;;  %1321 = vmatpush1.bf16.msra.mxu1 %v10236_v11 }
  0x6c   :  { %7639 = vmatprep.mubr.msk.bf16.mxu0 %vm346_vm0, %v9162_v58  ;;  %7646 = vmatprep.mubr.msk.bf16.mxu1 %vm346_vm0, %v9162_v58  ;;  %v9264_v58 = vld [vmem:[%s14033_s3 + $0xe8] ss:$16 sps:$4 sm:$0xff]  }
  0x6d   :  { %1219 = vmatprep.subr.bf16.mxu0 %v10243_v12  ;;  %1322 = vmatprep.subr.bf16.mxu1 %v10250_v13 }
  0x6f   :  { %1220 = vmatpush1.bf16.msra.mxu0 %v10255_v14  ;;  %1323 = vmatpush1.bf16.msra.mxu1 %v10262_v15 }
  0x70   :  { %1221 = vmatprep.subr.bf16.mxu0 %v10267_v16  ;;  %1324 = vmatprep.subr.bf16.mxu1 %v10274_v17 }
  0x72   :  { %726 = vmatmul.mubr.bf16.gmra.mrb[36].mxu0 %v9164_v59  ;;  %829 = vmatmul.mubr.bf16.gmra.mrb[36].mxu1 %v9164_v59  ;;  %v9212_v59 = vld [vmem:[%s14032_s0 + $0x190] ss:$8 sps:$4 sm:$0xff]  }
  0x73   :  { %7640 = vmatprep.mubr.msk.bf16.mxu0 %vm346_vm0, %v9165_v60  ;;  %7647 = vmatprep.mubr.msk.bf16.mxu1 %vm346_vm0, %v9165_v60  ;;  %v9213_v60 = vld [vmem:[%s14032_s0 + $0x1a4] ss:$8 sps:$4 sm:$0xff]  }
  0x74   :  { %1222 = vmatpush1.bf16.msra.mxu0 %v10279_v18  ;;  %1325 = vmatpush1.bf16.msra.mxu1 %v10284_v19 }
  0x75   :  { %1223 = vmatprep.subr.bf16.mxu0 %v10291_v20  ;;  %1326 = vmatprep.subr.bf16.mxu1 %v10298_v21 }
  0x78   :  { %1224 = vmatpush1.bf16.msra.mxu0 %v10303_v22  ;;  %1327 = vmatpush1.bf16.msra.mxu1 %v10310_v23 }
  0x79   :  { %1225 = vmatprep.subr.bf16.mxu0 %v10315_v24  ;;  %1328 = vmatprep.subr.bf16.mxu1 %v10322_v25 }
  0x7a   :  { %736 = vmatmul.mubr.bf16.gmra.mrb[40].mxu0 %v9167_v61  ;;  %839 = vmatmul.mubr.bf16.gmra.mrb[40].mxu1 %v9167_v61  ;;  %v9269_v61 = vld [vmem:[%s14033_s3 + $0x104] ss:$16 sps:$4 sm:$0xff]  }
  0x7b   :  { %7641 = vmatprep.mubr.msk.bf16.mxu0 %vm346_vm0, %v9168_v62  ;;  %7648 = vmatprep.mubr.msk.bf16.mxu1 %vm346_vm0, %v9168_v62  ;;  %v9272_v62 = vld [vmem:[%s14033_s3 + $0x10c] ss:$16 sps:$4 sm:$0xff]  }
  0x7c   :  { %1226 = vmatpush1.bf16.msra.mxu0 %v10327_v26  ;;  %1329 = vmatpush1.bf16.msra.mxu1 %v10332_v27 }
  0x7d   :  { %1227 = vmatprep.subr.bf16.mxu0 %v10339_v28  ;;  %1330 = vmatprep.subr.bf16.mxu1 %v10346_v29 }
  0x80   :  { %1228 = vmatpush1.bf16.msra.mxu0 %v10351_v30  ;;  %1331 = vmatpush1.bf16.msra.mxu1 %v10356_v31 }
  0x81   :  { %1229 = vmatprep.subr.bf16.mxu0 %v10366_v33  ;;  %1332 = vmatprep.subr.bf16.mxu1 %v10373_v34 }
  0x82   :  { %746 = vmatmul.mubr.bf16.gmra.mrb[44].mxu0 %v9170_v63  ;;  %849 = vmatmul.mubr.bf16.gmra.mrb[44].mxu1 %v9170_v63  ;;  %v9267_v63 = vld [vmem:[%s14033_s3 + $0x100] ss:$16 sps:$4 sm:$0xff]  }
  0x83   :  { %7642 = vmatprep.mubr.msk.bf16.mxu0 %vm346_vm0, %v9171_v32  ;;  %7649 = vmatprep.mubr.msk.bf16.mxu1 %vm346_vm0, %v9171_v32  ;;  %v9270_v32 = vld [vmem:[%s14033_s3 + $0x108] ss:$16 sps:$4 sm:$0xff]  }
  0x84   :  { %1230 = vmatpush1.bf16.msra.mxu0 %v10380_v35  ;;  %1333 = vmatpush1.bf16.msra.mxu1 %v10385_v36 }
  0x85   :  { %1231 = vmatprep.subr.bf16.mxu0 %v10392_v37  ;;  %1334 = vmatprep.subr.bf16.mxu1 %v10399_v38 }
  0x88   :  { %1232 = vmatpush1.bf16.msra.mxu0 %v10404_v39  ;;  %1335 = vmatpush1.bf16.msra.mxu1 %v10411_v40 }
  0x89   :  { %1518 = vmatprep.subr.bf16.mxu0 %v10175_v0  ;;  %1621 = vmatprep.subr.bf16.mxu1 %v10180_v1  ;;  %v9177_v0 = vld [vmem:[%s14032_s0 + $0xe0] ss:$8 sps:$4 sm:$0xff]   ;;  %v9180_v1 = vld [vmem:[%s14032_s0 + $0xf4] ss:$8 sps:$4 sm:$0xff]  }
  0x8a   :  { %756 = vmatmul.mubr.bf16.gmra.mrb[48].mxu0 %v9173_v41  ;;  %859 = vmatmul.mubr.bf16.gmra.mrb[48].mxu1 %v9173_v41  ;;  %v9275_v41 = vld [vmem:[%s14033_s3 + $0x124] ss:$16 sps:$4 sm:$0xff]  }
  0x8b   :  { %7643 = vmatprep.mubr.msk.bf16.mxu0 %vm346_vm0, %v9174_v42  ;;  %7650 = vmatprep.mubr.msk.bf16.mxu1 %vm346_vm0, %v9174_v42  ;;  %v9278_v42 = vld [vmem:[%s14033_s3 + $0x12c] ss:$16 sps:$4 sm:$0xff]  }
  0x92   :  { %766 = vmatmul.mubr.bf16.gmra.mrb[52].mxu0 %v9176_v43  ;;  %869 = vmatmul.mubr.bf16.gmra.mrb[52].mxu1 %v9176_v43  ;;  %v9273_v43 = vld [vmem:[%s14033_s3 + $0x120] ss:$16 sps:$4 sm:$0xff]  }
  0x93   :  { %7679 = vmatprep.mubr.msk.bf16.mxu0 %vm346_vm0, %v9179_v44  ;;  %7686 = vmatprep.mubr.msk.bf16.mxu1 %vm346_vm0, %v9179_v44  ;;  %v9276_v44 = vld [vmem:[%s14033_s3 + $0x128] ss:$16 sps:$4 sm:$0xff]  }
  0x9a   :  { %1246 = vmatmul.mubr.bf16.vlgmr.msra.gmra.mrb[56].mxu0 %v9177_v0  ;;  %1349 = vmatmul.mubr.bf16.vlgmr.msra.gmra.mrb[56].mxu1 %v9177_v0  ;;  %v9281_v0 = vld [vmem:[%s14033_s3 + $0x144] ss:$16 sps:$4 sm:$0xff]  }
  0x9b   :  { %1519 = vmatpush1.bf16.msra.mxu0 %v10186_v2  ;;  %1622 = vmatpush1.bf16.msra.mxu1 %v10191_v3  ;;  %v9183_v2 = vld [vmem:[%s14032_s0 + $0x104] ss:$8 sps:$4 sm:$0xff]   ;;  %v9185_v3 = vld [vmem:[%s14032_s0 + $0x100] ss:$8 sps:$4 sm:$0xff]  }
  0x9c   :  { %1520 = vmatprep.subr.bf16.mxu0 %v10197_v4  ;;  %1623 = vmatprep.subr.bf16.mxu1 %v10204_v5  ;;  %v9186_v4 = vld [vmem:[%s14032_s0 + $0x114] ss:$8 sps:$4 sm:$0xff]   ;;  %v9188_v5 = vld [vmem:[%s14032_s0 + $0x110] ss:$8 sps:$4 sm:$0xff]  }
  0x9d   :  { %7680 = vmatprep.mubr.msk.bf16.mxu0 %vm346_vm0, %v9180_v1  ;;  %7687 = vmatprep.mubr.msk.bf16.mxu1 %vm346_vm0, %v9180_v1  ;;  %v9284_v1 = vld [vmem:[%s14033_s3 + $0x14c] ss:$16 sps:$4 sm:$0xff]  }
  0x9f   :  { %1521 = vmatpush1.bf16.msra.mxu0 %v10209_v6  ;;  %1624 = vmatpush1.bf16.msra.mxu1 %v10215_v7  ;;  %v9189_v6 = vld [vmem:[%s14032_s0 + $0x124] ss:$8 sps:$4 sm:$0xff]   ;;  %v9191_v7 = vld [vmem:[%s14032_s0 + $0x120] ss:$8 sps:$4 sm:$0xff]  }
  0xa0   :  { %1522 = vmatprep.subr.bf16.mxu0 %v10221_v8  ;;  %1625 = vmatprep.subr.bf16.mxu1 %v10226_v9  ;;  %v9192_v8 = vld [vmem:[%s14032_s0 + $0x134] ss:$8 sps:$4 sm:$0xff]  }
  0xa1   :  { %v9218_v9 = vld [vmem:[%s14033_s3 + $0x4] ss:$16 sps:$4 sm:$0xff]  }
  0xa2   :  { %1256 = vmatmul.mubr.bf16.gmra.mrb[60].mxu0 %v9182_v45  ;;  %1359 = vmatmul.mubr.bf16.gmra.mrb[60].mxu1 %v9182_v45  ;;  %v9215_v45 = vld [vmem:[%s14032_s0 + $0x1a0] ss:$8 sps:$4 sm:$0xff]  }
  0xa3   :  { %1523 = vmatpush1.bf16.msra.mxu0 %v10231_v10  ;;  %1626 = vmatpush1.bf16.msra.mxu1 %v10236_v11  ;;  %v9221_v10 = vld [vmem:[%s14033_s3 + $0xc] ss:$16 sps:$4 sm:$0xff]   ;;  %v9194_v11 = vld [vmem:[%s14032_s0 + $0x130] ss:$8 sps:$4 sm:$0xff]  }
  0xa4   :  { %7681 = vmatprep.mubr.msk.bf16.mxu0 %vm346_vm0, %v9183_v2  ;;  %7688 = vmatprep.mubr.msk.bf16.mxu1 %vm346_vm0, %v9183_v2  ;;  %v9228_v2 = vld [vmem:[%s14032_s0 + $0x1b4] ss:$8 sps:$4 sm:$0xff]  }
  0xa5   :  { %1524 = vmatprep.subr.bf16.mxu0 %v10243_v12  ;;  %1627 = vmatprep.subr.bf16.mxu1 %v10250_v13  ;;  %v9195_v12 = vld [vmem:[%s14032_s0 + $0x144] ss:$8 sps:$4 sm:$0xff]   ;;  %v9197_v13 = vld [vmem:[%s14032_s0 + $0x140] ss:$8 sps:$4 sm:$0xff]  }
  0xa7   :  { %1525 = vmatpush1.bf16.msra.mxu0 %v10255_v14  ;;  %1628 = vmatpush1.bf16.msra.mxu1 %v10262_v15  ;;  %v9200_v14 = vld [vmem:[%s14032_s0 + $0x154] ss:$8 sps:$4 sm:$0xff]   ;;  %v9198_v15 = vld [vmem:[%s14032_s0 + $0x150] ss:$8 sps:$4 sm:$0xff]  }
  0xa8   :  { %1526 = vmatprep.subr.bf16.mxu0 %v10267_v16  ;;  %1629 = vmatprep.subr.bf16.mxu1 %v10274_v17  ;;  %v9201_v16 = vld [vmem:[%s14032_s0 + $0x164] ss:$8 sps:$4 sm:$0xff]   ;;  %v9216_v17 = vld [vmem:[%s14033_s3] ss:$16 sps:$4 sm:$0xff]  }
  0xaa   :  { %1266 = vmatmul.mubr.bf16.gmra.mrb[64].mxu0 %v9185_v3  ;;  %1369 = vmatmul.mubr.bf16.gmra.mrb[64].mxu1 %v9185_v3  ;;  %v9279_v3 = vld [vmem:[%s14033_s3 + $0x140] ss:$16 sps:$4 sm:$0xff]  }
  0xab   :  { %7682 = vmatprep.mubr.msk.bf16.mxu0 %vm346_vm0, %v9186_v4  ;;  %7689 = vmatprep.mubr.msk.bf16.mxu1 %vm346_vm0, %v9186_v4  ;;  %v9282_v4 = vld [vmem:[%s14033_s3 + $0x148] ss:$16 sps:$4 sm:$0xff]  }
  0xac   :  { %1527 = vmatpush1.bf16.msra.mxu0 %v10279_v18  ;;  %1630 = vmatpush1.bf16.msra.mxu1 %v10284_v19  ;;  %v9219_v18 = vld [vmem:[%s14033_s3 + $0x8] ss:$16 sps:$4 sm:$0xff]   ;;  %v9224_v19 = vld [vmem:[%s14033_s3 + $0x24] ss:$16 sps:$4 sm:$0xff]  }
  0xad   :  { %1528 = vmatprep.subr.bf16.mxu0 %v10291_v20  ;;  %1631 = vmatprep.subr.bf16.mxu1 %v10298_v21  ;;  %v9227_v20 = vld [vmem:[%s14033_s3 + $0x2c] ss:$16 sps:$4 sm:$0xff]   ;;  %v9222_v21 = vld [vmem:[%s14033_s3 + $0x20] ss:$16 sps:$4 sm:$0xff]  }
  0xb0   :  { %1529 = vmatpush1.bf16.msra.mxu0 %v10303_v22  ;;  %1632 = vmatpush1.bf16.msra.mxu1 %v10310_v23  ;;  %v9225_v22 = vld [vmem:[%s14033_s3 + $0x28] ss:$16 sps:$4 sm:$0xff]   ;;  %v9233_v23 = vld [vmem:[%s14033_s3 + $0x44] ss:$16 sps:$4 sm:$0xff]  }
  0xb1   :  { %1530 = vmatprep.subr.bf16.mxu0 %v10315_v24  ;;  %1633 = vmatprep.subr.bf16.mxu1 %v10322_v25  ;;  %v9236_v24 = vld [vmem:[%s14033_s3 + $0x4c] ss:$16 sps:$4 sm:$0xff]   ;;  %v9203_v25 = vld [vmem:[%s14032_s0 + $0x160] ss:$8 sps:$4 sm:$0xff]  }
  0xb2   :  { %1276 = vmatmul.mubr.bf16.gmra.mrb[68].mxu0 %v9188_v5  ;;  %1379 = vmatmul.mubr.bf16.gmra.mrb[68].mxu1 %v9188_v5  ;;  %v9287_v5 = vld [vmem:[%s14033_s3 + $0x164] ss:$16 sps:$4 sm:$0xff]  }
  0xb3   :  { %7683 = vmatprep.mubr.msk.bf16.mxu0 %vm346_vm0, %v9189_v6  ;;  %7690 = vmatprep.mubr.msk.bf16.mxu1 %vm346_vm0, %v9189_v6  ;;  %v9290_v6 = vld [vmem:[%s14033_s3 + $0x16c] ss:$16 sps:$4 sm:$0xff]  }
  0xb4   :  { %1531 = vmatpush1.bf16.msra.mxu0 %v10327_v26  ;;  %1634 = vmatpush1.bf16.msra.mxu1 %v10332_v27  ;;  %v9204_v26 = vld [vmem:[%s14032_s0 + $0x174] ss:$8 sps:$4 sm:$0xff]   ;;  %v9231_v27 = vld [vmem:[%s14033_s3 + $0x40] ss:$16 sps:$4 sm:$0xff]  }
  0xb5   :  { %1532 = vmatprep.subr.bf16.mxu0 %v10339_v28  ;;  %1635 = vmatprep.subr.bf16.mxu1 %v10346_v29  ;;  %v9234_v28 = vld [vmem:[%s14033_s3 + $0x48] ss:$16 sps:$4 sm:$0xff]   ;;  %v9239_v29 = vld [vmem:[%s14033_s3 + $0x64] ss:$16 sps:$4 sm:$0xff]  }
  0xb8   :  { %1533 = vmatpush1.bf16.msra.mxu0 %v10351_v30  ;;  %1636 = vmatpush1.bf16.msra.mxu1 %v10356_v31  ;;  %v9242_v30 = vld [vmem:[%s14033_s3 + $0x6c] ss:$16 sps:$4 sm:$0xff]   ;;  %v9237_v31 = vld [vmem:[%s14033_s3 + $0x60] ss:$16 sps:$4 sm:$0xff]  }
  0xb9   :  { %1534 = vmatprep.subr.bf16.mxu0 %v10366_v33  ;;  %1637 = vmatprep.subr.bf16.mxu1 %v10373_v34  ;;  %v9240_v33 = vld [vmem:[%s14033_s3 + $0x68] ss:$16 sps:$4 sm:$0xff]   ;;  %v9245_v34 = vld [vmem:[%s14033_s3 + $0x84] ss:$16 sps:$4 sm:$0xff]  }
  0xba   :  { %1286 = vmatmul.mubr.bf16.gmra.mrb[72].mxu0 %v9191_v7  ;;  %1389 = vmatmul.mubr.bf16.gmra.mrb[72].mxu1 %v9191_v7  ;;  %v9285_v7 = vld [vmem:[%s14033_s3 + $0x160] ss:$16 sps:$4 sm:$0xff]  }
  0xbb   :  { %7684 = vmatprep.mubr.msk.bf16.mxu0 %vm346_vm0, %v9192_v8  ;;  %7691 = vmatprep.mubr.msk.bf16.mxu1 %vm346_vm0, %v9192_v8  ;;  %v9288_v8 = vld [vmem:[%s14033_s3 + $0x168] ss:$16 sps:$4 sm:$0xff]  }
  0xbc   :  { %1535 = vmatpush1.bf16.msra.mxu0 %v10380_v35  ;;  %1638 = vmatpush1.bf16.msra.mxu1 %v10385_v36  ;;  %v9248_v35 = vld [vmem:[%s14033_s3 + $0x8c] ss:$16 sps:$4 sm:$0xff]   ;;  %v9206_v36 = vld [vmem:[%s14032_s0 + $0x170] ss:$8 sps:$4 sm:$0xff]  }
  0xbd   :  { %1536 = vmatprep.subr.bf16.mxu0 %v10392_v37  ;;  %1639 = vmatprep.subr.bf16.mxu1 %v10399_v38  ;;  %v9207_v37 = vld [vmem:[%s14032_s0 + $0x184] ss:$8 sps:$4 sm:$0xff]   ;;  %v9243_v38 = vld [vmem:[%s14033_s3 + $0x80] ss:$16 sps:$4 sm:$0xff]  }
  0xc0   :  { %1537 = vmatpush1.bf16.msra.mxu0 %v10404_v39  ;;  %1640 = vmatpush1.bf16.msra.mxu1 %v10411_v40  ;;  %v9246_v39 = vld [vmem:[%s14033_s3 + $0x88] ss:$16 sps:$4 sm:$0xff]   ;;  %v9251_v40 = vld [vmem:[%s14033_s3 + $0xa4] ss:$16 sps:$4 sm:$0xff]  }
  0xc1   :  { %3959 = vmatprep.subr.bf16.mxu0 %v9218_v9  ;;  %4474 = vmatprep.subr.bf16.mxu1 %v9221_v10 }
  0xc2   :  { %1296 = vmatmul.mubr.bf16.gmra.mrb[76].mxu0 %v9194_v11  ;;  %1399 = vmatmul.mubr.bf16.gmra.mrb[76].mxu1 %v9194_v11  ;;  %v9293_v11 = vld [vmem:[%s14033_s3 + $0x184] ss:$16 sps:$4 sm:$0xff]  }
  0xc3   :  { %7685 = vmatprep.mubr.msk.bf16.mxu0 %vm346_vm0, %v9195_v12  ;;  %7692 = vmatprep.mubr.msk.bf16.mxu1 %vm346_vm0, %v9195_v12  ;;  %v9296_v12 = vld [vmem:[%s14033_s3 + $0x18c] ss:$16 sps:$4 sm:$0xff]  }
  0xca   :  { %1306 = vmatmul.mubr.bf16.gmra.mrb[80].mxu0 %v9197_v13  ;;  %1409 = vmatmul.mubr.bf16.gmra.mrb[80].mxu1 %v9197_v13 }
  0xcb   :  { %7721 = vmatprep.mubr.msk.bf16.mxu0 %vm346_vm0, %v9200_v14  ;;  %7728 = vmatprep.mubr.msk.bf16.mxu1 %vm346_vm0, %v9200_v14 }
  0xd2   :  { %1551 = vmatmul.mubr.bf16.vlgmr.msra.gmra.mrb[84].mxu0 %v9198_v15  ;;  %1654 = vmatmul.mubr.bf16.vlgmr.msra.gmra.mrb[84].mxu1 %v9198_v15  ;;  %v9230_v15 = vld [vmem:[%s14032_s0 + $0x1b0] ss:$8 sps:$4 sm:$0xff]  }
  0xd3   :  { %7722 = vmatprep.mubr.msk.bf16.mxu0 %vm346_vm0, %v9201_v16  ;;  %7729 = vmatprep.mubr.msk.bf16.mxu1 %vm346_vm0, %v9201_v16  ;;  %v9291_v16 = vld [vmem:[%s14033_s3 + $0x180] ss:$16 sps:$4 sm:$0xff]  }
  0xd4   :  { %3960 = vmatpush1.bf16.msra.mxu0 %v9216_v17  ;;  %4475 = vmatpush1.bf16.msra.mxu1 %v9219_v18 }
  0xd5   :  { %3961 = vmatprep.subr.bf16.mxu0 %v9224_v19  ;;  %4476 = vmatprep.subr.bf16.mxu1 %v9227_v20 }
  0xd8   :  { %3962 = vmatpush1.bf16.msra.mxu0 %v9222_v21  ;;  %4477 = vmatpush1.bf16.msra.mxu1 %v9225_v22  ;;  %v9294_v21 = vld [vmem:[%s14033_s3 + $0x188] ss:$16 sps:$4 sm:$0xff]   ;;  %v9299_v22 = vld [vmem:[%s14033_s3 + $0x1a4] ss:$16 sps:$4 sm:$0xff]  }
  0xd9   :  { %3963 = vmatprep.subr.bf16.mxu0 %v9233_v23  ;;  %4478 = vmatprep.subr.bf16.mxu1 %v9236_v24  ;;  %v9302_v23 = vld [vmem:[%s14033_s3 + $0x1ac] ss:$16 sps:$4 sm:$0xff]   ;;  %v9297_v24 = vld [vmem:[%s14033_s3 + $0x1a0] ss:$16 sps:$4 sm:$0xff]  }
  0xda   :  { %1561 = vmatmul.mubr.bf16.gmra.mrb[88].mxu0 %v9203_v25  ;;  %1664 = vmatmul.mubr.bf16.gmra.mrb[88].mxu1 %v9203_v25  ;;  %v9300_v25 = vld [vmem:[%s14033_s3 + $0x1a8] ss:$16 sps:$4 sm:$0xff]  }
  0xdb   :  { %7723 = vmatprep.mubr.msk.bf16.mxu0 %vm346_vm0, %v9204_v26  ;;  %7730 = vmatprep.mubr.msk.bf16.mxu1 %vm346_vm0, %v9204_v26  ;;  %v14039_v26 = vmov 0  }
  0xdc   :  { %3964 = vmatpush1.bf16.msra.mxu0 %v9231_v27  ;;  %4479 = vmatpush1.bf16.msra.mxu1 %v9234_v28 }
  0xdd   :  { %3965 = vmatprep.subr.bf16.mxu0 %v9239_v29  ;;  %4480 = vmatprep.subr.bf16.mxu1 %v9242_v30  ;;  %v9305_v29 = vld [vmem:[%s14033_s3 + $0x1c4] ss:$16 sps:$4 sm:$0xff]   ;;  %v9308_v30 = vld [vmem:[%s14033_s3 + $0x1cc] ss:$16 sps:$4 sm:$0xff]  }
  0xe0   :  { %3966 = vmatpush1.bf16.msra.mxu0 %v9237_v31  ;;  %4481 = vmatpush1.bf16.msra.mxu1 %v9240_v33 }
  0xe1   :  { %3967 = vmatprep.subr.bf16.mxu0 %v9245_v34  ;;  %4482 = vmatprep.subr.bf16.mxu1 %v9248_v35 }
  0xe2   :  { %1571 = vmatmul.mubr.bf16.gmra.mrb[92].mxu0 %v9206_v36  ;;  %1674 = vmatmul.mubr.bf16.gmra.mrb[92].mxu1 %v9206_v36 }
  0xe3   :  { %7724 = vmatprep.mubr.msk.bf16.mxu0 %vm346_vm0, %v9207_v37  ;;  %7731 = vmatprep.mubr.msk.bf16.mxu1 %vm346_vm0, %v9207_v37 }
  0xe4   :  { %3968 = vmatpush1.bf16.msra.mxu0 %v9243_v38  ;;  %4483 = vmatpush1.bf16.msra.mxu1 %v9246_v39  ;;  %v9303_v38 = vld [vmem:[%s14033_s3 + $0x1c0] ss:$16 sps:$4 sm:$0xff]   ;;  %v9306_v39 = vld [vmem:[%s14033_s3 + $0x1c8] ss:$16 sps:$4 sm:$0xff]  }
  0xe5   :  { %3969 = vmatprep.subr.bf16.mxu0 %v9251_v40  ;;  %4484 = vmatprep.subr.bf16.mxu1 %v9254_v46  ;;  %v9311_v40 = vld [vmem:[%s14033_s3 + $0x1e4] ss:$16 sps:$4 sm:$0xff]   ;;  %v9314_v46 = vld [vmem:[%s14033_s3 + $0x1ec] ss:$16 sps:$4 sm:$0xff]  }
  0xe8   :  { %3970 = vmatpush1.bf16.msra.mxu0 %v9249_v47  ;;  %4485 = vmatpush1.bf16.msra.mxu1 %v9252_v48  ;;  %v9309_v47 = vld [vmem:[%s14033_s3 + $0x1e0] ss:$16 sps:$4 sm:$0xff]   ;;  %v9312_v48 = vld [vmem:[%s14033_s3 + $0x1e8] ss:$16 sps:$4 sm:$0xff]  }
  0xe9   :  { %3971 = vmatprep.subr.bf16.mxu0 %v9257_v51  ;;  %4486 = vmatprep.subr.bf16.mxu1 %v9260_v52  ;;  %v9317_v51 = vld [vmem:[%s14033_s3 + $0x204] ss:$16 sps:$4 sm:$0xff]   ;;  %v9320_v52 = vld [vmem:[%s14033_s3 + $0x20c] ss:$16 sps:$4 sm:$0xff]  }
  0xea   :  { %1581 = vmatmul.mubr.bf16.gmra.mrb[96].mxu0 %v9209_v49  ;;  %1684 = vmatmul.mubr.bf16.gmra.mrb[96].mxu1 %v9209_v49 }
  0xeb   :  { %7725 = vmatprep.mubr.msk.bf16.mxu0 %vm346_vm0, %v9210_v50  ;;  %7732 = vmatprep.mubr.msk.bf16.mxu1 %vm346_vm0, %v9210_v50 }
  0xec   :  { %3972 = vmatpush1.bf16.msra.mxu0 %v9255_v53  ;;  %4487 = vmatpush1.bf16.msra.mxu1 %v9258_v54 }
  0xed   :  { %3973 = vmatprep.subr.bf16.mxu0 %v9263_v55  ;;  %4488 = vmatprep.subr.bf16.mxu1 %v9266_v56 }
  0xf0   :  { %3974 = vmatpush1.bf16.msra.mxu0 %v9261_v57  ;;  %4489 = vmatpush1.bf16.msra.mxu1 %v9264_v58 }
  0xf1   :  { %3975 = vmatprep.subr.bf16.mxu0 %v9269_v61  ;;  %4490 = vmatprep.subr.bf16.mxu1 %v9272_v62  ;;  %v9323_v61 = vld [vmem:[%s14033_s3 + $0x224] ss:$16 sps:$4 sm:$0xff]   ;;  %v9326_v62 = vld [vmem:[%s14033_s3 + $0x22c] ss:$16 sps:$4 sm:$0xff]  }
  0xf2   :  { %1591 = vmatmul.mubr.bf16.gmra.mrb[100].mxu0 %v9212_v59  ;;  %1694 = vmatmul.mubr.bf16.gmra.mrb[100].mxu1 %v9212_v59  ;;  %v9315_v59 = vld [vmem:[%s14033_s3 + $0x200] ss:$16 sps:$4 sm:$0xff]  }
  0xf3   :  { %7726 = vmatprep.mubr.msk.bf16.mxu0 %vm346_vm0, %v9213_v60  ;;  %7733 = vmatprep.mubr.msk.bf16.mxu1 %vm346_vm0, %v9213_v60  ;;  %v9318_v60 = vld [vmem:[%s14033_s3 + $0x208] ss:$16 sps:$4 sm:$0xff]  }
  0xf4   :  { %3976 = vmatpush1.bf16.msra.mxu0 %v9267_v63  ;;  %4491 = vmatpush1.bf16.msra.mxu1 %v9270_v32  ;;  %v9321_v63 = vld [vmem:[%s14033_s3 + $0x220] ss:$16 sps:$4 sm:$0xff]   ;;  %v9324_v32 = vld [vmem:[%s14033_s3 + $0x228] ss:$16 sps:$4 sm:$0xff]  }
  0xf5   :  { %3977 = vmatprep.subr.bf16.mxu0 %v9275_v41  ;;  %4492 = vmatprep.subr.bf16.mxu1 %v9278_v42 }
  0xf8   :  { %3978 = vmatpush1.bf16.msra.mxu0 %v9273_v43  ;;  %4493 = vmatpush1.bf16.msra.mxu1 %v9276_v44  ;;  %v9329_v43 = vld [vmem:[%s14033_s3 + $0x244] ss:$16 sps:$4 sm:$0xff]   ;;  %v9332_v44 = vld [vmem:[%s14033_s3 + $0x24c] ss:$16 sps:$4 sm:$0xff]  }
  0xf9   :  { %3979 = vmatprep.subr.bf16.mxu0 %v9281_v0  ;;  %4494 = vmatprep.subr.bf16.mxu1 %v9284_v1 }
  0xfa   :  { %1601 = vmatmul.mubr.bf16.gmra.mrb[104].mxu0 %v9215_v45  ;;  %1704 = vmatmul.mubr.bf16.gmra.mrb[104].mxu1 %v9215_v45 }
  0xfb   :  { %7727 = vmatprep.mubr.msk.bf16.mxu0 %vm346_vm0, %v9228_v2  ;;  %7734 = vmatprep.mubr.msk.bf16.mxu1 %vm346_vm0, %v9228_v2 }
  0xfc   :  { %3980 = vmatpush1.bf16.msra.mxu0 %v9279_v3  ;;  %4495 = vmatpush1.bf16.msra.mxu1 %v9282_v4 }
  0xfd   :  { %v10897_v9 = vpop.f32.mrb[0].mxu0  ;;  %v10899_v10 = vpop.f32.mrb[0].mxu1  ;;  %3981 = vmatprep.subr.bf16.mxu0 %v9287_v5  ;;  %4496 = vmatprep.subr.bf16.mxu1 %v9290_v6  ;;  %v9327_v5 = vld [vmem:[%s14033_s3 + $0x240] ss:$16 sps:$4 sm:$0xff]   ;;  %v9330_v6 = vld [vmem:[%s14033_s3 + $0x248] ss:$16 sps:$4 sm:$0xff]  }
  0xfe   :  { %v10907_v13 = vpop.f32.mrb[1].mxu0  ;;  %v10909_v14 = vpop.f32.mrb[1].mxu1 }
  0xff   :  { %v10917_v17 = vpop.f32.mrb[2].mxu0  ;;  %v10919_v18 = vpop.f32.mrb[2].mxu1 }
 0x100   :  { %v10921_v19 = vpop.f32.mrb[3].mxu0  ;;  %v10923_v20 = vpop.f32.mrb[3].mxu1  ;;  %3982 = vmatpush1.bf16.msra.mxu0 %v9285_v7  ;;  %4497 = vmatpush1.bf16.msra.mxu1 %v9288_v8  ;;  %v9335_v7 = vld [vmem:[%s14033_s3 + $0x264] ss:$16 sps:$4 sm:$0xff]   ;;  %v9338_v8 = vld [vmem:[%s14033_s3 + $0x26c] ss:$16 sps:$4 sm:$0xff]  }
 0x101   :  { %3983 = vmatprep.subr.bf16.mxu0 %v9293_v11  ;;  %4498 = vmatprep.subr.bf16.mxu1 %v9296_v12  ;;  %v9333_v11 = vld [vmem:[%s14033_s3 + $0x260] ss:$16 sps:$4 sm:$0xff]   ;;  %v9336_v12 = vld [vmem:[%s14033_s3 + $0x268] ss:$16 sps:$4 sm:$0xff]  }
 0x102   :  { %1611 = vmatmul.mubr.bf16.gmra.mrb[108].mxu0 %v9230_v15  ;;  %1714 = vmatmul.mubr.bf16.gmra.mrb[108].mxu1 %v9230_v15 }
 0x103   :  { %3991 = vmatprep.mubr.bf16.mxu0 %v14039_v26  ;;  %4506 = vmatprep.mubr.bf16.mxu1 %v14039_v26 }
 0x104   :  { %3984 = vmatpush1.bf16.msra.mxu0 %v9291_v16  ;;  %4499 = vmatpush1.bf16.msra.mxu1 %v9294_v21  ;;  %v9341_v21 = vld [vmem:[%s14033_s3 + $0x284] ss:$16 sps:$4 sm:$0xff]  }
 0x105   :  { %v10942_v27 = vpop.f32.mrb[4].mxu0  ;;  %v10944_v28 = vpop.f32.mrb[4].mxu1  ;;  %3985 = vmatprep.subr.bf16.mxu0 %v9299_v22  ;;  %4500 = vmatprep.subr.bf16.mxu1 %v9302_v23  ;;  %v9344_v22 = vld [vmem:[%s14033_s3 + $0x28c] ss:$16 sps:$4 sm:$0xff]  }
 0x106   :  { %v10952_v31 = vpop.f32.mrb[5].mxu0  ;;  %v10954_v33 = vpop.f32.mrb[5].mxu1 }
 0x107   :  { %v10956_v34 = vpop.f32.mrb[6].mxu0  ;;  %v10958_v35 = vpop.f32.mrb[6].mxu1 }
 0x108   :  { %v10960_v36 = vpop.f32.mrb[7].mxu0  ;;  %v10962_v37 = vpop.f32.mrb[7].mxu1  ;;  %3986 = vmatpush1.bf16.msra.mxu0 %v9297_v24  ;;  %4501 = vmatpush1.bf16.msra.mxu1 %v9300_v25 }
 0x109   :  { %3987 = vmatprep.subr.bf16.mxu0 %v9305_v29  ;;  %4502 = vmatprep.subr.bf16.mxu1 %v9308_v30 }
 0x10c   :  { %3988 = vmatpush1.bf16.msra.mxu0 %v9303_v38  ;;  %4503 = vmatpush1.bf16.msra.mxu1 %v9306_v39  ;;  %v9339_v39 = vld [vmem:[%s14033_s3 + $0x280] ss:$16 sps:$4 sm:$0xff]  }
 0x10d   :  { %v10982_v49 = vpop.f32.mrb[8].mxu0  ;;  %v10984_v50 = vpop.f32.mrb[8].mxu1  ;;  %3989 = vmatprep.subr.bf16.mxu0 %v9311_v40  ;;  %4504 = vmatprep.subr.bf16.mxu1 %v9314_v46  ;;  %v9342_v40 = vld [vmem:[%s14033_s3 + $0x288] ss:$16 sps:$4 sm:$0xff]   ;;  %v9347_v46 = vld [vmem:[%s14033_s3 + $0x2a4] ss:$16 sps:$4 sm:$0xff]  }
 0x10e   :  { %v10992_v53 = vpop.f32.mrb[9].mxu0  ;;  %v10994_v54 = vpop.f32.mrb[9].mxu1 }
 0x10f   :  { %v10996_v55 = vpop.f32.mrb[10].mxu0  ;;  %v10998_v56 = vpop.f32.mrb[10].mxu1 }
 0x110   :  { %v11000_v57 = vpop.f32.mrb[11].mxu0  ;;  %v11002_v58 = vpop.f32.mrb[11].mxu1  ;;  %3990 = vmatpush1.bf16.msra.mxu0 %v9309_v47  ;;  %4505 = vmatpush1.bf16.msra.mxu1 %v9312_v48  ;;  %v9350_v47 = vld [vmem:[%s14033_s3 + $0x2ac] ss:$16 sps:$4 sm:$0xff]   ;;  %v9345_v48 = vld [vmem:[%s14033_s3 + $0x2a0] ss:$16 sps:$4 sm:$0xff]  }
 0x111   :  { %4062 = vmatprep.subr.bf16.mxu0 %v9317_v51  ;;  %4577 = vmatprep.subr.bf16.mxu1 %v9320_v52  ;;  %v9348_v51 = vld [vmem:[%s14033_s3 + $0x2a8] ss:$16 sps:$4 sm:$0xff]  }
 0x113   :  { %3992 = vmatmul.mubr.bf16.vlgmr.msra.gmra.mrb[112].mxu0 %v14039_v26  ;;  %4507 = vmatmul.mubr.bf16.vlgmr.msra.gmra.mrb[112].mxu1 %v14039_v26  ;;  %v9366_v26 = vld [vmem:[%s14033_s3 + $0x308] ss:$16 sps:$4 sm:$0xff]  }
 0x114   :  { %4063 = vmatpush1.bf16.msra.mxu0 %v9315_v59  ;;  %4578 = vmatpush1.bf16.msra.mxu1 %v9318_v60  ;;  %v9353_v60 = vld [vmem:[%s14033_s3 + $0x2c4] ss:$16 sps:$4 sm:$0xff]  }
 0x115   :  { %v11024_v41 = vpop.f32.mrb[12].mxu0  ;;  %v11026_v42 = vpop.f32.mrb[12].mxu1  ;;  %4064 = vmatprep.subr.bf16.mxu0 %v9323_v61  ;;  %4579 = vmatprep.subr.bf16.mxu1 %v9326_v62  ;;  %v9356_v61 = vld [vmem:[%s14033_s3 + $0x2cc] ss:$16 sps:$4 sm:$0xff]  }
 0x116   :  { %v11034_v0 = vpop.f32.mrb[13].mxu0  ;;  %v11036_v1 = vpop.f32.mrb[13].mxu1 }
 0x117   :  { %v11038_v45 = vpop.f32.mrb[14].mxu0  ;;  %v11040_v2 = vpop.f32.mrb[14].mxu1 }
 0x118   :  { %v11042_v3 = vpop.f32.mrb[15].mxu0  ;;  %v11044_v4 = vpop.f32.mrb[15].mxu1  ;;  %4065 = vmatpush1.bf16.msra.mxu0 %v9321_v63  ;;  %4580 = vmatpush1.bf16.msra.mxu1 %v9324_v32 }
 0x119   :  { %4066 = vmatprep.subr.bf16.mxu0 %v9329_v43  ;;  %4581 = vmatprep.subr.bf16.mxu1 %v9332_v44 }
 0x11c   :  { %4067 = vmatpush1.bf16.msra.mxu0 %v9327_v5  ;;  %4582 = vmatpush1.bf16.msra.mxu1 %v9330_v6  ;;  %v9351_v6 = vld [vmem:[%s14033_s3 + $0x2c0] ss:$16 sps:$4 sm:$0xff]  }
 0x11d   :  { %v11064_v15 = vpop.f32.mrb[16].mxu0  ;;  %v11066_v16 = vpop.f32.mrb[16].mxu1  ;;  %4068 = vmatprep.subr.bf16.mxu0 %v9335_v7  ;;  %4583 = vmatprep.subr.bf16.mxu1 %v9338_v8  ;;  %v9354_v7 = vld [vmem:[%s14033_s3 + $0x2c8] ss:$16 sps:$4 sm:$0xff]   ;;  %v9359_v8 = vld [vmem:[%s14033_s3 + $0x2e4] ss:$16 sps:$4 sm:$0xff]  }
 0x11e   :  { %v11074_v23 = vpop.f32.mrb[17].mxu0  ;;  %v11076_v24 = vpop.f32.mrb[17].mxu1 }
 0x11f   :  { %v11078_v25 = vpop.f32.mrb[18].mxu0  ;;  %v11080_v29 = vpop.f32.mrb[18].mxu1 }
 0x120   :  { %v11082_v30 = vpop.f32.mrb[19].mxu0  ;;  %v11084_v38 = vpop.f32.mrb[19].mxu1  ;;  %4069 = vmatpush1.bf16.msra.mxu0 %v9333_v11  ;;  %4584 = vmatpush1.bf16.msra.mxu1 %v9336_v12  ;;  %v9362_v11 = vld [vmem:[%s14033_s3 + $0x2ec] ss:$16 sps:$4 sm:$0xff]   ;;  %v964_v12 = vlaneseq }
 0x121   :  { %4070 = vmatprep.subr.bf16.mxu0 %v9341_v21  ;;  %4585 = vmatprep.subr.bf16.mxu1 %v9344_v22  ;;  %v9357_v21 = vld [vmem:[%s14033_s3 + $0x2e0] ss:$16 sps:$4 sm:$0xff]   ;;  %v9360_v22 = vld [vmem:[%s14033_s3 + $0x2e8] ss:$16 sps:$4 sm:$0xff]  }
 0x124   :  { %4071 = vmatpush1.bf16.msra.mxu0 %v9339_v39  ;;  %4586 = vmatpush1.bf16.msra.mxu1 %v9342_v40 }
 0x125   :  { %v11104_v52 = vpop.f32.mrb[20].mxu0  ;;  %v11106_v59 = vpop.f32.mrb[20].mxu1  ;;  %4072 = vmatprep.subr.bf16.mxu0 %v9347_v46  ;;  %4587 = vmatprep.subr.bf16.mxu1 %v9350_v47  ;;  %v9365_v46 = vld [vmem:[%s14033_s3 + $0x304] ss:$16 sps:$4 sm:$0xff]   ;;  %v9368_v47 = vld [vmem:[%s14033_s3 + $0x30c] ss:$16 sps:$4 sm:$0xff]  }
 0x126   :  { %v11114_v62 = vpop.f32.mrb[21].mxu0  ;;  %v11116_v63 = vpop.f32.mrb[21].mxu1 }
 0x127   :  { %14070 = vst [vmem:[#allocation4_spill] sm:$0xff] %v11116_v63  ;;  %v11118_v32 = vpop.f32.mrb[22].mxu0  ;;  %v11120_v43 = vpop.f32.mrb[22].mxu1 }
 0x128   :  { %14071 = vst [vmem:[#allocation5_spill] sm:$0xff] %v11118_v32  ;;  %14072 = vst [vmem:[#allocation6_spill] sm:$0xff] %v11120_v43  ;;  %v11122_v44 = vpop.f32.mrb[23].mxu0  ;;  %v11124_v5 = vpop.f32.mrb[23].mxu1  ;;  %4073 = vmatpush1.bf16.msra.mxu0 %v9345_v48  ;;  %4588 = vmatpush1.bf16.msra.mxu1 %v9348_v51 }
 0x129   :  { %14073 = vst [vmem:[#allocation7_spill] sm:$0xff] %v11122_v44  ;;  %14074 = vst [vmem:[#allocation8_spill] sm:$0xff] %v11124_v5  ;;  %4074 = vmatprep.subr.bf16.mxu0 %v9353_v60  ;;  %4589 = vmatprep.subr.bf16.mxu1 %v9356_v61  ;;  %v11158_v60 = vshrl.u32 %v964_v12, 7  ;;  %v9371_v12 = vld [vmem:[%s14033_s3 + $0x324] ss:$16 sps:$4 sm:$0xff]  }
 0x12b   :  { %14079 = vst [vmem:[#allocation13_spill] sm:$0xff] %v11158_v60  ;;  %v14085_v5 = vsub.s32 1, %v11158_v60 }
 0x12c   :  { %4075 = vmatpush1.bf16.msra.mxu0 %v9351_v6  ;;  %4590 = vmatpush1.bf16.msra.mxu1 %v9354_v7 }
 0x12d   :  { %v11144_v39 = vpop.f32.mrb[24].mxu0  ;;  %v11146_v40 = vpop.f32.mrb[24].mxu1  ;;  %4076 = vmatprep.subr.bf16.mxu0 %v9359_v8  ;;  %4591 = vmatprep.subr.bf16.mxu1 %v9362_v11  ;;  %v9363_v11 = vld [vmem:[%s14033_s3 + $0x300] ss:$16 sps:$4 sm:$0xff]  }
 0x12e   :  { %14075 = vst [vmem:[#allocation9_spill] sm:$0xff] %v11144_v39  ;;  %14076 = vst [vmem:[#allocation10_spill] sm:$0xff] %v11146_v40  ;;  %v11154_v48 = vpop.f32.mrb[25].mxu0  ;;  %v11156_v51 = vpop.f32.mrb[25].mxu1 }
 0x12f   :  { %14077 = vst [vmem:[#allocation11_spill] sm:$0xff] %v11154_v48  ;;  %14078 = vst [vmem:[#allocation12_spill] sm:$0xff] %v11156_v51  ;;  %v11160_v61 = vpop.f32.mrb[26].mxu0  ;;  %v11162_v6 = vpop.f32.mrb[26].mxu1  ;;  %v14084_v51 = vsub.s32 0, %v11158_v60 }
 0x130   :  { %14080 = vst [vmem:[#allocation14_spill] sm:$0xff] %v11160_v61  ;;  %14081 = vst [vmem:[#allocation15_spill] sm:$0xff] %v11162_v6  ;;  %v11164_v7 = vpop.f32.mrb[27].mxu0  ;;  %v11166_v8 = vpop.f32.mrb[27].mxu1  ;;  %4077 = vmatpush1.bf16.msra.mxu0 %v9357_v21  ;;  %4592 = vmatpush1.bf16.msra.mxu1 %v9360_v22  ;;  %v67_v22 = vld [vmem:[%s14034_s2] sm:$0x3] }
 0x131   :  { %14082 = vst [vmem:[#allocation16_spill] sm:$0xff] %v11164_v7  ;;  %14083 = vst [vmem:[#allocation17_spill] sm:$0xff] %v11166_v8  ;;  %4078 = vmatprep.subr.bf16.mxu0 %v9365_v46  ;;  %4593 = vmatprep.subr.bf16.mxu1 %v9368_v47  ;;  %v9374_v8 = vld [vmem:[%s14033_s3 + $0x32c] ss:$16 sps:$4 sm:$0xff]   ;;  %v9369_v46 = vld [vmem:[%s14033_s3 + $0x320] ss:$16 sps:$4 sm:$0xff]   ;;  %v11201_v48 = vrot.slane %v67_v22, %v14084_v51  ;;  %v11207_v44 = vrot.slane %v67_v22, %v14085_v5 }
 0x132   :  { %v9372_v47 = vld [vmem:[%s14033_s3 + $0x328] ss:$16 sps:$4 sm:$0xff]   ;;  %v9377_v21 = vld [vmem:[%s14033_s3 + $0x344] ss:$16 sps:$4 sm:$0xff]  }
 0x133   :  { %v9467_v60 = vld [vmem:[%s14033_s3 + $0x524] ss:$16 sps:$4 sm:$0xff]  }
 0x134   :  { %4079 = vmatpush1.bf16.msra.mxu0 %v9363_v11  ;;  %4594 = vmatpush1.bf16.msra.mxu1 %v9366_v26  ;;  %v9380_v26 = vld [vmem:[%s14033_s3 + $0x34c] ss:$16 sps:$4 sm:$0xff]  }
 0x135   :  { %v707_v6 = vpop.f32.mrb[28].mxu0  ;;  %v810_v61 = vpop.f32.mrb[28].mxu1  ;;  %4080 = vmatprep.subr.bf16.mxu0 %v9371_v12  ;;  %4595 = vmatprep.subr.bf16.mxu1 %v9374_v8 }
 0x136   :  { %v879_v11 = vmax.f32 %v10897_v9, %v707_v6  ;;  %v881_v7 = vmax.f32 %v10899_v10, %v810_v61  ;;  %v709_v40 = vpop.f32.mrb[29].mxu0  ;;  %v812_v39 = vpop.f32.mrb[29].mxu1 }
 0x137   :  { %v880_v8 = vmax.f32 %v10907_v13, %v709_v40  ;;  %v882_v12 = vmax.f32 %v10909_v14, %v812_v39  ;;  %v711_v43 = vpop.f32.mrb[30].mxu0  ;;  %v814_v32 = vpop.f32.mrb[30].mxu1  ;;  %v9375_v13 = vld [vmem:[%s14033_s3 + $0x340] ss:$16 sps:$4 sm:$0xff]   ;;  %v9378_v14 = vld [vmem:[%s14033_s3 + $0x348] ss:$16 sps:$4 sm:$0xff]  }
 0x138   :  { %v935_v63 = vmax.f32 %v879_v11, %v881_v7  ;;  %v883_v9 = vmax.f32 %v10917_v17, %v711_v43  ;;  %v885_v10 = vmax.f32 %v10919_v18, %v814_v32  ;;  %v713_v61 = vpop.f32.mrb[31].mxu0  ;;  %v816_v51 = vpop.f32.mrb[31].mxu1  ;;  %4081 = vmatpush1.bf16.msra.mxu0 %v9369_v46  ;;  %4596 = vmatpush1.bf16.msra.mxu1 %v9372_v47  ;;  %v9383_v17 = vld [vmem:[%s14033_s3 + $0x364] ss:$16 sps:$4 sm:$0xff]   ;;  %v9386_v18 = vld [vmem:[%s14033_s3 + $0x36c] ss:$16 sps:$4 sm:$0xff]  }
 0x139   :  { %v936_v5 = vmax.f32 %v880_v8, %v882_v12  ;;  %v884_v39 = vmax.f32 %v10921_v19, %v713_v61  ;;  %v886_v40 = vmax.f32 %v10923_v20, %v816_v51  ;;  %4082 = vmatprep.subr.bf16.mxu0 %v9377_v21  ;;  %4597 = vmatprep.subr.bf16.mxu1 %v9380_v26  ;;  %v9381_v20 = vld [vmem:[%s14033_s3 + $0x360] ss:$16 sps:$4 sm:$0xff]   ;;  %v9389_v47 = vld [vmem:[%s14033_s3 + $0x384] ss:$16 sps:$4 sm:$0xff]   ;;  %v9392_v61 = vld [vmem:[%s14033_s3 + $0x38c] ss:$16 sps:$4 sm:$0xff]  }
 0x13a   :  { %v974_v32 = vadd.f32 %v11201_v48, %v935_v63  ;;  %v937_v43 = vmax.f32 %v883_v9, %v885_v10  ;;  %v9384_v63 = vld [vmem:[%s14033_s3 + $0x368] ss:$16 sps:$4 sm:$0xff]  }
 0x13b   :  { %v975_v6 = vadd.f32 %v11207_v44, %v936_v5  ;;  %v938_v7 = vmax.f32 %v884_v39, %v886_v40 }
 0x13c   :  { %v976_v19 = vadd.f32 %v11201_v48, %v937_v43  ;;  %4083 = vmatpush1.bf16.msra.mxu0 %v9375_v13  ;;  %4598 = vmatpush1.bf16.msra.mxu1 %v9378_v14  ;;  %v1002_v26 = vmax.f32 %v974_v32, 0.0 }
 0x13d   :  { %v977_v21 = vadd.f32 %v11207_v44, %v938_v7  ;;  %v717_v22 = vpop.f32.mrb[32].mxu0  ;;  %v820_v46 = vpop.f32.mrb[32].mxu1  ;;  %4084 = vmatprep.subr.bf16.mxu0 %v9383_v17  ;;  %4599 = vmatprep.subr.bf16.mxu1 %v9386_v18  ;;  %v1003_v51 = vmax.f32 %v975_v6, 0.0 }
 0x13e   :  { %v1004_v11 = vmax.f32 %v976_v19, 0.0  ;;  %v887_v8 = vmax.f32 %v10942_v27, %v717_v22  ;;  %v889_v12 = vmax.f32 %v10944_v28, %v820_v46  ;;  %v719_v9 = vpop.f32.mrb[33].mxu0  ;;  %v822_v10 = vpop.f32.mrb[33].mxu1 }
 0x13f   :  { %v1005_v13 = vmax.f32 %v977_v21, 0.0  ;;  %v888_v14 = vmax.f32 %v10952_v31, %v719_v9  ;;  %v890_v5 = vmax.f32 %v10954_v33, %v822_v10  ;;  %v721_v39 = vpop.f32.mrb[34].mxu0  ;;  %v824_v40 = vpop.f32.mrb[34].mxu1  ;;  %v9387_v33 = vld [vmem:[%s14033_s3 + $0x380] ss:$16 sps:$4 sm:$0xff]  }
 0x140   :  { %v11245_v17 = vpack.c.bf16 %v1004_v11, %v1002_v26  ;;  %v939_v18 = vmax.f32 %v887_v8, %v889_v12  ;;  %v891_v27 = vmax.f32 %v10956_v34, %v721_v39  ;;  %v893_v28 = vmax.f32 %v10958_v35, %v824_v40  ;;  %v723_v32 = vpop.f32.mrb[35].mxu0  ;;  %v826_v43 = vpop.f32.mrb[35].mxu1  ;;  %4085 = vmatpush1.bf16.msra.mxu0 %v9381_v20  ;;  %v9390_v34 = vld [vmem:[%s14033_s3 + $0x388] ss:$16 sps:$4 sm:$0xff]   ;;  %v9393_v11 = vld [vmem:[%s14033_s3 + $0x3a0] ss:$16 sps:$4 sm:$0xff]  }
 0x141   :  { %v11249_v7 = vpack.c.bf16 %v1005_v13, %v1003_v51  ;;  %v940_v6 = vmax.f32 %v888_v14, %v890_v5  ;;  %v892_v19 = vmax.f32 %v10960_v36, %v723_v32  ;;  %v894_v31 = vmax.f32 %v10962_v37, %v826_v43  ;;  %4600 = vmatpush1.bf16.msra.mxu1 %v9384_v63  ;;  %v9395_v36 = vld [vmem:[%s14033_s3 + $0x3a4] ss:$16 sps:$4 sm:$0xff]   ;;  %v9398_v37 = vld [vmem:[%s14033_s3 + $0x3ac] ss:$16 sps:$4 sm:$0xff]   ;;  %v9396_v8 = vld [vmem:[%s14033_s3 + $0x3a8] ss:$16 sps:$4 sm:$0xff]  }
 0x142   :  { %14086 = vst [vmem:[#allocation18_spill] sm:$0xff] %v11245_v17  ;;  %v978_v35 = vadd.f32 %v11201_v48, %v939_v18  ;;  %v941_v21 = vmax.f32 %v891_v27, %v893_v28  ;;  %4086 = vmatprep.subr.bf16.mxu0 %v9389_v47  ;;  %4601 = vmatprep.subr.bf16.mxu1 %v9392_v61  ;;  %v9401_v14 = vld [vmem:[%s14033_s3 + $0x3c4] ss:$16 sps:$4 sm:$0xff]  }
 0x143   :  { %14087 = vst [vmem:[#allocation19_spill] sm:$0xff] %v11249_v7  ;;  %v979_v20 = vadd.f32 %v11207_v44, %v940_v6  ;;  %v942_v22 = vmax.f32 %v892_v19, %v894_v31  ;;  %4001 = vmatprep.mubr.bf16.mxu0 %v11249_v7  ;;  %4516 = vmatprep.mubr.bf16.mxu1 %v11249_v7 }
 0x144   :  { %v980_v46 = vadd.f32 %v11201_v48, %v941_v21  ;;  %4002 = vmatmul.mubr.bf16.gmra.mrb[116].mxu0 %v11245_v17  ;;  %4517 = vmatmul.mubr.bf16.gmra.mrb[116].mxu1 %v11245_v17  ;;  %v1006_v12 = vmax.f32 %v978_v35, 0.0 }
 0x145   :  { %v981_v63 = vadd.f32 %v11207_v44, %v942_v22  ;;  %v727_v47 = vpop.f32.mrb[36].mxu0  ;;  %v830_v26 = vpop.f32.mrb[36].mxu1  ;;  %4087 = vmatpush1.bf16.msra.mxu0 %v9387_v33  ;;  %4602 = vmatpush1.bf16.msra.mxu1 %v9390_v34  ;;  %v1007_v5 = vmax.f32 %v979_v20, 0.0 }
 0x146   :  { %v1008_v9 = vmax.f32 %v980_v46, 0.0  ;;  %v895_v10 = vmax.f32 %v10982_v49, %v727_v47  ;;  %v897_v61 = vmax.f32 %v10984_v50, %v830_v26  ;;  %v729_v51 = vpop.f32.mrb[37].mxu0  ;;  %v832_v13 = vpop.f32.mrb[37].mxu1  ;;  %4088 = vmatprep.subr.bf16.mxu0 %v9395_v36  ;;  %4603 = vmatprep.subr.bf16.mxu1 %v9398_v37  ;;  %v9410_v37 = vld [vmem:[%s14033_s3 + $0x3ec] ss:$16 sps:$4 sm:$0xff]  }
 0x147   :  { %v1009_v39 = vmax.f32 %v981_v63, 0.0  ;;  %v896_v40 = vmax.f32 %v10992_v53, %v729_v51  ;;  %v898_v18 = vmax.f32 %v10994_v54, %v832_v13  ;;  %v731_v27 = vpop.f32.mrb[38].mxu0  ;;  %v834_v28 = vpop.f32.mrb[38].mxu1  ;;  %v9399_v54 = vld [vmem:[%s14033_s3 + $0x3c0] ss:$16 sps:$4 sm:$0xff]  }
 0x148   :  { %v11286_v32 = vpack.c.bf16 %v1008_v9, %v1006_v12  ;;  %v943_v49 = vmax.f32 %v895_v10, %v897_v61  ;;  %v899_v50 = vmax.f32 %v10996_v55, %v731_v27  ;;  %v901_v43 = vmax.f32 %v10998_v56, %v834_v28  ;;  %v733_v6 = vpop.f32.mrb[39].mxu0  ;;  %v836_v19 = vpop.f32.mrb[39].mxu1  ;;  %v9404_v55 = vld [vmem:[%s14033_s3 + $0x3cc] ss:$16 sps:$4 sm:$0xff]   ;;  %v9405_v47 = vld [vmem:[%s14033_s3 + $0x3e0] ss:$16 sps:$4 sm:$0xff]  }
 0x149   :  { %v11290_v31 = vpack.c.bf16 %v1009_v39, %v1007_v5  ;;  %v944_v33 = vmax.f32 %v896_v40, %v898_v18  ;;  %v900_v34 = vmax.f32 %v11000_v57, %v733_v6  ;;  %v902_v53 = vmax.f32 %v11002_v58, %v836_v19  ;;  %4089 = vmatpush1.bf16.msra.mxu0 %v9393_v11  ;;  %v9402_v57 = vld [vmem:[%s14033_s3 + $0x3c8] ss:$16 sps:$4 sm:$0xff]   ;;  %v9407_v58 = vld [vmem:[%s14033_s3 + $0x3e4] ss:$16 sps:$4 sm:$0xff]  }
 0x14a   :  { %14088 = vst [vmem:[#allocation20_spill] sm:$0xff] %v11286_v32  ;;  %v982_v56 = vadd.f32 %v11201_v48, %v943_v49  ;;  %v945_v35 = vmax.f32 %v899_v50, %v901_v43  ;;  %4604 = vmatpush1.bf16.msra.mxu1 %v9396_v8  ;;  %4090 = vmatprep.subr.bf16.mxu0 %v9401_v14  ;;  %v9408_v26 = vld [vmem:[%s14033_s3 + $0x3e8] ss:$16 sps:$4 sm:$0xff]   ;;  %v9413_v51 = vld [vmem:[%s14033_s3 + $0x404] ss:$16 sps:$4 sm:$0xff]  }
 0x14b   :  { %14089 = vst [vmem:[#allocation21_spill] sm:$0xff] %v11290_v31  ;;  %v983_v21 = vadd.f32 %v11207_v44, %v944_v33  ;;  %v946_v36 = vmax.f32 %v900_v34, %v902_v53  ;;  %4011 = vmatprep.mubr.bf16.mxu0 %v11290_v31  ;;  %4526 = vmatprep.mubr.bf16.mxu1 %v11290_v31 }
 0x14c   :  { %v984_v20 = vadd.f32 %v11201_v48, %v945_v35  ;;  %4012 = vmatmul.mubr.bf16.gmra.mrb[120].mxu0 %v11286_v32  ;;  %4527 = vmatmul.mubr.bf16.gmra.mrb[120].mxu1 %v11286_v32  ;;  %v1010_v11 = vmax.f32 %v982_v56, 0.0  ;;  %v9485_v32 = vld [vmem:[%s14033_s3 + $0x584] ss:$16 sps:$4 sm:$0xff]  }
 0x14d   :  { %v985_v22 = vadd.f32 %v11207_v44, %v946_v36  ;;  %v737_v46 = vpop.f32.mrb[40].mxu0  ;;  %v840_v63 = vpop.f32.mrb[40].mxu1  ;;  %4605 = vmatprep.subr.bf16.mxu1 %v9404_v55  ;;  %4091 = vmatpush1.bf16.msra.mxu0 %v9399_v54  ;;  %v1011_v13 = vmax.f32 %v983_v21, 0.0 }
 0x14e   :  { %v1012_v8 = vmax.f32 %v984_v20, 0.0  ;;  %v903_v12 = vmax.f32 %v11024_v41, %v737_v46  ;;  %v905_v9 = vmax.f32 %v11026_v42, %v840_v63  ;;  %v739_v10 = vpop.f32.mrb[41].mxu0  ;;  %v842_v61 = vpop.f32.mrb[41].mxu1  ;;  %4606 = vmatpush1.bf16.msra.mxu1 %v9402_v57  ;;  %4092 = vmatprep.subr.bf16.mxu0 %v9407_v58 }
 0x14f   :  { %v1013_v14 = vmax.f32 %v985_v22, 0.0  ;;  %v904_v5 = vmax.f32 %v11034_v0, %v739_v10  ;;  %v906_v39 = vmax.f32 %v11036_v1, %v842_v61  ;;  %v741_v40 = vpop.f32.mrb[42].mxu0  ;;  %v844_v18 = vpop.f32.mrb[42].mxu1  ;;  %4607 = vmatprep.subr.bf16.mxu1 %v9410_v37  ;;  %v9416_v1 = vld [vmem:[%s14033_s3 + $0x40c] ss:$16 sps:$4 sm:$0xff]  }
 0x150   :  { %v11330_v41 = vpack.c.bf16 %v1012_v8, %v1010_v11  ;;  %v947_v42 = vmax.f32 %v903_v12, %v905_v9  ;;  %v907_v27 = vmax.f32 %v11038_v45, %v741_v40  ;;  %v909_v28 = vmax.f32 %v11040_v2, %v844_v18  ;;  %v743_v49 = vpop.f32.mrb[43].mxu0  ;;  %v846_v50 = vpop.f32.mrb[43].mxu1 }
 0x151   :  { %v11334_v43 = vpack.c.bf16 %v1013_v14, %v1011_v13  ;;  %v948_v6 = vmax.f32 %v904_v5, %v906_v39  ;;  %v908_v19 = vmax.f32 %v11042_v3, %v743_v49  ;;  %v910_v0 = vmax.f32 %v11044_v4, %v846_v50  ;;  %4093 = vmatpush1.bf16.msra.mxu0 %v9405_v47  ;;  %v14094_v50 = vld [vmem:[#allocation4_spill] sm:$0xff] }
 0x152   :  { %14090 = vst [vmem:[#allocation22_spill] sm:$0xff] %v11330_v41  ;;  %v986_v33 = vadd.f32 %v11201_v48, %v947_v42  ;;  %v949_v34 = vmax.f32 %v907_v27, %v909_v28  ;;  %4608 = vmatpush1.bf16.msra.mxu1 %v9408_v26  ;;  %4165 = vmatprep.subr.bf16.mxu0 %v9413_v51 }
 0x153   :  { %14091 = vst [vmem:[#allocation23_spill] sm:$0xff] %v11334_v43  ;;  %v987_v45 = vadd.f32 %v11207_v44, %v948_v6  ;;  %v950_v2 = vmax.f32 %v908_v19, %v910_v0  ;;  %4021 = vmatprep.mubr.bf16.mxu0 %v11334_v43  ;;  %4536 = vmatprep.mubr.bf16.mxu1 %v11334_v43 }
 0x154   :  { %v988_v3 = vadd.f32 %v11201_v48, %v949_v34  ;;  %4022 = vmatmul.mubr.bf16.gmra.mrb[124].mxu0 %v11330_v41  ;;  %4537 = vmatmul.mubr.bf16.gmra.mrb[124].mxu1 %v11330_v41  ;;  %v1014_v55 = vmax.f32 %v986_v33, 0.0  ;;  %v14096_v34 = vld [vmem:[#allocation5_spill] sm:$0xff]  ;;  %v9477_v41 = vld [vmem:[%s14033_s3 + $0x560] ss:$16 sps:$4 sm:$0xff]  }
 0x155   :  { %v989_v4 = vadd.f32 %v11207_v44, %v950_v2  ;;  %v747_v53 = vpop.f32.mrb[44].mxu0  ;;  %v850_v54 = vpop.f32.mrb[44].mxu1  ;;  %4680 = vmatprep.subr.bf16.mxu1 %v9416_v1  ;;  %v1015_v36 = vmax.f32 %v987_v45, 0.0  ;;  %v14097_v2 = vld [vmem:[#allocation6_spill] sm:$0xff] }
 0x156   :  { %v1016_v56 = vmax.f32 %v988_v3, 0.0  ;;  %v911_v35 = vmax.f32 %v11064_v15, %v747_v53  ;;  %v913_v57 = vmax.f32 %v11066_v16, %v850_v54  ;;  %v749_v58 = vpop.f32.mrb[45].mxu0  ;;  %v852_v21 = vpop.f32.mrb[45].mxu1  ;;  %v14099_v54 = vld [vmem:[#allocation7_spill] sm:$0xff] }
 0x157   :  { %v1017_v37 = vmax.f32 %v989_v4, 0.0  ;;  %v912_v20 = vmax.f32 %v11074_v23, %v749_v58  ;;  %v914_v22 = vmax.f32 %v11076_v24, %v852_v21  ;;  %v751_v46 = vpop.f32.mrb[46].mxu0  ;;  %v854_v63 = vpop.f32.mrb[46].mxu1 }
 0x158   :  { %v11353_v47 = vpack.c.bf16 %v1016_v56, %v1014_v55  ;;  %v951_v26 = vmax.f32 %v911_v35, %v913_v57  ;;  %v915_v11 = vmax.f32 %v11078_v25, %v751_v46  ;;  %v917_v8 = vmax.f32 %v11080_v29, %v854_v63  ;;  %v753_v15 = vpop.f32.mrb[47].mxu0  ;;  %v856_v12 = vpop.f32.mrb[47].mxu1  ;;  %v14100_v56 = vld [vmem:[#allocation8_spill] sm:$0xff] }
 0x159   :  { %v11357_v16 = vpack.c.bf16 %v1017_v37, %v1015_v36  ;;  %v952_v9 = vmax.f32 %v912_v20, %v914_v22  ;;  %v916_v10 = vmax.f32 %v11082_v30, %v753_v15  ;;  %v918_v23 = vmax.f32 %v11084_v38, %v856_v12 }
 0x15a   :  { %14092 = vst [vmem:[#allocation24_spill] sm:$0xff] %v11353_v47  ;;  %v990_v24 = vadd.f32 %v11201_v48, %v951_v26  ;;  %v953_v61 = vmax.f32 %v915_v11, %v917_v8  ;;  %v14101_v26 = vld [vmem:[#allocation9_spill] sm:$0xff]  ;;  %v14102_v8 = vld [vmem:[#allocation10_spill] sm:$0xff] }
 0x15b   :  { %14093 = vst [vmem:[#allocation25_spill] sm:$0xff] %v11357_v16  ;;  %v991_v51 = vadd.f32 %v11207_v44, %v952_v9  ;;  %v954_v13 = vmax.f32 %v916_v10, %v918_v23  ;;  %4031 = vmatprep.mubr.bf16.mxu0 %v11357_v16  ;;  %4546 = vmatprep.mubr.bf16.mxu1 %v11357_v16  ;;  %v9482_v16 = vld [vmem:[%s14033_s3 + $0x56c] ss:$16 sps:$4 sm:$0xff]  }
 0x15c   :  { %v992_v25 = vadd.f32 %v11201_v48, %v953_v61  ;;  %4032 = vmatmul.mubr.bf16.gmra.mrb[128].mxu0 %v11353_v47  ;;  %4547 = vmatmul.mubr.bf16.gmra.mrb[128].mxu1 %v11353_v47  ;;  %v1018_v14 = vmax.f32 %v990_v24, 0.0  ;;  %v14103_v24 = vld [vmem:[#allocation11_spill] sm:$0xff]  ;;  %v9479_v47 = vld [vmem:[%s14033_s3 + $0x564] ss:$16 sps:$4 sm:$0xff]  }
 0x15d   :  { %v993_v29 = vadd.f32 %v11207_v44, %v954_v13  ;;  %v757_v30 = vpop.f32.mrb[48].mxu0  ;;  %v860_v38 = vpop.f32.mrb[48].mxu1  ;;  %v1019_v27 = vmax.f32 %v991_v51, 0.0  ;;  %v14104_v51 = vld [vmem:[#allocation12_spill] sm:$0xff] }
 0x15e   :  { %v1020_v5 = vmax.f32 %v992_v25, 0.0  ;;  %v919_v39 = vmax.f32 %v11104_v52, %v757_v30  ;;  %v921_v40 = vmax.f32 %v11106_v59, %v860_v38  ;;  %v759_v18 = vpop.f32.mrb[49].mxu0  ;;  %v862_v42 = vpop.f32.mrb[49].mxu1 }
 0x15f   :  { %v1021_v28 = vmax.f32 %v993_v29, 0.0  ;;  %v920_v49 = vmax.f32 %v11114_v62, %v759_v18  ;;  %v922_v6 = vmax.f32 %v14094_v50, %v862_v42  ;;  %v761_v19 = vpop.f32.mrb[50].mxu0  ;;  %v864_v0 = vpop.f32.mrb[50].mxu1 }
 0x160   :  { %v11373_v1 = vpack.c.bf16 %v1020_v5, %v1018_v14  ;;  %v955_v33 = vmax.f32 %v919_v39, %v921_v40  ;;  %v923_v45 = vmax.f32 %v14096_v34, %v761_v19  ;;  %v925_v3 = vmax.f32 %v14097_v2, %v864_v0  ;;  %v763_v52 = vpop.f32.mrb[51].mxu0  ;;  %v866_v4 = vpop.f32.mrb[51].mxu1  ;;  %v14106_v14 = vld [vmem:[#allocation14_spill] sm:$0xff]  ;;  %v14107_v39 = vld [vmem:[#allocation15_spill] sm:$0xff] }
 0x161   :  { %v11377_v59 = vpack.c.bf16 %v1021_v28, %v1019_v27  ;;  %v956_v53 = vmax.f32 %v920_v49, %v922_v6  ;;  %v924_v55 = vmax.f32 %v14099_v54, %v763_v52  ;;  %v926_v62 = vmax.f32 %v14100_v56, %v866_v4  ;;  %v14109_v49 = vld [vmem:[#allocation16_spill] sm:$0xff]  ;;  %v14110_v6 = vld [vmem:[#allocation17_spill] sm:$0xff] }
 0x162   :  { %14095 = vst [vmem:[#allocation4_spill] sm:$0xff] %v11373_v1  ;;  %v994_v35 = vadd.f32 %v11201_v48, %v955_v33  ;;  %v957_v57 = vmax.f32 %v923_v45, %v925_v3 }
 0x163   :  { %14098 = vst [vmem:[#allocation5_spill] sm:$0xff] %v11377_v59  ;;  %v995_v58 = vadd.f32 %v11207_v44, %v956_v53  ;;  %v958_v21 = vmax.f32 %v924_v55, %v926_v62  ;;  %4041 = vmatprep.mubr.bf16.mxu0 %v11377_v59  ;;  %4556 = vmatprep.mubr.bf16.mxu1 %v11377_v59  ;;  %v14111_v53 = vmov 0  }
 0x164   :  { %v996_v36 = vadd.f32 %v11201_v48, %v957_v57  ;;  %4042 = vmatmul.mubr.bf16.gmra.mrb[132].mxu0 %v11373_v1  ;;  %4557 = vmatmul.mubr.bf16.gmra.mrb[132].mxu1 %v11373_v1  ;;  %v1022_v46 = vmax.f32 %v994_v35, 0.0 }
 0x165   :  { %v997_v37 = vadd.f32 %v11207_v44, %v958_v21  ;;  %v767_v20 = vpop.f32.mrb[52].mxu0  ;;  %v870_v22 = vpop.f32.mrb[52].mxu1  ;;  %v1023_v10 = vmax.f32 %v995_v58, 0.0 }
 0x166   :  { %v1024_v63 = vmax.f32 %v996_v36, 0.0  ;;  %v927_v11 = vmax.f32 %v14101_v26, %v767_v20  ;;  %v929_v15 = vmax.f32 %v14102_v8, %v870_v22  ;;  %v769_v12 = vpop.f32.mrb[53].mxu0  ;;  %v872_v9 = vpop.f32.mrb[53].mxu1  ;;  %v9419_v26 = vld [vmem:[%s14033_s3 + $0x424] ss:$16 sps:$4 sm:$0xff]  }
 0x167   :  { %v1025_v23 = vmax.f32 %v997_v37, 0.0  ;;  %v928_v61 = vmax.f32 %v14103_v24, %v769_v12  ;;  %v930_v13 = vmax.f32 %v14104_v51, %v872_v9  ;;  %v771_v25 = vpop.f32.mrb[54].mxu0  ;;  %v874_v29 = vpop.f32.mrb[54].mxu1  ;;  %v9417_v12 = vld [vmem:[%s14033_s3 + $0x420] ss:$16 sps:$4 sm:$0xff]  }
 0x168   :  { %v11393_v30 = vpack.c.bf16 %v1024_v63, %v1022_v46  ;;  %v959_v38 = vmax.f32 %v927_v11, %v929_v15  ;;  %v931_v5 = vmax.f32 %v14106_v14, %v771_v25  ;;  %v933_v40 = vmax.f32 %v14107_v39, %v874_v29  ;;  %v773_v18 = vpop.f32.mrb[55].mxu0  ;;  %v876_v42 = vpop.f32.mrb[55].mxu1  ;;  %v9411_v46 = vld [vmem:[%s14033_s3 + $0x400] ss:$16 sps:$4 sm:$0xff]   ;;  %v9414_v63 = vld [vmem:[%s14033_s3 + $0x408] ss:$16 sps:$4 sm:$0xff]  }
 0x169   :  { %v11397_v27 = vpack.c.bf16 %v1025_v23, %v1023_v10  ;;  %v960_v28 = vmax.f32 %v928_v61, %v930_v13  ;;  %v932_v50 = vmax.f32 %v14109_v49, %v773_v18  ;;  %v934_v19 = vmax.f32 %v14110_v6, %v876_v42  ;;  %v9422_v11 = vld [vmem:[%s14033_s3 + $0x42c] ss:$16 sps:$4 sm:$0xff]   ;;  %v9420_v9 = vld [vmem:[%s14033_s3 + $0x428] ss:$16 sps:$4 sm:$0xff]   ;;  %v9425_v24 = vld [vmem:[%s14033_s3 + $0x444] ss:$16 sps:$4 sm:$0xff]  }
 0x16a   :  { %14105 = vst [vmem:[#allocation6_spill] sm:$0xff] %v11393_v30  ;;  %v998_v0 = vadd.f32 %v11201_v48, %v959_v38  ;;  %v961_v33 = vmax.f32 %v931_v5, %v933_v40  ;;  %v9428_v61 = vld [vmem:[%s14033_s3 + $0x44c] ss:$16 sps:$4 sm:$0xff]   ;;  %v9423_v38 = vld [vmem:[%s14033_s3 + $0x440] ss:$16 sps:$4 sm:$0xff]  }
 0x16b   :  { %14108 = vst [vmem:[#allocation7_spill] sm:$0xff] %v11397_v27  ;;  %v999_v34 = vadd.f32 %v11207_v44, %v960_v28  ;;  %v962_v45 = vmax.f32 %v932_v50, %v934_v19  ;;  %4051 = vmatprep.mubr.bf16.mxu0 %v11397_v27  ;;  %4566 = vmatprep.mubr.bf16.mxu1 %v11397_v27  ;;  %v9426_v14 = vld [vmem:[%s14033_s3 + $0x448] ss:$16 sps:$4 sm:$0xff]   ;;  %v9431_v5 = vld [vmem:[%s14033_s3 + $0x464] ss:$16 sps:$4 sm:$0xff]  }
 0x16c   :  { %v1000_v2 = vadd.f32 %v11201_v48, %v961_v33  ;;  %4052 = vmatmul.mubr.bf16.gmra.mrb[136].mxu0 %v11393_v30  ;;  %4567 = vmatmul.mubr.bf16.gmra.mrb[136].mxu1 %v11393_v30  ;;  %v1026_v54 = vmax.f32 %v998_v0, 0.0  ;;  %v9434_v39 = vld [vmem:[%s14033_s3 + $0x46c] ss:$16 sps:$4 sm:$0xff]   ;;  %v9429_v42 = vld [vmem:[%s14033_s3 + $0x460] ss:$16 sps:$4 sm:$0xff]  }
 0x16d   :  { %v1001_v3 = vadd.f32 %v11207_v44, %v962_v45  ;;  %v11409_v52 = vpop.f32.mrb[56].mxu0  ;;  %v11411_v4 = vpop.f32.mrb[56].mxu1  ;;  %4094 = vmatprep.mubr.bf16.mxu0 %v14111_v53  ;;  %4609 = vmatprep.mubr.bf16.mxu1 %v14111_v53  ;;  %v1027_v35 = vmax.f32 %v999_v34, 0.0  ;;  %v9432_v28 = vld [vmem:[%s14033_s3 + $0x468] ss:$16 sps:$4 sm:$0xff]  }
 0x16e   :  { %v1028_v55 = vmax.f32 %v1000_v2, 0.0  ;;  %v11415_v56 = vpop.f32.mrb[57].mxu0  ;;  %v11417_v62 = vpop.f32.mrb[57].mxu1  ;;  %v9437_v6 = vld [vmem:[%s14033_s3 + $0x484] ss:$16 sps:$4 sm:$0xff]  }
 0x16f   :  { %v1029_v57 = vmax.f32 %v1001_v3, 0.0  ;;  %v11419_v58 = vpop.f32.mrb[58].mxu0  ;;  %v11421_v21 = vpop.f32.mrb[58].mxu1  ;;  %v9440_v19 = vld [vmem:[%s14033_s3 + $0x48c] ss:$16 sps:$4 sm:$0xff]  }
 0x170   :  { %v11423_v36 = vpack.c.bf16 %v1028_v55, %v1026_v54  ;;  %v11425_v37 = vpop.f32.mrb[59].mxu0  ;;  %v11427_v20 = vpop.f32.mrb[59].mxu1  ;;  %v9435_v2 = vld [vmem:[%s14033_s3 + $0x480] ss:$16 sps:$4 sm:$0xff]   ;;  %v9438_v3 = vld [vmem:[%s14033_s3 + $0x488] ss:$16 sps:$4 sm:$0xff]  }
 0x171   :  { %v11429_v22 = vpack.c.bf16 %v1029_v57, %v1027_v35  ;;  %v9443_v54 = vld [vmem:[%s14033_s3 + $0x4a4] ss:$16 sps:$4 sm:$0xff]   ;;  %v9446_v55 = vld [vmem:[%s14033_s3 + $0x4ac] ss:$16 sps:$4 sm:$0xff]  }
 0x172   :  { %14112 = vst [vmem:[#allocation8_spill] sm:$0xff] %v11423_v36  ;;  %v9465_v36 = vld [vmem:[%s14033_s3 + $0x520] ss:$16 sps:$4 sm:$0xff]   ;;  %v9473_v30 = vld [vmem:[%s14033_s3 + $0x544] ss:$16 sps:$4 sm:$0xff]  }
 0x173   :  { %14113 = vst [vmem:[#allocation9_spill] sm:$0xff] %v11429_v22 }
 0x174   :  { %4095 = vmatmul.mubr.bf16.vlgmr.msra.gmra.mrb[112].mxu0 %v14111_v53  ;;  %4610 = vmatmul.mubr.bf16.vlgmr.msra.gmra.mrb[112].mxu1 %v14111_v53  ;;  %v9470_v53 = vld [vmem:[%s14033_s3 + $0x52c] ss:$16 sps:$4 sm:$0xff]  }
 0x175   :  { %v11445_v8 = vpop.f32.mrb[60].mxu0  ;;  %v11447_v15 = vpop.f32.mrb[60].mxu1  ;;  %4166 = vmatpush1.bf16.msra.mxu0 %v9411_v46  ;;  %4681 = vmatpush1.bf16.msra.mxu1 %v9414_v63  ;;  %v9441_v46 = vld [vmem:[%s14033_s3 + $0x4a0] ss:$16 sps:$4 sm:$0xff]   ;;  %v9444_v63 = vld [vmem:[%s14033_s3 + $0x4a8] ss:$16 sps:$4 sm:$0xff]  }
 0x176   :  { %v11455_v10 = vpop.f32.mrb[61].mxu0  ;;  %v11457_v23 = vpop.f32.mrb[61].mxu1  ;;  %4167 = vmatprep.subr.bf16.mxu0 %v9419_v26  ;;  %4682 = vmatprep.subr.bf16.mxu1 %v9422_v11 }
 0x177   :  { %v11465_v51 = vpop.f32.mrb[62].mxu0  ;;  %v11467_v13 = vpop.f32.mrb[62].mxu1 }
 0x178   :  { %v11469_v25 = vpop.f32.mrb[63].mxu0  ;;  %v11471_v29 = vpop.f32.mrb[63].mxu1 }
 0x179   :  { %4168 = vmatpush1.bf16.msra.mxu0 %v9417_v12  ;;  %4683 = vmatpush1.bf16.msra.mxu1 %v9420_v9  ;;  %v9449_v12 = vld [vmem:[%s14033_s3 + $0x4c4] ss:$16 sps:$4 sm:$0xff]   ;;  %v9452_v9 = vld [vmem:[%s14033_s3 + $0x4cc] ss:$16 sps:$4 sm:$0xff]  }
 0x17a   :  { %4169 = vmatprep.subr.bf16.mxu0 %v9425_v24  ;;  %4684 = vmatprep.subr.bf16.mxu1 %v9428_v61 }
 0x17d   :  { %v11485_v40 = vpop.f32.mrb[64].mxu0  ;;  %v11487_v18 = vpop.f32.mrb[64].mxu1  ;;  %4170 = vmatpush1.bf16.msra.mxu0 %v9423_v38  ;;  %4685 = vmatpush1.bf16.msra.mxu1 %v9426_v14 }
 0x17e   :  { %v11495_v49 = vpop.f32.mrb[65].mxu0  ;;  %v11497_v50 = vpop.f32.mrb[65].mxu1  ;;  %4171 = vmatprep.subr.bf16.mxu0 %v9431_v5  ;;  %4686 = vmatprep.subr.bf16.mxu1 %v9434_v39  ;;  %v9447_v5 = vld [vmem:[%s14033_s3 + $0x4c0] ss:$16 sps:$4 sm:$0xff]   ;;  %v9450_v39 = vld [vmem:[%s14033_s3 + $0x4c8] ss:$16 sps:$4 sm:$0xff]  }
 0x17f   :  { %v11505_v0 = vpop.f32.mrb[66].mxu0  ;;  %v11507_v33 = vpop.f32.mrb[66].mxu1 }
 0x180   :  { %v11509_v34 = vpop.f32.mrb[67].mxu0  ;;  %v11511_v45 = vpop.f32.mrb[67].mxu1 }
 0x181   :  { %4172 = vmatpush1.bf16.msra.mxu0 %v9429_v42  ;;  %4687 = vmatpush1.bf16.msra.mxu1 %v9432_v28  ;;  %v9455_v42 = vld [vmem:[%s14033_s3 + $0x4e4] ss:$16 sps:$4 sm:$0xff]   ;;  %v9458_v28 = vld [vmem:[%s14033_s3 + $0x4ec] ss:$16 sps:$4 sm:$0xff]  }
 0x182   :  { %4173 = vmatprep.subr.bf16.mxu0 %v9437_v6  ;;  %4688 = vmatprep.subr.bf16.mxu1 %v9440_v19 }
 0x185   :  { %v11525_v35 = vpop.f32.mrb[68].mxu0  ;;  %v11527_v57 = vpop.f32.mrb[68].mxu1  ;;  %4174 = vmatpush1.bf16.msra.mxu0 %v9435_v2  ;;  %4689 = vmatpush1.bf16.msra.mxu1 %v9438_v3  ;;  %v9453_v2 = vld [vmem:[%s14033_s3 + $0x4e0] ss:$16 sps:$4 sm:$0xff]   ;;  %v9456_v3 = vld [vmem:[%s14033_s3 + $0x4e8] ss:$16 sps:$4 sm:$0xff]  }
 0x186   :  { %v11535_v26 = vpop.f32.mrb[69].mxu0  ;;  %v11537_v11 = vpop.f32.mrb[69].mxu1  ;;  %4175 = vmatprep.subr.bf16.mxu0 %v9443_v54  ;;  %4690 = vmatprep.subr.bf16.mxu1 %v9446_v55 }
 0x187   :  { %v11545_v24 = vpop.f32.mrb[70].mxu0  ;;  %v11547_v61 = vpop.f32.mrb[70].mxu1 }
 0x188   :  { %v11549_v38 = vpop.f32.mrb[71].mxu0  ;;  %v11551_v14 = vpop.f32.mrb[71].mxu1 }
 0x189   :  { %4176 = vmatpush1.bf16.msra.mxu0 %v9441_v46  ;;  %4691 = vmatpush1.bf16.msra.mxu1 %v9444_v63  ;;  %v9461_v46 = vld [vmem:[%s14033_s3 + $0x504] ss:$16 sps:$4 sm:$0xff]   ;;  %v9464_v63 = vld [vmem:[%s14033_s3 + $0x50c] ss:$16 sps:$4 sm:$0xff]  }
 0x18a   :  { %4177 = vmatprep.subr.bf16.mxu0 %v9449_v12  ;;  %4692 = vmatprep.subr.bf16.mxu1 %v9452_v9 }
 0x18d   :  { %v11565_v6 = vpop.f32.mrb[72].mxu0  ;;  %v11567_v19 = vpop.f32.mrb[72].mxu1  ;;  %4178 = vmatpush1.bf16.msra.mxu0 %v9447_v5  ;;  %4693 = vmatpush1.bf16.msra.mxu1 %v9450_v39 }
 0x18e   :  { %v11575_v54 = vpop.f32.mrb[73].mxu0  ;;  %v11577_v55 = vpop.f32.mrb[73].mxu1  ;;  %4179 = vmatprep.subr.bf16.mxu0 %v9455_v42  ;;  %4694 = vmatprep.subr.bf16.mxu1 %v9458_v28  ;;  %v9459_v42 = vld [vmem:[%s14033_s3 + $0x500] ss:$16 sps:$4 sm:$0xff]   ;;  %v9462_v28 = vld [vmem:[%s14033_s3 + $0x508] ss:$16 sps:$4 sm:$0xff]  }
 0x18f   :  { %v11585_v12 = vpop.f32.mrb[74].mxu0  ;;  %v11587_v9 = vpop.f32.mrb[74].mxu1 }
 0x190   :  { %v11589_v5 = vpop.f32.mrb[75].mxu0  ;;  %v11591_v39 = vpop.f32.mrb[75].mxu1 }
 0x191   :  { %4180 = vmatpush1.bf16.msra.mxu0 %v9453_v2  ;;  %4695 = vmatpush1.bf16.msra.mxu1 %v9456_v3 }
 0x192   :  { %4181 = vmatprep.subr.bf16.mxu0 %v9461_v46  ;;  %4696 = vmatprep.subr.bf16.mxu1 %v9464_v63  ;;  %v9468_v46 = vld [vmem:[%s14033_s3 + $0x528] ss:$16 sps:$4 sm:$0xff]  }
 0x195   :  { %v11605_v2 = vpop.f32.mrb[76].mxu0  ;;  %v11607_v3 = vpop.f32.mrb[76].mxu1  ;;  %4182 = vmatpush1.bf16.msra.mxu0 %v9459_v42  ;;  %4697 = vmatpush1.bf16.msra.mxu1 %v9462_v28  ;;  %v9476_v42 = vld [vmem:[%s14033_s3 + $0x54c] ss:$16 sps:$4 sm:$0xff]  }
 0x196   :  { %v11615_v63 = vpop.f32.mrb[77].mxu0  ;;  %v11617_v22 = vpop.f32.mrb[77].mxu1  ;;  %4183 = vmatprep.subr.bf16.mxu0 %v9467_v60  ;;  %4698 = vmatprep.subr.bf16.mxu1 %v9470_v53  ;;  %v9471_v60 = vld [vmem:[%s14033_s3 + $0x540] ss:$16 sps:$4 sm:$0xff]   ;;  %v9474_v53 = vld [vmem:[%s14033_s3 + $0x548] ss:$16 sps:$4 sm:$0xff]  }
 0x197   :  { %v11625_v28 = vpop.f32.mrb[78].mxu0  ;;  %v11627_v27 = vpop.f32.mrb[78].mxu1 }
 0x198   :  { %14114 = vst [vmem:[#allocation10_spill] sm:$0xff] %v11625_v28  ;;  %14115 = vst [vmem:[#allocation11_spill] sm:$0xff] %v11627_v27  ;;  %v11629_v1 = vpop.f32.mrb[79].mxu0  ;;  %v11631_v59 = vpop.f32.mrb[79].mxu1 }
 0x199   :  { %14116 = vst [vmem:[#allocation12_spill] sm:$0xff] %v11629_v1  ;;  %14117 = vst [vmem:[#allocation14_spill] sm:$0xff] %v11631_v59  ;;  %4184 = vmatpush1.bf16.msra.mxu0 %v9465_v36  ;;  %4699 = vmatpush1.bf16.msra.mxu1 %v9468_v46 }
 0x19a   :  { %4185 = vmatprep.subr.bf16.mxu0 %v9473_v30  ;;  %4700 = vmatprep.subr.bf16.mxu1 %v9476_v42  ;;  %v9480_v30 = vld [vmem:[%s14033_s3 + $0x568] ss:$16 sps:$4 sm:$0xff]  }
 0x19d   :  { %v11645_v36 = vpop.f32.mrb[80].mxu0  ;;  %v11647_v46 = vpop.f32.mrb[80].mxu1  ;;  %4186 = vmatpush1.bf16.msra.mxu0 %v9471_v60  ;;  %4701 = vmatpush1.bf16.msra.mxu1 %v9474_v53  ;;  %v9488_v60 = vld [vmem:[%s14033_s3 + $0x58c] ss:$16 sps:$4 sm:$0xff]  }
 0x19e   :  { %14118 = vst [vmem:[#allocation15_spill] sm:$0xff] %v11645_v36  ;;  %14119 = vst [vmem:[#allocation16_spill] sm:$0xff] %v11647_v46  ;;  %v11655_v42 = vpop.f32.mrb[81].mxu0  ;;  %v11657_v43 = vpop.f32.mrb[81].mxu1  ;;  %4187 = vmatprep.subr.bf16.mxu0 %v9479_v47  ;;  %4702 = vmatprep.subr.bf16.mxu1 %v9482_v16  ;;  %v9483_v47 = vld [vmem:[%s14033_s3 + $0x580] ss:$16 sps:$4 sm:$0xff]  }
 0x19f   :  { %14120 = vst [vmem:[#allocation17_spill] sm:$0xff] %v11655_v42  ;;  %14121 = vst [vmem:[#allocation26_spill] sm:$0xff] %v11657_v43  ;;  %v11665_v53 = vpop.f32.mrb[82].mxu0  ;;  %v11667_v31 = vpop.f32.mrb[82].mxu1  ;;  %v9486_v16 = vld [vmem:[%s14033_s3 + $0x588] ss:$16 sps:$4 sm:$0xff]  }
 0x1a0   :  { %14122 = vst [vmem:[#allocation27_spill] sm:$0xff] %v11665_v53  ;;  %14123 = vst [vmem:[#allocation28_spill] sm:$0xff] %v11667_v31  ;;  %v11669_v17 = vpop.f32.mrb[83].mxu0  ;;  %v11671_v7 = vpop.f32.mrb[83].mxu1  ;;  %v9491_v31 = vld [vmem:[%s14033_s3 + $0x5a4] ss:$16 sps:$4 sm:$0xff]  }
 0x1a1   :  { %14124 = vst [vmem:[#allocation29_spill] sm:$0xff] %v11669_v17  ;;  %14125 = vst [vmem:[#allocation30_spill] sm:$0xff] %v11671_v7  ;;  %4188 = vmatpush1.bf16.msra.mxu0 %v9477_v41  ;;  %4703 = vmatpush1.bf16.msra.mxu1 %v9480_v30  ;;  %v9494_v7 = vld [vmem:[%s14033_s3 + $0x5ac] ss:$16 sps:$4 sm:$0xff]   ;;  %v9489_v17 = vld [vmem:[%s14033_s3 + $0x5a0] ss:$16 sps:$4 sm:$0xff]  }
 0x1a2   :  { %4189 = vmatprep.subr.bf16.mxu0 %v9485_v32  ;;  %4704 = vmatprep.subr.bf16.mxu1 %v9488_v60  ;;  %v9492_v32 = vld [vmem:[%s14033_s3 + $0x5a8] ss:$16 sps:$4 sm:$0xff]  }
 0x1a5   :  { %v1552_v41 = vpop.f32.mrb[84].mxu0  ;;  %v1655_v30 = vpop.f32.mrb[84].mxu1  ;;  %4190 = vmatpush1.bf16.msra.mxu0 %v9483_v47  ;;  %4705 = vmatpush1.bf16.msra.mxu1 %v9486_v16  ;;  %v9497_v47 = vld [vmem:[%s14033_s3 + $0x5c4] ss:$16 sps:$4 sm:$0xff]   ;;  %v9500_v16 = vld [vmem:[%s14033_s3 + $0x5cc] ss:$16 sps:$4 sm:$0xff]  }
 0x1a6   :  { %v1724_v60 = vmax.f32 %v11409_v52, %v1552_v41  ;;  %v1726_v53 = vmax.f32 %v11411_v4, %v1655_v30  ;;  %v1554_v43 = vpop.f32.mrb[85].mxu0  ;;  %v1657_v42 = vpop.f32.mrb[85].mxu1  ;;  %4191 = vmatprep.subr.bf16.mxu0 %v9491_v31  ;;  %4706 = vmatprep.subr.bf16.mxu1 %v9494_v7 }
 0x1a7   :  { %v1725_v46 = vmax.f32 %v11415_v56, %v1554_v43  ;;  %v1727_v36 = vmax.f32 %v11417_v62, %v1657_v42  ;;  %v1556_v59 = vpop.f32.mrb[86].mxu0  ;;  %v1659_v52 = vpop.f32.mrb[86].mxu1  ;;  %v9495_v43 = vld [vmem:[%s14033_s3 + $0x5c0] ss:$16 sps:$4 sm:$0xff]   ;;  %v9498_v56 = vld [vmem:[%s14033_s3 + $0x5c8] ss:$16 sps:$4 sm:$0xff]  }
 0x1a8   :  { %v1780_v41 = vmax.f32 %v1724_v60, %v1726_v53  ;;  %v1728_v4 = vmax.f32 %v11419_v58, %v1556_v59  ;;  %v1730_v31 = vmax.f32 %v11421_v21, %v1659_v52  ;;  %v1558_v7 = vpop.f32.mrb[87].mxu0  ;;  %v1661_v30 = vpop.f32.mrb[87].mxu1  ;;  %v9503_v58 = vld [vmem:[%s14033_s3 + $0x5e4] ss:$16 sps:$4 sm:$0xff]   ;;  %v9501_v53 = vld [vmem:[%s14033_s3 + $0x5e0] ss:$16 sps:$4 sm:$0xff]  }
 0x1a9   :  { %v1781_v1 = vmax.f32 %v1725_v46, %v1727_v36  ;;  %v1729_v27 = vmax.f32 %v11425_v37, %v1558_v7  ;;  %v1731_v28 = vmax.f32 %v11427_v20, %v1661_v30  ;;  %4192 = vmatpush1.bf16.msra.mxu0 %v9489_v17  ;;  %4707 = vmatpush1.bf16.msra.mxu1 %v9492_v32  ;;  %v9506_v17 = vld [vmem:[%s14033_s3 + $0x5ec] ss:$16 sps:$4 sm:$0xff]   ;;  %v9504_v32 = vld [vmem:[%s14033_s3 + $0x5e8] ss:$16 sps:$4 sm:$0xff]   ;;  %v9509_v52 = vld [vmem:[%s14033_s3 + $0x604] ss:$16 sps:$4 sm:$0xff]  }
 0x1aa   :  { %v1808_v59 = vadd.f32 %v1780_v41, %v11201_v48  ;;  %v1782_v62 = vmax.f32 %v1728_v4, %v1730_v31  ;;  %4193 = vmatprep.subr.bf16.mxu0 %v9497_v47  ;;  %4708 = vmatprep.subr.bf16.mxu1 %v9500_v16 }
 0x1ab   :  { %v1809_v21 = vadd.f32 %v1781_v1, %v11207_v44  ;;  %v1783_v37 = vmax.f32 %v1729_v27, %v1731_v28 }
 0x1ac   :  { %v1810_v20 = vadd.f32 %v1782_v62, %v11201_v48  ;;  %v1836_v60 = vmax.f32 %v1808_v59, 0.0 }
 0x1ad   :  { %v1811_v36 = vadd.f32 %v1783_v37, %v11207_v44  ;;  %v1562_v46 = vpop.f32.mrb[88].mxu0  ;;  %v1665_v42 = vpop.f32.mrb[88].mxu1  ;;  %4194 = vmatpush1.bf16.msra.mxu0 %v9495_v43  ;;  %4709 = vmatpush1.bf16.msra.mxu1 %v9498_v56  ;;  %v1837_v41 = vmax.f32 %v1809_v21, 0.0 }
 0x1ae   :  { %v1838_v47 = vmax.f32 %v1810_v20, 0.0  ;;  %v1732_v1 = vmax.f32 %v11445_v8, %v1562_v46  ;;  %v1734_v27 = vmax.f32 %v11447_v15, %v1665_v42  ;;  %v1564_v28 = vpop.f32.mrb[89].mxu0  ;;  %v1667_v16 = vpop.f32.mrb[89].mxu1  ;;  %4195 = vmatprep.subr.bf16.mxu0 %v9503_v58  ;;  %4710 = vmatprep.subr.bf16.mxu1 %v9506_v17 }
 0x1af   :  { %v1839_v4 = vmax.f32 %v1811_v36, 0.0  ;;  %v1733_v31 = vmax.f32 %v11455_v10, %v1564_v28  ;;  %v1735_v7 = vmax.f32 %v11457_v23, %v1667_v16  ;;  %v1566_v30 = vpop.f32.mrb[90].mxu0  ;;  %v1669_v43 = vpop.f32.mrb[90].mxu1  ;;  %v9512_v23 = vld [vmem:[%s14033_s3 + $0x60c] ss:$16 sps:$4 sm:$0xff]  }
 0x1b0   :  { %v11734_v56 = vpack.c.bf16 %v1838_v47, %v1836_v60  ;;  %v1784_v8 = vmax.f32 %v1732_v1, %v1734_v27  ;;  %v1736_v15 = vmax.f32 %v11465_v51, %v1566_v30  ;;  %v1738_v59 = vmax.f32 %v11467_v13, %v1669_v43  ;;  %v1568_v62 = vpop.f32.mrb[91].mxu0  ;;  %v1671_v58 = vpop.f32.mrb[91].mxu1 }
 0x1b1   :  { %v11738_v17 = vpack.c.bf16 %v1839_v4, %v1837_v41  ;;  %v1785_v37 = vmax.f32 %v1733_v31, %v1735_v7  ;;  %v1737_v21 = vmax.f32 %v11469_v25, %v1568_v62  ;;  %v1739_v10 = vmax.f32 %v11471_v29, %v1671_v58  ;;  %4196 = vmatpush1.bf16.msra.mxu0 %v9501_v53 }
 0x1b2   :  { %v1812_v20 = vadd.f32 %v1784_v8, %v11201_v48  ;;  %v1786_v36 = vmax.f32 %v1736_v15, %v1738_v59  ;;  %4711 = vmatpush1.bf16.msra.mxu1 %v9504_v32  ;;  %4268 = vmatprep.subr.bf16.mxu0 %v9509_v52 }
 0x1b3   :  { %v1813_v51 = vadd.f32 %v1785_v37, %v11207_v44  ;;  %v1787_v13 = vmax.f32 %v1737_v21, %v1739_v10  ;;  %4104 = vmatprep.mubr.bf16.mxu0 %v11738_v17  ;;  %4619 = vmatprep.mubr.bf16.mxu1 %v11738_v17 }
 0x1b4   :  { %v1814_v25 = vadd.f32 %v1786_v36, %v11201_v48  ;;  %4105 = vmatmul.mubr.bf16.gmra.mrb[116].mxu0 %v11734_v56  ;;  %4620 = vmatmul.mubr.bf16.gmra.mrb[116].mxu1 %v11734_v56  ;;  %v1840_v53 = vmax.f32 %v1812_v20, 0.0 }
 0x1b5   :  { %v1815_v29 = vadd.f32 %v1787_v13, %v11207_v44  ;;  %v1572_v46 = vpop.f32.mrb[92].mxu0  ;;  %v1675_v42 = vpop.f32.mrb[92].mxu1  ;;  %4783 = vmatprep.subr.bf16.mxu1 %v9512_v23  ;;  %v1841_v28 = vmax.f32 %v1813_v51, 0.0 }
 0x1b6   :  { %v1842_v32 = vmax.f32 %v1814_v25, 0.0  ;;  %v1740_v60 = vmax.f32 %v11485_v40, %v1572_v46  ;;  %v1742_v47 = vmax.f32 %v11487_v18, %v1675_v42  ;;  %v1574_v1 = vpop.f32.mrb[93].mxu0  ;;  %v1677_v27 = vpop.f32.mrb[93].mxu1 }
 0x1b7   :  { %v1843_v16 = vmax.f32 %v1815_v29, 0.0  ;;  %v1741_v52 = vmax.f32 %v11495_v49, %v1574_v1  ;;  %v1743_v41 = vmax.f32 %v11497_v50, %v1677_v27  ;;  %v1576_v4 = vpop.f32.mrb[94].mxu0  ;;  %v1679_v31 = vpop.f32.mrb[94].mxu1 }
 0x1b8   :  { %v11757_v7 = vpack.c.bf16 %v1842_v32, %v1840_v53  ;;  %v1788_v30 = vmax.f32 %v1740_v60, %v1742_v47  ;;  %v1744_v43 = vmax.f32 %v11505_v0, %v1576_v4  ;;  %v1746_v8 = vmax.f32 %v11507_v33, %v1679_v31  ;;  %v1578_v40 = vpop.f32.mrb[95].mxu0  ;;  %v1681_v15 = vpop.f32.mrb[95].mxu1 }
 0x1b9   :  { %v11761_v18 = vpack.c.bf16 %v1843_v16, %v1841_v28  ;;  %v1789_v59 = vmax.f32 %v1741_v52, %v1743_v41  ;;  %v1745_v62 = vmax.f32 %v11509_v34, %v1578_v40  ;;  %v1747_v49 = vmax.f32 %v11511_v45, %v1681_v15 }
 0x1ba   :  { %v1816_v50 = vadd.f32 %v1788_v30, %v11201_v48  ;;  %v1790_v58 = vmax.f32 %v1744_v43, %v1746_v8 }
 0x1bb   :  { %v1817_v37 = vadd.f32 %v1789_v59, %v11207_v44  ;;  %v1791_v21 = vmax.f32 %v1745_v62, %v1747_v49  ;;  %4114 = vmatprep.mubr.bf16.mxu0 %v11761_v18  ;;  %4629 = vmatprep.mubr.bf16.mxu1 %v11761_v18 }
 0x1bc   :  { %v1818_v0 = vadd.f32 %v1790_v58, %v11201_v48  ;;  %4115 = vmatmul.mubr.bf16.gmra.mrb[120].mxu0 %v11757_v7  ;;  %4630 = vmatmul.mubr.bf16.gmra.mrb[120].mxu1 %v11757_v7  ;;  %v1844_v10 = vmax.f32 %v1816_v50, 0.0 }
 0x1bd   :  { %v1819_v33 = vadd.f32 %v1791_v21, %v11207_v44  ;;  %v1582_v34 = vpop.f32.mrb[96].mxu0  ;;  %v1685_v45 = vpop.f32.mrb[96].mxu1  ;;  %v1845_v25 = vmax.f32 %v1817_v37, 0.0 }
 0x1be   :  { %v1846_v23 = vmax.f32 %v1818_v0, 0.0  ;;  %v1748_v20 = vmax.f32 %v11525_v35, %v1582_v34  ;;  %v1750_v36 = vmax.f32 %v11527_v57, %v1685_v45  ;;  %v1584_v51 = vpop.f32.mrb[97].mxu0  ;;  %v1687_v13 = vpop.f32.mrb[97].mxu1 }
 0x1bf   :  { %v1847_v29 = vmax.f32 %v1819_v33, 0.0  ;;  %v1749_v46 = vmax.f32 %v11535_v26, %v1584_v51  ;;  %v1751_v42 = vmax.f32 %v11537_v11, %v1687_v13  ;;  %v1586_v53 = vpop.f32.mrb[98].mxu0  ;;  %v1689_v32 = vpop.f32.mrb[98].mxu1 }
 0x1c0   :  { %v11777_v60 = vpack.c.bf16 %v1846_v23, %v1844_v10  ;;  %v1792_v47 = vmax.f32 %v1748_v20, %v1750_v36  ;;  %v1752_v1 = vmax.f32 %v11545_v24, %v1586_v53  ;;  %v1754_v27 = vmax.f32 %v11547_v61, %v1689_v32  ;;  %v1588_v35 = vpop.f32.mrb[99].mxu0  ;;  %v1691_v28 = vpop.f32.mrb[99].mxu1 }
 0x1c1   :  { %v11781_v57 = vpack.c.bf16 %v1847_v29, %v1845_v25  ;;  %v1793_v16 = vmax.f32 %v1749_v46, %v1751_v42  ;;  %v1753_v52 = vmax.f32 %v11549_v38, %v1588_v35  ;;  %v1755_v26 = vmax.f32 %v11551_v14, %v1691_v28 }
 0x1c2   :  { %v1820_v11 = vadd.f32 %v1792_v47, %v11201_v48  ;;  %v1794_v41 = vmax.f32 %v1752_v1, %v1754_v27 }
 0x1c3   :  { %v1821_v4 = vadd.f32 %v1793_v16, %v11207_v44  ;;  %v1795_v31 = vmax.f32 %v1753_v52, %v1755_v26  ;;  %4124 = vmatprep.mubr.bf16.mxu0 %v11781_v57  ;;  %4639 = vmatprep.mubr.bf16.mxu1 %v11781_v57 }
 0x1c4   :  { %v1822_v24 = vadd.f32 %v1794_v41, %v11201_v48  ;;  %4125 = vmatmul.mubr.bf16.gmra.mrb[124].mxu0 %v11777_v60  ;;  %4640 = vmatmul.mubr.bf16.gmra.mrb[124].mxu1 %v11777_v60  ;;  %v1848_v30 = vmax.f32 %v1820_v11, 0.0  ;;  %v14126_v11 = vld [vmem:[#allocation10_spill] sm:$0xff] }
 0x1c5   :  { %v1823_v61 = vadd.f32 %v1795_v31, %v11207_v44  ;;  %v1592_v38 = vpop.f32.mrb[100].mxu0  ;;  %v1695_v14 = vpop.f32.mrb[100].mxu1  ;;  %v1849_v62 = vmax.f32 %v1821_v4, 0.0  ;;  %v14127_v4 = vld [vmem:[#allocation11_spill] sm:$0xff] }
 0x1c6   :  { %v1850_v43 = vmax.f32 %v1822_v24, 0.0  ;;  %v1756_v8 = vmax.f32 %v11565_v6, %v1592_v38  ;;  %v1758_v40 = vmax.f32 %v11567_v19, %v1695_v14  ;;  %v1594_v15 = vpop.f32.mrb[101].mxu0  ;;  %v1697_v59 = vpop.f32.mrb[101].mxu1  ;;  %v14128_v38 = vld [vmem:[#allocation12_spill] sm:$0xff] }
 0x1c7   :  { %v1851_v49 = vmax.f32 %v1823_v61, 0.0  ;;  %v1757_v50 = vmax.f32 %v11575_v54, %v1594_v15  ;;  %v1759_v58 = vmax.f32 %v11577_v55, %v1697_v59  ;;  %v1596_v37 = vpop.f32.mrb[102].mxu0  ;;  %v1699_v21 = vpop.f32.mrb[102].mxu1 }
 0x1c8   :  { %v11797_v0 = vpack.c.bf16 %v1850_v43, %v1848_v30  ;;  %v1796_v33 = vmax.f32 %v1756_v8, %v1758_v40  ;;  %v1760_v34 = vmax.f32 %v11585_v12, %v1596_v37  ;;  %v1762_v45 = vmax.f32 %v11587_v9, %v1699_v21  ;;  %v1598_v6 = vpop.f32.mrb[103].mxu0  ;;  %v1701_v10 = vpop.f32.mrb[103].mxu1  ;;  %v14129_v30 = vld [vmem:[#allocation14_spill] sm:$0xff]  ;;  %v14130_v37 = vld [vmem:[#allocation15_spill] sm:$0xff] }
 0x1c9   :  { %v11801_v19 = vpack.c.bf16 %v1851_v49, %v1849_v62  ;;  %v1797_v23 = vmax.f32 %v1757_v50, %v1759_v58  ;;  %v1761_v20 = vmax.f32 %v11589_v5, %v1598_v6  ;;  %v1763_v54 = vmax.f32 %v11591_v39, %v1701_v10 }
 0x1ca   :  { %v1824_v55 = vadd.f32 %v1796_v33, %v11201_v48  ;;  %v1798_v36 = vmax.f32 %v1760_v34, %v1762_v45  ;;  %v14131_v33 = vld [vmem:[#allocation16_spill] sm:$0xff] }
 0x1cb   :  { %v1825_v51 = vadd.f32 %v1797_v23, %v11207_v44  ;;  %v1799_v13 = vmax.f32 %v1761_v20, %v1763_v54  ;;  %4134 = vmatprep.mubr.bf16.mxu0 %v11801_v19  ;;  %4649 = vmatprep.mubr.bf16.mxu1 %v11801_v19  ;;  %v14132_v20 = vld [vmem:[#allocation17_spill] sm:$0xff] }
 0x1cc   :  { %v1826_v12 = vadd.f32 %v1798_v36, %v11201_v48  ;;  %4135 = vmatmul.mubr.bf16.gmra.mrb[128].mxu0 %v11797_v0  ;;  %4650 = vmatmul.mubr.bf16.gmra.mrb[128].mxu1 %v11797_v0  ;;  %v1852_v25 = vmax.f32 %v1824_v55, 0.0  ;;  %v14133_v55 = vld [vmem:[#allocation26_spill] sm:$0xff] }
 0x1cd   :  { %v1827_v9 = vadd.f32 %v1799_v13, %v11207_v44  ;;  %v1602_v5 = vpop.f32.mrb[104].mxu0  ;;  %v1705_v39 = vpop.f32.mrb[104].mxu1  ;;  %v1853_v47 = vmax.f32 %v1825_v51, 0.0 }
 0x1ce   :  { %v1854_v29 = vmax.f32 %v1826_v12, 0.0  ;;  %v1764_v46 = vmax.f32 %v11605_v2, %v1602_v5  ;;  %v1766_v42 = vmax.f32 %v11607_v3, %v1705_v39  ;;  %v1604_v53 = vpop.f32.mrb[105].mxu0  ;;  %v1707_v32 = vpop.f32.mrb[105].mxu1  ;;  %v14134_v5 = vld [vmem:[#allocation27_spill] sm:$0xff] }
 0x1cf   :  { %v1855_v1 = vmax.f32 %v1827_v9, 0.0  ;;  %v1765_v27 = vmax.f32 %v11615_v63, %v1604_v53  ;;  %v1767_v35 = vmax.f32 %v11617_v22, %v1707_v32  ;;  %v1606_v28 = vpop.f32.mrb[106].mxu0  ;;  %v1709_v16 = vpop.f32.mrb[106].mxu1 }
 0x1d0   :  { %v11817_v52 = vpack.c.bf16 %v1854_v29, %v1852_v25  ;;  %v1800_v26 = vmax.f32 %v1764_v46, %v1766_v42  ;;  %v1768_v41 = vmax.f32 %v14126_v11, %v1606_v28  ;;  %v1770_v31 = vmax.f32 %v14127_v4, %v1709_v16  ;;  %v1608_v2 = vpop.f32.mrb[107].mxu0  ;;  %v1711_v24 = vpop.f32.mrb[107].mxu1  ;;  %v14135_v25 = vld [vmem:[#allocation28_spill] sm:$0xff] }
 0x1d1   :  { %v11821_v3 = vpack.c.bf16 %v1855_v1, %v1853_v47  ;;  %v1801_v61 = vmax.f32 %v1765_v27, %v1767_v35  ;;  %v1769_v14 = vmax.f32 %v14128_v38, %v1608_v2  ;;  %v1771_v63 = vmax.f32 %v14129_v30, %v1711_v24  ;;  %v14136_v47 = vld [vmem:[#allocation29_spill] sm:$0xff]  ;;  %v14137_v27 = vld [vmem:[#allocation30_spill] sm:$0xff] }
 0x1d2   :  { %v1828_v22 = vadd.f32 %v1800_v26, %v11201_v48  ;;  %v1802_v43 = vmax.f32 %v1768_v41, %v1770_v31  ;;  %v14138_v31 = vld [vmem:[#allocation19_spill] sm:$0xff] }
 0x1d3   :  { %v1829_v8 = vadd.f32 %v1801_v61, %v11207_v44  ;;  %v1803_v40 = vmax.f32 %v1769_v14, %v1771_v63  ;;  %4144 = vmatprep.mubr.bf16.mxu0 %v11821_v3  ;;  %4659 = vmatprep.mubr.bf16.mxu1 %v11821_v3  ;;  %v9515_v63 = vld [vmem:[%s14033_s3 + $0x624] ss:$16 sps:$4 sm:$0xff]  }
 0x1d4   :  { %v1830_v15 = vadd.f32 %v1802_v43, %v11201_v48  ;;  %4145 = vmatmul.mubr.bf16.gmra.mrb[132].mxu0 %v11817_v52  ;;  %4660 = vmatmul.mubr.bf16.gmra.mrb[132].mxu1 %v11817_v52  ;;  %v1856_v50 = vmax.f32 %v1828_v22, 0.0  ;;  %v9518_v22 = vld [vmem:[%s14033_s3 + $0x62c] ss:$16 sps:$4 sm:$0xff]   ;;  %v14139_v43 = vld [vmem:[#allocation18_spill] sm:$0xff] }
 0x1d5   :  { %v1831_v59 = vadd.f32 %v1803_v40, %v11207_v44  ;;  %v1612_v62 = vpop.f32.mrb[108].mxu0  ;;  %v1715_v49 = vpop.f32.mrb[108].mxu1  ;;  %v1857_v10 = vmax.f32 %v1829_v8, 0.0  ;;  %v9513_v8 = vld [vmem:[%s14033_s3 + $0x620] ss:$16 sps:$4 sm:$0xff]  }
 0x1d6   :  { %v1858_v58 = vmax.f32 %v1830_v15, 0.0  ;;  %v1772_v21 = vmax.f32 %v14130_v37, %v1612_v62  ;;  %v1774_v34 = vmax.f32 %v14131_v33, %v1715_v49  ;;  %v1614_v45 = vpop.f32.mrb[109].mxu0  ;;  %v1717_v6 = vpop.f32.mrb[109].mxu1  ;;  %v9516_v40 = vld [vmem:[%s14033_s3 + $0x628] ss:$16 sps:$4 sm:$0xff]  }
 0x1d7   :  { %v1859_v23 = vmax.f32 %v1831_v59, 0.0  ;;  %v1773_v54 = vmax.f32 %v14132_v20, %v1614_v45  ;;  %v1775_v36 = vmax.f32 %v14133_v55, %v1717_v6  ;;  %v1616_v51 = vpop.f32.mrb[110].mxu0  ;;  %v1719_v13 = vpop.f32.mrb[110].mxu1  ;;  %v14140_v15 = vld [vmem:[#allocation21_spill] sm:$0xff]  ;;  %v9521_v59 = vld [vmem:[%s14033_s3 + $0x644] ss:$16 sps:$4 sm:$0xff]  }
 0x1d8   :  { %v11837_v12 = vpack.c.bf16 %v1858_v58, %v1856_v50  ;;  %v1804_v9 = vmax.f32 %v1772_v21, %v1774_v34  ;;  %v1776_v39 = vmax.f32 %v14134_v5, %v1616_v51  ;;  %v1778_v29 = vmax.f32 %v14135_v25, %v1719_v13  ;;  %v1618_v46 = vpop.f32.mrb[111].mxu0  ;;  %v1721_v42 = vpop.f32.mrb[111].mxu1  ;;  %v9524_v62 = vld [vmem:[%s14033_s3 + $0x64c] ss:$16 sps:$4 sm:$0xff]   ;;  %v9519_v49 = vld [vmem:[%s14033_s3 + $0x640] ss:$16 sps:$4 sm:$0xff]  }
 0x1d9   :  { %v11841_v53 = vpack.c.bf16 %v1859_v23, %v1857_v10  ;;  %v1805_v32 = vmax.f32 %v1773_v54, %v1775_v36  ;;  %v1777_v1 = vmax.f32 %v14136_v47, %v1618_v46  ;;  %v1779_v35 = vmax.f32 %v14137_v27, %v1721_v42  ;;  %v9522_v50 = vld [vmem:[%s14033_s3 + $0x648] ss:$16 sps:$4 sm:$0xff]   ;;  %v9527_v58 = vld [vmem:[%s14033_s3 + $0x664] ss:$16 sps:$4 sm:$0xff]   ;;  %v9530_v37 = vld [vmem:[%s14033_s3 + $0x66c] ss:$16 sps:$4 sm:$0xff]  }
 0x1da   :  { %v1832_v28 = vadd.f32 %v1804_v9, %v11201_v48  ;;  %v1806_v16 = vmax.f32 %v1776_v39, %v1778_v29  ;;  %v14141_v21 = vld [vmem:[#allocation20_spill] sm:$0xff]  ;;  %v9528_v34 = vld [vmem:[%s14033_s3 + $0x668] ss:$16 sps:$4 sm:$0xff]   ;;  %v9536_v10 = vld [vmem:[%s14033_s3 + $0x68c] ss:$16 sps:$4 sm:$0xff]  }
 0x1db   :  { %v1833_v26 = vadd.f32 %v1805_v32, %v11207_v44  ;;  %v1807_v11 = vmax.f32 %v1777_v1, %v1779_v35  ;;  %4154 = vmatprep.mubr.bf16.mxu0 %v11841_v53  ;;  %4669 = vmatprep.mubr.bf16.mxu1 %v11841_v53  ;;  %v9525_v33 = vld [vmem:[%s14033_s3 + $0x660] ss:$16 sps:$4 sm:$0xff]   ;;  %v14142_v45 = vld [vmem:[#allocation23_spill] sm:$0xff]  ;;  %v9533_v6 = vld [vmem:[%s14033_s3 + $0x684] ss:$16 sps:$4 sm:$0xff]  }
 0x1dc   :  { %v1834_v41 = vadd.f32 %v1806_v16, %v11201_v48  ;;  %4155 = vmatmul.mubr.bf16.gmra.mrb[136].mxu0 %v11837_v12  ;;  %4670 = vmatmul.mubr.bf16.gmra.mrb[136].mxu1 %v11837_v12  ;;  %v1860_v2 = vmax.f32 %v1832_v28, 0.0  ;;  %v9507_v48 = vld [vmem:[%s14033_s3 + $0x600] ss:$16 sps:$4 sm:$0xff]   ;;  %v9534_v20 = vld [vmem:[%s14033_s3 + $0x688] ss:$16 sps:$4 sm:$0xff]  }
 0x1dd   :  { %v1835_v4 = vadd.f32 %v1807_v11, %v11207_v44  ;;  %4197 = vmatprep.mubr.bf16.mxu0 %v14138_v31  ;;  %4712 = vmatprep.mubr.bf16.mxu1 %v14138_v31  ;;  %v1861_v61 = vmax.f32 %v1833_v26, 0.0  ;;  %v9510_v44 = vld [vmem:[%s14033_s3 + $0x608] ss:$16 sps:$4 sm:$0xff]   ;;  %v9531_v23 = vld [vmem:[%s14033_s3 + $0x680] ss:$16 sps:$4 sm:$0xff]  }
 0x1de   :  { %v1862_v24 = vmax.f32 %v1834_v41, 0.0  ;;  %v9539_v54 = vld [vmem:[%s14033_s3 + $0x6a4] ss:$16 sps:$4 sm:$0xff]   ;;  %v9542_v55 = vld [vmem:[%s14033_s3 + $0x6ac] ss:$16 sps:$4 sm:$0xff]  }
 0x1df   :  { %v1863_v38 = vmax.f32 %v1835_v4, 0.0  ;;  %v14143_v36 = vld [vmem:[#allocation22_spill] sm:$0xff]  ;;  %v9540_v13 = vld [vmem:[%s14033_s3 + $0x6a8] ss:$16 sps:$4 sm:$0xff]   ;;  %v9548_v39 = vld [vmem:[%s14033_s3 + $0x6cc] ss:$16 sps:$4 sm:$0xff]  }
 0x1e0   :  { %v11855_v14 = vpack.c.bf16 %v1862_v24, %v1860_v2  ;;  %v9537_v51 = vld [vmem:[%s14033_s3 + $0x6a0] ss:$16 sps:$4 sm:$0xff]   ;;  %v14144_v9 = vld [vmem:[#allocation25_spill] sm:$0xff]  ;;  %v9545_v5 = vld [vmem:[%s14033_s3 + $0x6c4] ss:$16 sps:$4 sm:$0xff]  }
 0x1e1   :  { %v11857_v30 = vpack.c.bf16 %v1863_v38, %v1861_v61  ;;  %v9543_v25 = vld [vmem:[%s14033_s3 + $0x6c0] ss:$16 sps:$4 sm:$0xff]   ;;  %v9546_v29 = vld [vmem:[%s14033_s3 + $0x6c8] ss:$16 sps:$4 sm:$0xff]   ;;  %v9551_v46 = vld [vmem:[%s14033_s3 + $0x6e4] ss:$16 sps:$4 sm:$0xff]  }
 0x1e2   :  { %v9554_v42 = vld [vmem:[%s14033_s3 + $0x6ec] ss:$16 sps:$4 sm:$0xff]   ;;  %v14145_v32 = vld [vmem:[#allocation24_spill] sm:$0xff]  ;;  %v9552_v1 = vld [vmem:[%s14033_s3 + $0x6e8] ss:$16 sps:$4 sm:$0xff]  }
 0x1e3   :  { %v9549_v47 = vld [vmem:[%s14033_s3 + $0x6e0] ss:$16 sps:$4 sm:$0xff]   ;;  %v14146_v27 = vld [vmem:[#allocation5_spill] sm:$0xff]  ;;  %v9557_v35 = vld [vmem:[%s14033_s3 + $0x704] ss:$16 sps:$4 sm:$0xff]  }
 0x1e4   :  { %4198 = vmatmul.mubr.bf16.vlgmr.msra.gmra.mrb[112].mxu0 %v14139_v43  ;;  %4713 = vmatmul.mubr.bf16.vlgmr.msra.gmra.mrb[112].mxu1 %v14139_v43  ;;  %v9560_v28 = vld [vmem:[%s14033_s3 + $0x70c] ss:$16 sps:$4 sm:$0xff]   ;;  %v9555_v16 = vld [vmem:[%s14033_s3 + $0x700] ss:$16 sps:$4 sm:$0xff]   ;;  %v9558_v26 = vld [vmem:[%s14033_s3 + $0x708] ss:$16 sps:$4 sm:$0xff]  }
 0x1e5   :  { %4269 = vmatpush1.bf16.msra.mxu0 %v9507_v48  ;;  %4784 = vmatpush1.bf16.msra.mxu1 %v9510_v44  ;;  %v9563_v11 = vld [vmem:[%s14033_s3 + $0x724] ss:$16 sps:$4 sm:$0xff]   ;;  %v9566_v41 = vld [vmem:[%s14033_s3 + $0x72c] ss:$16 sps:$4 sm:$0xff]   ;;  %v9561_v2 = vld [vmem:[%s14033_s3 + $0x720] ss:$16 sps:$4 sm:$0xff]  }
 0x1e6   :  { %4207 = vmatprep.mubr.bf16.mxu0 %v14140_v15  ;;  %4722 = vmatprep.mubr.bf16.mxu1 %v14140_v15  ;;  %v14147_v4 = vld [vmem:[#allocation4_spill] sm:$0xff]  ;;  %v9564_v24 = vld [vmem:[%s14033_s3 + $0x728] ss:$16 sps:$4 sm:$0xff]   ;;  %v9572_v48 = vld [vmem:[%s14033_s3 + $0x74c] ss:$16 sps:$4 sm:$0xff]  }
 0x1e7   :  { %4270 = vmatprep.subr.bf16.mxu0 %v9515_v63  ;;  %4785 = vmatprep.subr.bf16.mxu1 %v9518_v22  ;;  %v14148_v61 = vld [vmem:[#allocation7_spill] sm:$0xff]  ;;  %v9569_v38 = vld [vmem:[%s14033_s3 + $0x744] ss:$16 sps:$4 sm:$0xff]   ;;  %v9567_v44 = vld [vmem:[%s14033_s3 + $0x740] ss:$16 sps:$4 sm:$0xff]  }
 0x1e8   :  { %v9570_v63 = vld [vmem:[%s14033_s3 + $0x748] ss:$16 sps:$4 sm:$0xff]   ;;  %v9575_v22 = vld [vmem:[%s14033_s3 + $0x764] ss:$16 sps:$4 sm:$0xff]  }
 0x1e9   :  { %4271 = vmatpush1.bf16.msra.mxu0 %v9513_v8  ;;  %4786 = vmatpush1.bf16.msra.mxu1 %v9516_v40  ;;  %v9578_v8 = vld [vmem:[%s14033_s3 + $0x76c] ss:$16 sps:$4 sm:$0xff]   ;;  %v14149_v40 = vld [vmem:[#allocation6_spill] sm:$0xff] }
 0x1ea   :  { %4272 = vmatprep.subr.bf16.mxu0 %v9521_v59  ;;  %4787 = vmatprep.subr.bf16.mxu1 %v9524_v62  ;;  %v9573_v59 = vld [vmem:[%s14033_s3 + $0x760] ss:$16 sps:$4 sm:$0xff]   ;;  %v9576_v62 = vld [vmem:[%s14033_s3 + $0x768] ss:$16 sps:$4 sm:$0xff]  }
 0x1ec   :  { %4208 = vmatmul.mubr.bf16.gmra.mrb[116].mxu0 %v14141_v21  ;;  %4723 = vmatmul.mubr.bf16.gmra.mrb[116].mxu1 %v14141_v21 }
 0x1ed   :  { %4273 = vmatpush1.bf16.msra.mxu0 %v9519_v49  ;;  %4788 = vmatpush1.bf16.msra.mxu1 %v9522_v50  ;;  %v14150_v49 = vld [vmem:[#allocation9_spill] sm:$0xff]  ;;  %v9581_v50 = vld [vmem:[%s14033_s3 + $0x784] ss:$16 sps:$4 sm:$0xff]  }
 0x1ee   :  { %4217 = vmatprep.mubr.bf16.mxu0 %v14142_v45  ;;  %4732 = vmatprep.mubr.bf16.mxu1 %v14142_v45 }
 0x1ef   :  { %4274 = vmatprep.subr.bf16.mxu0 %v9527_v58  ;;  %4789 = vmatprep.subr.bf16.mxu1 %v9530_v37  ;;  %v9584_v58 = vld [vmem:[%s14033_s3 + $0x78c] ss:$16 sps:$4 sm:$0xff]   ;;  %v9579_v37 = vld [vmem:[%s14033_s3 + $0x780] ss:$16 sps:$4 sm:$0xff]  }
 0x1f1   :  { %4275 = vmatpush1.bf16.msra.mxu0 %v9525_v33  ;;  %4790 = vmatpush1.bf16.msra.mxu1 %v9528_v34  ;;  %v9582_v33 = vld [vmem:[%s14033_s3 + $0x788] ss:$16 sps:$4 sm:$0xff]   ;;  %v9587_v34 = vld [vmem:[%s14033_s3 + $0x7a4] ss:$16 sps:$4 sm:$0xff]  }
 0x1f2   :  { %4276 = vmatprep.subr.bf16.mxu0 %v9533_v6  ;;  %4791 = vmatprep.subr.bf16.mxu1 %v9536_v10  ;;  %v9590_v6 = vld [vmem:[%s14033_s3 + $0x7ac] ss:$16 sps:$4 sm:$0xff]   ;;  %v14151_v10 = vld [vmem:[#allocation8_spill] sm:$0xff] }
 0x1f4   :  { %4218 = vmatmul.mubr.bf16.gmra.mrb[120].mxu0 %v14143_v36  ;;  %4733 = vmatmul.mubr.bf16.gmra.mrb[120].mxu1 %v14143_v36 }
 0x1f5   :  { %4277 = vmatpush1.bf16.msra.mxu0 %v9531_v23  ;;  %4792 = vmatpush1.bf16.msra.mxu1 %v9534_v20  ;;  %v9585_v23 = vld [vmem:[%s14033_s3 + $0x7a0] ss:$16 sps:$4 sm:$0xff]   ;;  %v9588_v20 = vld [vmem:[%s14033_s3 + $0x7a8] ss:$16 sps:$4 sm:$0xff]  }
 0x1f6   :  { %4227 = vmatprep.mubr.bf16.mxu0 %v14144_v9  ;;  %4742 = vmatprep.mubr.bf16.mxu1 %v14144_v9 }
 0x1f7   :  { %4278 = vmatprep.subr.bf16.mxu0 %v9539_v54  ;;  %4793 = vmatprep.subr.bf16.mxu1 %v9542_v55  ;;  %v9593_v54 = vld [vmem:[%s14033_s3 + $0x7c4] ss:$16 sps:$4 sm:$0xff]   ;;  %v9596_v55 = vld [vmem:[%s14033_s3 + $0x7cc] ss:$16 sps:$4 sm:$0xff]  }
 0x1f9   :  { %4279 = vmatpush1.bf16.msra.mxu0 %v9537_v51  ;;  %4794 = vmatpush1.bf16.msra.mxu1 %v9540_v13  ;;  %v9591_v51 = vld [vmem:[%s14033_s3 + $0x7c0] ss:$16 sps:$4 sm:$0xff]   ;;  %v9594_v13 = vld [vmem:[%s14033_s3 + $0x7c8] ss:$16 sps:$4 sm:$0xff]  }
 0x1fa   :  { %4280 = vmatprep.subr.bf16.mxu0 %v9545_v5  ;;  %4795 = vmatprep.subr.bf16.mxu1 %v9548_v39  ;;  %v9599_v5 = vld [vmem:[%s14033_s3 + $0x7e4] ss:$16 sps:$4 sm:$0xff]   ;;  %v9602_v39 = vld [vmem:[%s14033_s3 + $0x7ec] ss:$16 sps:$4 sm:$0xff]  }
 0x1fc   :  { %4228 = vmatmul.mubr.bf16.gmra.mrb[124].mxu0 %v14145_v32  ;;  %4743 = vmatmul.mubr.bf16.gmra.mrb[124].mxu1 %v14145_v32 }
 0x1fd   :  { %4281 = vmatpush1.bf16.msra.mxu0 %v9543_v25  ;;  %4796 = vmatpush1.bf16.msra.mxu1 %v9546_v29  ;;  %v9597_v25 = vld [vmem:[%s14033_s3 + $0x7e0] ss:$16 sps:$4 sm:$0xff]   ;;  %v9600_v29 = vld [vmem:[%s14033_s3 + $0x7e8] ss:$16 sps:$4 sm:$0xff]  }
 0x1fe   :  { %4237 = vmatprep.mubr.bf16.mxu0 %v14146_v27  ;;  %4752 = vmatprep.mubr.bf16.mxu1 %v14146_v27 }
 0x1ff   :  { %4282 = vmatprep.subr.bf16.mxu0 %v9551_v46  ;;  %4797 = vmatprep.subr.bf16.mxu1 %v9554_v42  ;;  %v9605_v46 = vld [vmem:[%s14033_s3 + $0x804] ss:$16 sps:$4 sm:$0xff]   ;;  %v9608_v42 = vld [vmem:[%s14033_s3 + $0x80c] ss:$16 sps:$4 sm:$0xff]  }
 0x201   :  { %4283 = vmatpush1.bf16.msra.mxu0 %v9549_v47  ;;  %4798 = vmatpush1.bf16.msra.mxu1 %v9552_v1  ;;  %v9603_v47 = vld [vmem:[%s14033_s3 + $0x800] ss:$16 sps:$4 sm:$0xff]   ;;  %v9606_v1 = vld [vmem:[%s14033_s3 + $0x808] ss:$16 sps:$4 sm:$0xff]  }
 0x202   :  { %4284 = vmatprep.subr.bf16.mxu0 %v9557_v35  ;;  %4799 = vmatprep.subr.bf16.mxu1 %v9560_v28  ;;  %v9611_v35 = vld [vmem:[%s14033_s3 + $0x824] ss:$16 sps:$4 sm:$0xff]   ;;  %v9614_v28 = vld [vmem:[%s14033_s3 + $0x82c] ss:$16 sps:$4 sm:$0xff]  }
 0x204   :  { %4238 = vmatmul.mubr.bf16.gmra.mrb[128].mxu0 %v14147_v4  ;;  %4753 = vmatmul.mubr.bf16.gmra.mrb[128].mxu1 %v14147_v4 }
 0x205   :  { %4285 = vmatpush1.bf16.msra.mxu0 %v9555_v16  ;;  %4800 = vmatpush1.bf16.msra.mxu1 %v9558_v26  ;;  %v9609_v16 = vld [vmem:[%s14033_s3 + $0x820] ss:$16 sps:$4 sm:$0xff]   ;;  %v9612_v26 = vld [vmem:[%s14033_s3 + $0x828] ss:$16 sps:$4 sm:$0xff]  }
 0x206   :  { %4247 = vmatprep.mubr.bf16.mxu0 %v14148_v61  ;;  %4762 = vmatprep.mubr.bf16.mxu1 %v14148_v61 }
 0x207   :  { %4286 = vmatprep.subr.bf16.mxu0 %v9563_v11  ;;  %4801 = vmatprep.subr.bf16.mxu1 %v9566_v41  ;;  %v9617_v11 = vld [vmem:[%s14033_s3 + $0x844] ss:$16 sps:$4 sm:$0xff]   ;;  %v9620_v41 = vld [vmem:[%s14033_s3 + $0x84c] ss:$16 sps:$4 sm:$0xff]  }
 0x209   :  { %4287 = vmatpush1.bf16.msra.mxu0 %v9561_v2  ;;  %4802 = vmatpush1.bf16.msra.mxu1 %v9564_v24  ;;  %v9615_v2 = vld [vmem:[%s14033_s3 + $0x840] ss:$16 sps:$4 sm:$0xff]   ;;  %v9618_v24 = vld [vmem:[%s14033_s3 + $0x848] ss:$16 sps:$4 sm:$0xff]  }
 0x20a   :  { %4288 = vmatprep.subr.bf16.mxu0 %v9569_v38  ;;  %4803 = vmatprep.subr.bf16.mxu1 %v9572_v48  ;;  %v9623_v38 = vld [vmem:[%s14033_s3 + $0x864] ss:$16 sps:$4 sm:$0xff]   ;;  %v9626_v48 = vld [vmem:[%s14033_s3 + $0x86c] ss:$16 sps:$4 sm:$0xff]  }
 0x20c   :  { %4248 = vmatmul.mubr.bf16.gmra.mrb[132].mxu0 %v14149_v40  ;;  %4763 = vmatmul.mubr.bf16.gmra.mrb[132].mxu1 %v14149_v40 }
 0x20d   :  { %4289 = vmatpush1.bf16.msra.mxu0 %v9567_v44  ;;  %4804 = vmatpush1.bf16.msra.mxu1 %v9570_v63  ;;  %v9621_v44 = vld [vmem:[%s14033_s3 + $0x860] ss:$16 sps:$4 sm:$0xff]   ;;  %v9624_v63 = vld [vmem:[%s14033_s3 + $0x868] ss:$16 sps:$4 sm:$0xff]  }
 0x20e   :  { %4257 = vmatprep.mubr.bf16.mxu0 %v14150_v49  ;;  %4772 = vmatprep.mubr.bf16.mxu1 %v14150_v49 }
 0x20f   :  { %4290 = vmatprep.subr.bf16.mxu0 %v9575_v22  ;;  %4805 = vmatprep.subr.bf16.mxu1 %v9578_v8  ;;  %v9629_v22 = vld [vmem:[%s14033_s3 + $0x884] ss:$16 sps:$4 sm:$0xff]   ;;  %v9632_v8 = vld [vmem:[%s14033_s3 + $0x88c] ss:$16 sps:$4 sm:$0xff]  }
 0x211   :  { %4291 = vmatpush1.bf16.msra.mxu0 %v9573_v59  ;;  %4806 = vmatpush1.bf16.msra.mxu1 %v9576_v62  ;;  %v9627_v59 = vld [vmem:[%s14033_s3 + $0x880] ss:$16 sps:$4 sm:$0xff]   ;;  %v9630_v62 = vld [vmem:[%s14033_s3 + $0x888] ss:$16 sps:$4 sm:$0xff]  }
 0x212   :  { %4292 = vmatprep.subr.bf16.mxu0 %v9581_v50  ;;  %4807 = vmatprep.subr.bf16.mxu1 %v9584_v58  ;;  %v9635_v50 = vld [vmem:[%s14033_s3 + $0x8a4] ss:$16 sps:$4 sm:$0xff]   ;;  %v9638_v58 = vld [vmem:[%s14033_s3 + $0x8ac] ss:$16 sps:$4 sm:$0xff]  }
 0x214   :  { %4258 = vmatmul.mubr.bf16.gmra.mrb[136].mxu0 %v14151_v10  ;;  %4773 = vmatmul.mubr.bf16.gmra.mrb[136].mxu1 %v14151_v10 }
 0x215   :  { %4293 = vmatpush1.bf16.msra.mxu0 %v9579_v37  ;;  %4808 = vmatpush1.bf16.msra.mxu1 %v9582_v33  ;;  %v9633_v37 = vld [vmem:[%s14033_s3 + $0x8a0] ss:$16 sps:$4 sm:$0xff]   ;;  %v9636_v33 = vld [vmem:[%s14033_s3 + $0x8a8] ss:$16 sps:$4 sm:$0xff]  }
 0x216   :  { %4300 = vmatprep.mubr.bf16.mxu0 %v11738_v17  ;;  %4815 = vmatprep.mubr.bf16.mxu1 %v11738_v17 }
 0x217   :  { %4294 = vmatprep.subr.bf16.mxu0 %v9587_v34  ;;  %4809 = vmatprep.subr.bf16.mxu1 %v9590_v6  ;;  %v9641_v34 = vld [vmem:[%s14033_s3 + $0x8c4] ss:$16 sps:$4 sm:$0xff]   ;;  %v9644_v6 = vld [vmem:[%s14033_s3 + $0x8cc] ss:$16 sps:$4 sm:$0xff]  }
 0x219   :  { %4295 = vmatpush1.bf16.msra.mxu0 %v9585_v23  ;;  %4810 = vmatpush1.bf16.msra.mxu1 %v9588_v20  ;;  %v9639_v23 = vld [vmem:[%s14033_s3 + $0x8c0] ss:$16 sps:$4 sm:$0xff]   ;;  %v9642_v20 = vld [vmem:[%s14033_s3 + $0x8c8] ss:$16 sps:$4 sm:$0xff]  }
 0x21a   :  { %4296 = vmatprep.subr.bf16.mxu0 %v9593_v54  ;;  %4811 = vmatprep.subr.bf16.mxu1 %v9596_v55  ;;  %v9647_v54 = vld [vmem:[%s14033_s3 + $0x8e4] ss:$16 sps:$4 sm:$0xff]   ;;  %v9650_v55 = vld [vmem:[%s14033_s3 + $0x8ec] ss:$16 sps:$4 sm:$0xff]  }
 0x21d   :  { %4297 = vmatpush1.bf16.msra.mxu0 %v9591_v51  ;;  %4812 = vmatpush1.bf16.msra.mxu1 %v9594_v13  ;;  %v9645_v51 = vld [vmem:[%s14033_s3 + $0x8e0] ss:$16 sps:$4 sm:$0xff]   ;;  %v9648_v13 = vld [vmem:[%s14033_s3 + $0x8e8] ss:$16 sps:$4 sm:$0xff]  }
 0x21e   :  { %4298 = vmatprep.subr.bf16.mxu0 %v9599_v5  ;;  %4813 = vmatprep.subr.bf16.mxu1 %v9602_v39  ;;  %v9653_v5 = vld [vmem:[%s14033_s3 + $0x904] ss:$16 sps:$4 sm:$0xff]   ;;  %v9656_v39 = vld [vmem:[%s14033_s3 + $0x90c] ss:$16 sps:$4 sm:$0xff]  }
 0x221   :  { %4299 = vmatpush1.bf16.msra.mxu0 %v9597_v25  ;;  %4814 = vmatpush1.bf16.msra.mxu1 %v9600_v29  ;;  %v9651_v25 = vld [vmem:[%s14033_s3 + $0x900] ss:$16 sps:$4 sm:$0xff]   ;;  %v9654_v29 = vld [vmem:[%s14033_s3 + $0x908] ss:$16 sps:$4 sm:$0xff]  }
 0x222   :  { %4371 = vmatprep.subr.bf16.mxu0 %v9605_v46  ;;  %4886 = vmatprep.subr.bf16.mxu1 %v9608_v42  ;;  %v9659_v46 = vld [vmem:[%s14033_s3 + $0x924] ss:$16 sps:$4 sm:$0xff]   ;;  %v9662_v42 = vld [vmem:[%s14033_s3 + $0x92c] ss:$16 sps:$4 sm:$0xff]  }
 0x224   :  { %4301 = vmatmul.mubr.bf16.vlgmr.msra.gmra.mrb[112].mxu0 %v11734_v56  ;;  %4816 = vmatmul.mubr.bf16.vlgmr.msra.gmra.mrb[112].mxu1 %v11734_v56 }
 0x225   :  { %4310 = vmatprep.mubr.bf16.mxu0 %v11761_v18  ;;  %4372 = vmatpush1.bf16.msra.mxu0 %v9603_v47  ;;  %v9657_v47 = vld [vmem:[%s14033_s3 + $0x920] ss:$16 sps:$4 sm:$0xff]  }
 0x226   :  { %4825 = vmatprep.mubr.bf16.mxu1 %v11761_v18  ;;  %4887 = vmatpush1.bf16.msra.mxu1 %v9606_v1  ;;  %v9660_v1 = vld [vmem:[%s14033_s3 + $0x928] ss:$16 sps:$4 sm:$0xff]  }
 0x227   :  { %4373 = vmatprep.subr.bf16.mxu0 %v9611_v35  ;;  %4888 = vmatprep.subr.bf16.mxu1 %v9614_v28  ;;  %v9665_v35 = vld [vmem:[%s14033_s3 + $0x944] ss:$16 sps:$4 sm:$0xff]   ;;  %v9668_v28 = vld [vmem:[%s14033_s3 + $0x94c] ss:$16 sps:$4 sm:$0xff]  }
 0x229   :  { %4374 = vmatpush1.bf16.msra.mxu0 %v9609_v16  ;;  %v9663_v16 = vld [vmem:[%s14033_s3 + $0x940] ss:$16 sps:$4 sm:$0xff]  }
 0x22a   :  { %4889 = vmatpush1.bf16.msra.mxu1 %v9612_v26  ;;  %4375 = vmatprep.subr.bf16.mxu0 %v9617_v11  ;;  %v9666_v26 = vld [vmem:[%s14033_s3 + $0x948] ss:$16 sps:$4 sm:$0xff]   ;;  %v9671_v11 = vld [vmem:[%s14033_s3 + $0x964] ss:$16 sps:$4 sm:$0xff]  }
 0x22b   :  { %4890 = vmatprep.subr.bf16.mxu1 %v9620_v41  ;;  %v9674_v41 = vld [vmem:[%s14033_s3 + $0x96c] ss:$16 sps:$4 sm:$0xff]  }
 0x22c   :  { %4311 = vmatmul.mubr.bf16.gmra.mrb[116].mxu0 %v11757_v7  ;;  %4826 = vmatmul.mubr.bf16.gmra.mrb[116].mxu1 %v11757_v7 }
 0x22d   :  { %4320 = vmatprep.mubr.bf16.mxu0 %v11781_v57  ;;  %4376 = vmatpush1.bf16.msra.mxu0 %v9615_v2  ;;  %v9669_v2 = vld [vmem:[%s14033_s3 + $0x960] ss:$16 sps:$4 sm:$0xff]  }
 0x22e   :  { %4835 = vmatprep.mubr.bf16.mxu1 %v11781_v57  ;;  %4891 = vmatpush1.bf16.msra.mxu1 %v9618_v24  ;;  %v9672_v24 = vld [vmem:[%s14033_s3 + $0x968] ss:$16 sps:$4 sm:$0xff]  }
 0x22f   :  { %4377 = vmatprep.subr.bf16.mxu0 %v9623_v38  ;;  %4892 = vmatprep.subr.bf16.mxu1 %v9626_v48  ;;  %v9677_v38 = vld [vmem:[%s14033_s3 + $0x984] ss:$16 sps:$4 sm:$0xff]   ;;  %v9680_v48 = vld [vmem:[%s14033_s3 + $0x98c] ss:$16 sps:$4 sm:$0xff]  }
 0x231   :  { %4378 = vmatpush1.bf16.msra.mxu0 %v9621_v44  ;;  %v9675_v44 = vld [vmem:[%s14033_s3 + $0x980] ss:$16 sps:$4 sm:$0xff]  }
 0x232   :  { %4893 = vmatpush1.bf16.msra.mxu1 %v9624_v63  ;;  %4379 = vmatprep.subr.bf16.mxu0 %v9629_v22  ;;  %v9678_v63 = vld [vmem:[%s14033_s3 + $0x988] ss:$16 sps:$4 sm:$0xff]   ;;  %v9683_v22 = vld [vmem:[%s14033_s3 + $0x9a4] ss:$16 sps:$4 sm:$0xff]  }
 0x233   :  { %4894 = vmatprep.subr.bf16.mxu1 %v9632_v8  ;;  %v9686_v8 = vld [vmem:[%s14033_s3 + $0x9ac] ss:$16 sps:$4 sm:$0xff]  }
 0x234   :  { %4321 = vmatmul.mubr.bf16.gmra.mrb[120].mxu0 %v11777_v60  ;;  %4836 = vmatmul.mubr.bf16.gmra.mrb[120].mxu1 %v11777_v60 }
 0x235   :  { %4330 = vmatprep.mubr.bf16.mxu0 %v11801_v19  ;;  %4380 = vmatpush1.bf16.msra.mxu0 %v9627_v59  ;;  %v9681_v59 = vld [vmem:[%s14033_s3 + $0x9a0] ss:$16 sps:$4 sm:$0xff]  }
 0x236   :  { %4845 = vmatprep.mubr.bf16.mxu1 %v11801_v19  ;;  %4895 = vmatpush1.bf16.msra.mxu1 %v9630_v62  ;;  %v9684_v62 = vld [vmem:[%s14033_s3 + $0x9a8] ss:$16 sps:$4 sm:$0xff]  }
 0x237   :  { %4381 = vmatprep.subr.bf16.mxu0 %v9635_v50  ;;  %4896 = vmatprep.subr.bf16.mxu1 %v9638_v58  ;;  %v9689_v50 = vld [vmem:[%s14033_s3 + $0x9c4] ss:$16 sps:$4 sm:$0xff]   ;;  %v9692_v58 = vld [vmem:[%s14033_s3 + $0x9cc] ss:$16 sps:$4 sm:$0xff]  }
 0x239   :  { %4382 = vmatpush1.bf16.msra.mxu0 %v9633_v37  ;;  %v9687_v37 = vld [vmem:[%s14033_s3 + $0x9c0] ss:$16 sps:$4 sm:$0xff]  }
 0x23a   :  { %4897 = vmatpush1.bf16.msra.mxu1 %v9636_v33  ;;  %4383 = vmatprep.subr.bf16.mxu0 %v9641_v34  ;;  %v9690_v33 = vld [vmem:[%s14033_s3 + $0x9c8] ss:$16 sps:$4 sm:$0xff]   ;;  %v9695_v34 = vld [vmem:[%s14033_s3 + $0x9e4] ss:$16 sps:$4 sm:$0xff]  }
 0x23b   :  { %4898 = vmatprep.subr.bf16.mxu1 %v9644_v6  ;;  %v9698_v6 = vld [vmem:[%s14033_s3 + $0x9ec] ss:$16 sps:$4 sm:$0xff]  }
 0x23c   :  { %4331 = vmatmul.mubr.bf16.gmra.mrb[124].mxu0 %v11797_v0  ;;  %4846 = vmatmul.mubr.bf16.gmra.mrb[124].mxu1 %v11797_v0 }
 0x23d   :  { %4340 = vmatprep.mubr.bf16.mxu0 %v11821_v3  ;;  %4384 = vmatpush1.bf16.msra.mxu0 %v9639_v23  ;;  %v9693_v23 = vld [vmem:[%s14033_s3 + $0x9e0] ss:$16 sps:$4 sm:$0xff]  }
 0x23e   :  { %4855 = vmatprep.mubr.bf16.mxu1 %v11821_v3  ;;  %4899 = vmatpush1.bf16.msra.mxu1 %v9642_v20  ;;  %v9696_v20 = vld [vmem:[%s14033_s3 + $0x9e8] ss:$16 sps:$4 sm:$0xff]  }
 0x23f   :  { %4385 = vmatprep.subr.bf16.mxu0 %v9647_v54  ;;  %4900 = vmatprep.subr.bf16.mxu1 %v9650_v55  ;;  %v9811_v54 = vld [vmem:[%s14033_s3 + $0x4] ss:$16 sps:$4 sm:$0xff]   ;;  %v9812_v55 = vld [vmem:[%s14033_s3 + $0xc] ss:$16 sps:$4 sm:$0xff]  }
 0x241   :  { %4386 = vmatpush1.bf16.msra.mxu0 %v9645_v51  ;;  %v9813_v51 = vld [vmem:[%s14033_s3] ss:$16 sps:$4 sm:$0xff]  }
 0x242   :  { %4901 = vmatpush1.bf16.msra.mxu1 %v9648_v13  ;;  %4387 = vmatprep.subr.bf16.mxu0 %v9653_v5  ;;  %v9814_v13 = vld [vmem:[%s14033_s3 + $0x8] ss:$16 sps:$4 sm:$0xff]   ;;  %v9815_v5 = vld [vmem:[%s14033_s3 + $0x24] ss:$16 sps:$4 sm:$0xff]  }
 0x243   :  { %4902 = vmatprep.subr.bf16.mxu1 %v9656_v39  ;;  %v9816_v39 = vld [vmem:[%s14033_s3 + $0x2c] ss:$16 sps:$4 sm:$0xff]  }
 0x244   :  { %4341 = vmatmul.mubr.bf16.gmra.mrb[128].mxu0 %v11817_v52  ;;  %4856 = vmatmul.mubr.bf16.gmra.mrb[128].mxu1 %v11817_v52 }
 0x245   :  { %4350 = vmatprep.mubr.bf16.mxu0 %v11841_v53  ;;  %4388 = vmatpush1.bf16.msra.mxu0 %v9651_v25  ;;  %v9817_v25 = vld [vmem:[%s14033_s3 + $0x20] ss:$16 sps:$4 sm:$0xff]  }
 0x246   :  { %4865 = vmatprep.mubr.bf16.mxu1 %v11841_v53  ;;  %4903 = vmatpush1.bf16.msra.mxu1 %v9654_v29  ;;  %v9818_v29 = vld [vmem:[%s14033_s3 + $0x28] ss:$16 sps:$4 sm:$0xff]  }
 0x247   :  { %4389 = vmatprep.subr.bf16.mxu0 %v9659_v46  ;;  %4904 = vmatprep.subr.bf16.mxu1 %v9662_v42  ;;  %v9819_v46 = vld [vmem:[%s14033_s3 + $0x44] ss:$16 sps:$4 sm:$0xff]   ;;  %v9820_v42 = vld [vmem:[%s14033_s3 + $0x4c] ss:$16 sps:$4 sm:$0xff]  }
 0x249   :  { %4390 = vmatpush1.bf16.msra.mxu0 %v9657_v47  ;;  %v9821_v47 = vld [vmem:[%s14033_s3 + $0x40] ss:$16 sps:$4 sm:$0xff]  }
 0x24a   :  { %4905 = vmatpush1.bf16.msra.mxu1 %v9660_v1  ;;  %4391 = vmatprep.subr.bf16.mxu0 %v9665_v35  ;;  %v9822_v1 = vld [vmem:[%s14033_s3 + $0x48] ss:$16 sps:$4 sm:$0xff]   ;;  %v9823_v35 = vld [vmem:[%s14033_s3 + $0x64] ss:$16 sps:$4 sm:$0xff]  }
 0x24b   :  { %4906 = vmatprep.subr.bf16.mxu1 %v9668_v28  ;;  %v9824_v28 = vld [vmem:[%s14033_s3 + $0x6c] ss:$16 sps:$4 sm:$0xff]  }
 0x24c   :  { %4351 = vmatmul.mubr.bf16.gmra.mrb[132].mxu0 %v11837_v12  ;;  %4866 = vmatmul.mubr.bf16.gmra.mrb[132].mxu1 %v11837_v12 }
 0x24d   :  { %4360 = vmatprep.mubr.bf16.mxu0 %v11857_v30  ;;  %4392 = vmatpush1.bf16.msra.mxu0 %v9663_v16  ;;  %v9825_v16 = vld [vmem:[%s14033_s3 + $0x60] ss:$16 sps:$4 sm:$0xff]  }
 0x24e   :  { %4875 = vmatprep.mubr.bf16.mxu1 %v11857_v30  ;;  %4907 = vmatpush1.bf16.msra.mxu1 %v9666_v26  ;;  %v9826_v26 = vld [vmem:[%s14033_s3 + $0x68] ss:$16 sps:$4 sm:$0xff]  }
 0x24f   :  { %4393 = vmatprep.subr.bf16.mxu0 %v9671_v11  ;;  %4908 = vmatprep.subr.bf16.mxu1 %v9674_v41  ;;  %v9827_v11 = vld [vmem:[%s14033_s3 + $0x84] ss:$16 sps:$4 sm:$0xff]   ;;  %v9828_v41 = vld [vmem:[%s14033_s3 + $0x8c] ss:$16 sps:$4 sm:$0xff]  }
 0x251   :  { %4394 = vmatpush1.bf16.msra.mxu0 %v9669_v2  ;;  %v9829_v2 = vld [vmem:[%s14033_s3 + $0x80] ss:$16 sps:$4 sm:$0xff]  }
 0x252   :  { %4909 = vmatpush1.bf16.msra.mxu1 %v9672_v24  ;;  %4395 = vmatprep.subr.bf16.mxu0 %v9677_v38  ;;  %v9830_v24 = vld [vmem:[%s14033_s3 + $0x88] ss:$16 sps:$4 sm:$0xff]   ;;  %v9831_v38 = vld [vmem:[%s14033_s3 + $0xa4] ss:$16 sps:$4 sm:$0xff]  }
 0x253   :  { %4910 = vmatprep.subr.bf16.mxu1 %v9680_v48  ;;  %v9832_v48 = vld [vmem:[%s14033_s3 + $0xac] ss:$16 sps:$4 sm:$0xff]  }
 0x254   :  { %4361 = vmatmul.mubr.bf16.gmra.mrb[136].mxu0 %v11855_v14  ;;  %4876 = vmatmul.mubr.bf16.gmra.mrb[136].mxu1 %v11855_v14 }
 0x255   :  { %4396 = vmatpush1.bf16.msra.mxu0 %v9675_v44  ;;  %4403 = vmatprep.mubr.bf16.mxu0 %v14140_v15  ;;  %v9833_v44 = vld [vmem:[%s14033_s3 + $0xa0] ss:$16 sps:$4 sm:$0xff]  }
 0x256   :  { %4911 = vmatpush1.bf16.msra.mxu1 %v9678_v63  ;;  %4918 = vmatprep.mubr.bf16.mxu1 %v14140_v15  ;;  %v9834_v63 = vld [vmem:[%s14033_s3 + $0xa8] ss:$16 sps:$4 sm:$0xff]  }
 0x257   :  { %4397 = vmatprep.subr.bf16.mxu0 %v9683_v22  ;;  %4912 = vmatprep.subr.bf16.mxu1 %v9686_v8  ;;  %v9835_v22 = vld [vmem:[%s14033_s3 + $0xc4] ss:$16 sps:$4 sm:$0xff]   ;;  %v9836_v8 = vld [vmem:[%s14033_s3 + $0xcc] ss:$16 sps:$4 sm:$0xff]  }
 0x259   :  { %4398 = vmatpush1.bf16.msra.mxu0 %v9681_v59  ;;  %v9837_v59 = vld [vmem:[%s14033_s3 + $0xc0] ss:$16 sps:$4 sm:$0xff]  }
 0x25a   :  { %4913 = vmatpush1.bf16.msra.mxu1 %v9684_v62  ;;  %4399 = vmatprep.subr.bf16.mxu0 %v9689_v50  ;;  %v9838_v62 = vld [vmem:[%s14033_s3 + $0xc8] ss:$16 sps:$4 sm:$0xff]   ;;  %v9839_v50 = vld [vmem:[%s14033_s3 + $0xe4] ss:$16 sps:$4 sm:$0xff]  }
 0x25b   :  { %4914 = vmatprep.subr.bf16.mxu1 %v9692_v58  ;;  %v9840_v58 = vld [vmem:[%s14033_s3 + $0xec] ss:$16 sps:$4 sm:$0xff]  }
 0x25d   :  { %4400 = vmatpush1.bf16.msra.mxu0 %v9687_v37  ;;  %v9841_v37 = vld [vmem:[%s14033_s3 + $0xe0] ss:$16 sps:$4 sm:$0xff]  }
 0x25e   :  { %4915 = vmatpush1.bf16.msra.mxu1 %v9690_v33  ;;  %4401 = vmatprep.subr.bf16.mxu0 %v9695_v34  ;;  %v9842_v33 = vld [vmem:[%s14033_s3 + $0xe8] ss:$16 sps:$4 sm:$0xff]   ;;  %v9843_v34 = vld [vmem:[%s14033_s3 + $0x104] ss:$16 sps:$4 sm:$0xff]  }
 0x25f   :  { %4916 = vmatprep.subr.bf16.mxu1 %v9698_v6  ;;  %v9844_v6 = vld [vmem:[%s14033_s3 + $0x10c] ss:$16 sps:$4 sm:$0xff]  }
 0x261   :  { %4402 = vmatpush1.bf16.msra.mxu0 %v9693_v23  ;;  %v9845_v23 = vld [vmem:[%s14033_s3 + $0x100] ss:$16 sps:$4 sm:$0xff]  }
 0x262   :  { %4917 = vmatpush1.bf16.msra.mxu1 %v9696_v20  ;;  %5143 = vmatprep.subr.bf16.mxu0 %v9811_v54  ;;  %v9846_v20 = vld [vmem:[%s14033_s3 + $0x108] ss:$16 sps:$4 sm:$0xff]   ;;  %v9847_v54 = vld [vmem:[%s14033_s3 + $0x124] ss:$16 sps:$4 sm:$0xff]  }
 0x263   :  { %5658 = vmatprep.subr.bf16.mxu1 %v9812_v55  ;;  %v9848_v55 = vld [vmem:[%s14033_s3 + $0x12c] ss:$16 sps:$4 sm:$0xff]  }
 0x264   :  { %4404 = vmatmul.mubr.bf16.vlgmr.msra.gmra.mrb[112].mxu0 %v14141_v21 }
 0x265   :  { %4919 = vmatmul.mubr.bf16.vlgmr.msra.gmra.mrb[112].mxu1 %v14141_v21  ;;  %4413 = vmatprep.mubr.bf16.mxu0 %v14142_v45 }
 0x266   :  { %4928 = vmatprep.mubr.bf16.mxu1 %v14142_v45  ;;  %5144 = vmatpush1.bf16.msra.mxu0 %v9813_v51  ;;  %v9849_v51 = vld [vmem:[%s14033_s3 + $0x120] ss:$16 sps:$4 sm:$0xff]  }
 0x267   :  { %5659 = vmatpush1.bf16.msra.mxu1 %v9814_v13  ;;  %5145 = vmatprep.subr.bf16.mxu0 %v9815_v5  ;;  %v9850_v13 = vld [vmem:[%s14033_s3 + $0x128] ss:$16 sps:$4 sm:$0xff]   ;;  %v9851_v5 = vld [vmem:[%s14033_s3 + $0x144] ss:$16 sps:$4 sm:$0xff]  }
 0x268   :  { %5660 = vmatprep.subr.bf16.mxu1 %v9816_v39  ;;  %v9852_v39 = vld [vmem:[%s14033_s3 + $0x14c] ss:$16 sps:$4 sm:$0xff]  }
 0x26a   :  { %5146 = vmatpush1.bf16.msra.mxu0 %v9817_v25  ;;  %v14152_v25 = vmov 0  }
 0x26b   :  { %5661 = vmatpush1.bf16.msra.mxu1 %v9818_v29  ;;  %5147 = vmatprep.subr.bf16.mxu0 %v9819_v46  ;;  %v9853_v29 = vld [vmem:[%s14033_s3 + $0x140] ss:$16 sps:$4 sm:$0xff]   ;;  %v9854_v46 = vld [vmem:[%s14033_s3 + $0x148] ss:$16 sps:$4 sm:$0xff]  }
 0x26c   :  { %4414 = vmatmul.mubr.bf16.gmra.mrb[116].mxu0 %v14143_v36  ;;  %5662 = vmatprep.subr.bf16.mxu1 %v9820_v42  ;;  %v9855_v42 = vld [vmem:[%s14033_s3 + $0x164] ss:$16 sps:$4 sm:$0xff]  }
 0x26d   :  { %4929 = vmatmul.mubr.bf16.gmra.mrb[116].mxu1 %v14143_v36  ;;  %4423 = vmatprep.mubr.bf16.mxu0 %v14144_v9 }
 0x26e   :  { %4938 = vmatprep.mubr.bf16.mxu1 %v14144_v9  ;;  %5148 = vmatpush1.bf16.msra.mxu0 %v9821_v47  ;;  %v9856_v47 = vld [vmem:[%s14033_s3 + $0x16c] ss:$16 sps:$4 sm:$0xff]  }
 0x26f   :  { %5663 = vmatpush1.bf16.msra.mxu1 %v9822_v1  ;;  %5149 = vmatprep.subr.bf16.mxu0 %v9823_v35  ;;  %v9857_v1 = vld [vmem:[%s14033_s3 + $0x160] ss:$16 sps:$4 sm:$0xff]   ;;  %v9858_v35 = vld [vmem:[%s14033_s3 + $0x168] ss:$16 sps:$4 sm:$0xff]  }
 0x270   :  { %5664 = vmatprep.subr.bf16.mxu1 %v9824_v28  ;;  %v9859_v28 = vld [vmem:[%s14033_s3 + $0x184] ss:$16 sps:$4 sm:$0xff]  }
 0x272   :  { %5150 = vmatpush1.bf16.msra.mxu0 %v9825_v16  ;;  %v9860_v16 = vld [vmem:[%s14033_s3 + $0x18c] ss:$16 sps:$4 sm:$0xff]  }
 0x273   :  { %5665 = vmatpush1.bf16.msra.mxu1 %v9826_v26  ;;  %5151 = vmatprep.subr.bf16.mxu0 %v9827_v11  ;;  %v9861_v26 = vld [vmem:[%s14033_s3 + $0x180] ss:$16 sps:$4 sm:$0xff]   ;;  %v9862_v11 = vld [vmem:[%s14033_s3 + $0x188] ss:$16 sps:$4 sm:$0xff]  }
 0x274   :  { %4424 = vmatmul.mubr.bf16.gmra.mrb[120].mxu0 %v14145_v32  ;;  %5666 = vmatprep.subr.bf16.mxu1 %v9828_v41  ;;  %v9863_v41 = vld [vmem:[%s14033_s3 + $0x1a4] ss:$16 sps:$4 sm:$0xff]  }
 0x275   :  { %4939 = vmatmul.mubr.bf16.gmra.mrb[120].mxu1 %v14145_v32  ;;  %4433 = vmatprep.mubr.bf16.mxu0 %v14146_v27 }
 0x276   :  { %4948 = vmatprep.mubr.bf16.mxu1 %v14146_v27  ;;  %5152 = vmatpush1.bf16.msra.mxu0 %v9829_v2  ;;  %v9864_v2 = vld [vmem:[%s14033_s3 + $0x1ac] ss:$16 sps:$4 sm:$0xff]  }
 0x277   :  { %5667 = vmatpush1.bf16.msra.mxu1 %v9830_v24  ;;  %5153 = vmatprep.subr.bf16.mxu0 %v9831_v38  ;;  %v9865_v24 = vld [vmem:[%s14033_s3 + $0x1a0] ss:$16 sps:$4 sm:$0xff]   ;;  %v9866_v38 = vld [vmem:[%s14033_s3 + $0x1a8] ss:$16 sps:$4 sm:$0xff]  }
 0x278   :  { %5668 = vmatprep.subr.bf16.mxu1 %v9832_v48  ;;  %v9867_v48 = vld [vmem:[%s14033_s3 + $0x1c4] ss:$16 sps:$4 sm:$0xff]  }
 0x27a   :  { %5154 = vmatpush1.bf16.msra.mxu0 %v9833_v44  ;;  %v9868_v44 = vld [vmem:[%s14033_s3 + $0x1cc] ss:$16 sps:$4 sm:$0xff]  }
 0x27b   :  { %5669 = vmatpush1.bf16.msra.mxu1 %v9834_v63  ;;  %5155 = vmatprep.subr.bf16.mxu0 %v9835_v22  ;;  %v9869_v63 = vld [vmem:[%s14033_s3 + $0x1c0] ss:$16 sps:$4 sm:$0xff]   ;;  %v9870_v22 = vld [vmem:[%s14033_s3 + $0x1c8] ss:$16 sps:$4 sm:$0xff]  }
 0x27c   :  { %4434 = vmatmul.mubr.bf16.gmra.mrb[124].mxu0 %v14147_v4  ;;  %5670 = vmatprep.subr.bf16.mxu1 %v9836_v8  ;;  %v9871_v8 = vld [vmem:[%s14033_s3 + $0x1e4] ss:$16 sps:$4 sm:$0xff]  }
 0x27d   :  { %4949 = vmatmul.mubr.bf16.gmra.mrb[124].mxu1 %v14147_v4  ;;  %4443 = vmatprep.mubr.bf16.mxu0 %v14148_v61 }
 0x27e   :  { %4958 = vmatprep.mubr.bf16.mxu1 %v14148_v61  ;;  %5156 = vmatpush1.bf16.msra.mxu0 %v9837_v59  ;;  %v9872_v59 = vld [vmem:[%s14033_s3 + $0x1ec] ss:$16 sps:$4 sm:$0xff]  }
 0x27f   :  { %5671 = vmatpush1.bf16.msra.mxu1 %v9838_v62  ;;  %5157 = vmatprep.subr.bf16.mxu0 %v9839_v50  ;;  %v9873_v62 = vld [vmem:[%s14033_s3 + $0x1e0] ss:$16 sps:$4 sm:$0xff]   ;;  %v9874_v50 = vld [vmem:[%s14033_s3 + $0x1e8] ss:$16 sps:$4 sm:$0xff]  }
 0x280   :  { %5672 = vmatprep.subr.bf16.mxu1 %v9840_v58  ;;  %v9875_v58 = vld [vmem:[%s14033_s3 + $0x204] ss:$16 sps:$4 sm:$0xff]  }
 0x282   :  { %5158 = vmatpush1.bf16.msra.mxu0 %v9841_v37  ;;  %v9876_v37 = vld [vmem:[%s14033_s3 + $0x20c] ss:$16 sps:$4 sm:$0xff]  }
 0x283   :  { %5673 = vmatpush1.bf16.msra.mxu1 %v9842_v33  ;;  %5159 = vmatprep.subr.bf16.mxu0 %v9843_v34  ;;  %v9877_v33 = vld [vmem:[%s14033_s3 + $0x200] ss:$16 sps:$4 sm:$0xff]   ;;  %v9878_v34 = vld [vmem:[%s14033_s3 + $0x208] ss:$16 sps:$4 sm:$0xff]  }
 0x284   :  { %4444 = vmatmul.mubr.bf16.gmra.mrb[128].mxu0 %v14149_v40  ;;  %5674 = vmatprep.subr.bf16.mxu1 %v9844_v6  ;;  %v9879_v6 = vld [vmem:[%s14033_s3 + $0x224] ss:$16 sps:$4 sm:$0xff]  }
 0x285   :  { %4959 = vmatmul.mubr.bf16.gmra.mrb[128].mxu1 %v14149_v40  ;;  %4453 = vmatprep.mubr.bf16.mxu0 %v14150_v49 }
 0x286   :  { %4968 = vmatprep.mubr.bf16.mxu1 %v14150_v49  ;;  %5160 = vmatpush1.bf16.msra.mxu0 %v9845_v23  ;;  %v9880_v23 = vld [vmem:[%s14033_s3 + $0x22c] ss:$16 sps:$4 sm:$0xff]  }
 0x287   :  { %5675 = vmatpush1.bf16.msra.mxu1 %v9846_v20  ;;  %5161 = vmatprep.subr.bf16.mxu0 %v9847_v54  ;;  %v9881_v20 = vld [vmem:[%s14033_s3 + $0x220] ss:$16 sps:$4 sm:$0xff]   ;;  %v9882_v54 = vld [vmem:[%s14033_s3 + $0x228] ss:$16 sps:$4 sm:$0xff]  }
 0x288   :  { %5676 = vmatprep.subr.bf16.mxu1 %v9848_v55  ;;  %v9883_v55 = vld [vmem:[%s14033_s3 + $0x244] ss:$16 sps:$4 sm:$0xff]  }
 0x28a   :  { %5162 = vmatpush1.bf16.msra.mxu0 %v9849_v51  ;;  %v9884_v51 = vld [vmem:[%s14033_s3 + $0x24c] ss:$16 sps:$4 sm:$0xff]  }
 0x28b   :  { %5677 = vmatpush1.bf16.msra.mxu1 %v9850_v13  ;;  %5163 = vmatprep.subr.bf16.mxu0 %v9851_v5  ;;  %v9885_v13 = vld [vmem:[%s14033_s3 + $0x240] ss:$16 sps:$4 sm:$0xff]   ;;  %v9886_v5 = vld [vmem:[%s14033_s3 + $0x248] ss:$16 sps:$4 sm:$0xff]  }
 0x28c   :  { %4454 = vmatmul.mubr.bf16.gmra.mrb[132].mxu0 %v14151_v10  ;;  %5678 = vmatprep.subr.bf16.mxu1 %v9852_v39  ;;  %v9887_v39 = vld [vmem:[%s14033_s3 + $0x264] ss:$16 sps:$4 sm:$0xff]  }
 0x28d   :  { %4969 = vmatmul.mubr.bf16.gmra.mrb[132].mxu1 %v14151_v10  ;;  %4463 = vmatprep.mubr.bf16.mxu0 %v14152_v25 }
 0x28e   :  { %5164 = vmatpush1.bf16.msra.mxu0 %v9853_v29  ;;  %4978 = vmatprep.mubr.bf16.mxu1 %v14152_v25  ;;  %v9888_v29 = vld [vmem:[%s14033_s3 + $0x26c] ss:$16 sps:$4 sm:$0xff]  }
 0x28f   :  { %5679 = vmatpush1.bf16.msra.mxu1 %v9854_v46  ;;  %5165 = vmatprep.subr.bf16.mxu0 %v9855_v42  ;;  %v9889_v46 = vld [vmem:[%s14033_s3 + $0x260] ss:$16 sps:$4 sm:$0xff]   ;;  %v9890_v42 = vld [vmem:[%s14033_s3 + $0x268] ss:$16 sps:$4 sm:$0xff]  }
 0x290   :  { %5680 = vmatprep.subr.bf16.mxu1 %v9856_v47  ;;  %v9891_v47 = vld [vmem:[%s14033_s3 + $0x284] ss:$16 sps:$4 sm:$0xff]  }
 0x292   :  { %5166 = vmatpush1.bf16.msra.mxu0 %v9857_v1  ;;  %v9892_v1 = vld [vmem:[%s14033_s3 + $0x28c] ss:$16 sps:$4 sm:$0xff]  }
 0x293   :  { %5681 = vmatpush1.bf16.msra.mxu1 %v9858_v35  ;;  %5167 = vmatprep.subr.bf16.mxu0 %v9859_v28  ;;  %v9893_v35 = vld [vmem:[%s14033_s3 + $0x280] ss:$16 sps:$4 sm:$0xff]   ;;  %v9894_v28 = vld [vmem:[%s14033_s3 + $0x288] ss:$16 sps:$4 sm:$0xff]  }
 0x294   :  { %4464 = vmatmul.mubr.bf16.gmra.mrb[136].mxu0 %v14152_v25  ;;  %5682 = vmatprep.subr.bf16.mxu1 %v9860_v16  ;;  %v9895_v16 = vld [vmem:[%s14033_s3 + $0x2a4] ss:$16 sps:$4 sm:$0xff]  }
 0x295   :  { %4979 = vmatmul.mubr.bf16.gmra.mrb[136].mxu1 %v14152_v25  ;;  %5175 = vmatprep.mubr.bf16.mxu0 %v14152_v25 }
 0x296   :  { %5168 = vmatpush1.bf16.msra.mxu0 %v9861_v26  ;;  %5690 = vmatprep.mubr.bf16.mxu1 %v14152_v25  ;;  %v9896_v26 = vld [vmem:[%s14033_s3 + $0x2ac] ss:$16 sps:$4 sm:$0xff]  }
 0x297   :  { %5683 = vmatpush1.bf16.msra.mxu1 %v9862_v11  ;;  %5169 = vmatprep.subr.bf16.mxu0 %v9863_v41  ;;  %v9897_v11 = vld [vmem:[%s14033_s3 + $0x2a0] ss:$16 sps:$4 sm:$0xff]   ;;  %v9898_v41 = vld [vmem:[%s14033_s3 + $0x2a8] ss:$16 sps:$4 sm:$0xff]  }
 0x298   :  { %5684 = vmatprep.subr.bf16.mxu1 %v9864_v2  ;;  %v9899_v2 = vld [vmem:[%s14033_s3 + $0x2c4] ss:$16 sps:$4 sm:$0xff]  }
 0x29a   :  { %5170 = vmatpush1.bf16.msra.mxu0 %v9865_v24  ;;  %v9900_v24 = vld [vmem:[%s14033_s3 + $0x2cc] ss:$16 sps:$4 sm:$0xff]  }
 0x29b   :  { %5685 = vmatpush1.bf16.msra.mxu1 %v9866_v38  ;;  %5171 = vmatprep.subr.bf16.mxu0 %v9867_v48  ;;  %v9901_v38 = vld [vmem:[%s14033_s3 + $0x2c0] ss:$16 sps:$4 sm:$0xff]   ;;  %v9902_v48 = vld [vmem:[%s14033_s3 + $0x2c8] ss:$16 sps:$4 sm:$0xff]  }
 0x29c   :  { %5686 = vmatprep.subr.bf16.mxu1 %v9868_v44  ;;  %v9903_v44 = vld [vmem:[%s14033_s3 + $0x2e4] ss:$16 sps:$4 sm:$0xff]  }
 0x29e   :  { %5172 = vmatpush1.bf16.msra.mxu0 %v9869_v63  ;;  %v9904_v63 = vld [vmem:[%s14033_s3 + $0x2ec] ss:$16 sps:$4 sm:$0xff]  }
 0x29f   :  { %5687 = vmatpush1.bf16.msra.mxu1 %v9870_v22  ;;  %5173 = vmatprep.subr.bf16.mxu0 %v9871_v8  ;;  %v9905_v22 = vld [vmem:[%s14033_s3 + $0x2e0] ss:$16 sps:$4 sm:$0xff]   ;;  %v9906_v8 = vld [vmem:[%s14033_s3 + $0x2e8] ss:$16 sps:$4 sm:$0xff]  }
 0x2a0   :  { %5688 = vmatprep.subr.bf16.mxu1 %v9872_v59  ;;  %v9907_v59 = vld [vmem:[%s14033_s3 + $0x304] ss:$16 sps:$4 sm:$0xff]  }
 0x2a2   :  { %5174 = vmatpush1.bf16.msra.mxu0 %v9873_v62  ;;  %v9908_v62 = vld [vmem:[%s14033_s3 + $0x30c] ss:$16 sps:$4 sm:$0xff]  }
 0x2a3   :  { %5689 = vmatpush1.bf16.msra.mxu1 %v9874_v50  ;;  %5246 = vmatprep.subr.bf16.mxu0 %v9875_v58  ;;  %v9909_v50 = vld [vmem:[%s14033_s3 + $0x300] ss:$16 sps:$4 sm:$0xff]   ;;  %v9910_v58 = vld [vmem:[%s14033_s3 + $0x308] ss:$16 sps:$4 sm:$0xff]  }
 0x2a4   :  { %5761 = vmatprep.subr.bf16.mxu1 %v9876_v37  ;;  %v9911_v37 = vld [vmem:[%s14033_s3 + $0x324] ss:$16 sps:$4 sm:$0xff]  }
 0x2a5   :  { %5176 = vmatmul.mubr.bf16.vlgmr.msra.gmra.mrb[140].mxu0 %v14152_v25 }
 0x2a6   :  { %5691 = vmatmul.mubr.bf16.vlgmr.msra.gmra.mrb[140].mxu1 %v14152_v25  ;;  %5185 = vmatprep.mubr.bf16.mxu0 %v11738_v17 }
 0x2a7   :  { %5247 = vmatpush1.bf16.msra.mxu0 %v9877_v33  ;;  %5700 = vmatprep.mubr.bf16.mxu1 %v11738_v17  ;;  %v9912_v33 = vld [vmem:[%s14033_s3 + $0x32c] ss:$16 sps:$4 sm:$0xff]  }
 0x2a8   :  { %5762 = vmatpush1.bf16.msra.mxu1 %v9878_v34  ;;  %5248 = vmatprep.subr.bf16.mxu0 %v9879_v6  ;;  %v9913_v34 = vld [vmem:[%s14033_s3 + $0x320] ss:$16 sps:$4 sm:$0xff]   ;;  %v9914_v6 = vld [vmem:[%s14033_s3 + $0x328] ss:$16 sps:$4 sm:$0xff]  }
 0x2a9   :  { %5763 = vmatprep.subr.bf16.mxu1 %v9880_v23  ;;  %v9915_v23 = vld [vmem:[%s14033_s3 + $0x344] ss:$16 sps:$4 sm:$0xff]  }
 0x2ab   :  { %5249 = vmatpush1.bf16.msra.mxu0 %v9881_v20  ;;  %v9916_v20 = vld [vmem:[%s14033_s3 + $0x34c] ss:$16 sps:$4 sm:$0xff]  }
 0x2ac   :  { %5764 = vmatpush1.bf16.msra.mxu1 %v9882_v54  ;;  %5250 = vmatprep.subr.bf16.mxu0 %v9883_v55  ;;  %v9917_v54 = vld [vmem:[%s14033_s3 + $0x340] ss:$16 sps:$4 sm:$0xff]   ;;  %v9918_v55 = vld [vmem:[%s14033_s3 + $0x348] ss:$16 sps:$4 sm:$0xff]  }
 0x2ad   :  { %5186 = vmatmul.mubr.bf16.gmra.mrb[144].mxu0 %v11734_v56  ;;  %5765 = vmatprep.subr.bf16.mxu1 %v9884_v51  ;;  %v9919_v51 = vld [vmem:[%s14033_s3 + $0x364] ss:$16 sps:$4 sm:$0xff]  }
 0x2ae   :  { %5701 = vmatmul.mubr.bf16.gmra.mrb[144].mxu1 %v11734_v56  ;;  %5195 = vmatprep.mubr.bf16.mxu0 %v11761_v18 }
 0x2af   :  { %5251 = vmatpush1.bf16.msra.mxu0 %v9885_v13  ;;  %5710 = vmatprep.mubr.bf16.mxu1 %v11761_v18  ;;  %v9920_v13 = vld [vmem:[%s14033_s3 + $0x36c] ss:$16 sps:$4 sm:$0xff]  }
 0x2b0   :  { %5766 = vmatpush1.bf16.msra.mxu1 %v9886_v5  ;;  %5252 = vmatprep.subr.bf16.mxu0 %v9887_v39  ;;  %v9921_v5 = vld [vmem:[%s14033_s3 + $0x360] ss:$16 sps:$4 sm:$0xff]   ;;  %v9922_v39 = vld [vmem:[%s14033_s3 + $0x368] ss:$16 sps:$4 sm:$0xff]  }
 0x2b1   :  { %5767 = vmatprep.subr.bf16.mxu1 %v9888_v29  ;;  %v9923_v29 = vld [vmem:[%s14033_s3 + $0x384] ss:$16 sps:$4 sm:$0xff]  }
 0x2b3   :  { %5253 = vmatpush1.bf16.msra.mxu0 %v9889_v46  ;;  %v9924_v46 = vld [vmem:[%s14033_s3 + $0x38c] ss:$16 sps:$4 sm:$0xff]  }
 0x2b4   :  { %5768 = vmatpush1.bf16.msra.mxu1 %v9890_v42  ;;  %5254 = vmatprep.subr.bf16.mxu0 %v9891_v47  ;;  %v9925_v42 = vld [vmem:[%s14033_s3 + $0x380] ss:$16 sps:$4 sm:$0xff]   ;;  %v9926_v47 = vld [vmem:[%s14033_s3 + $0x388] ss:$16 sps:$4 sm:$0xff]  }
 0x2b5   :  { %5196 = vmatmul.mubr.bf16.gmra.mrb[148].mxu0 %v11757_v7  ;;  %5769 = vmatprep.subr.bf16.mxu1 %v9892_v1  ;;  %v9927_v1 = vld [vmem:[%s14033_s3 + $0x3a4] ss:$16 sps:$4 sm:$0xff]  }
 0x2b6   :  { %5711 = vmatmul.mubr.bf16.gmra.mrb[148].mxu1 %v11757_v7  ;;  %5205 = vmatprep.mubr.bf16.mxu0 %v11781_v57 }
 0x2b7   :  { %5255 = vmatpush1.bf16.msra.mxu0 %v9893_v35  ;;  %5720 = vmatprep.mubr.bf16.mxu1 %v11781_v57  ;;  %v9928_v35 = vld [vmem:[%s14033_s3 + $0x3ac] ss:$16 sps:$4 sm:$0xff]  }
 0x2b8   :  { %5770 = vmatpush1.bf16.msra.mxu1 %v9894_v28  ;;  %5256 = vmatprep.subr.bf16.mxu0 %v9895_v16  ;;  %v9929_v28 = vld [vmem:[%s14033_s3 + $0x3a0] ss:$16 sps:$4 sm:$0xff]   ;;  %v9931_v16 = vld [vmem:[%s14033_s3 + $0x3c4] ss:$16 sps:$4 sm:$0xff]  }
 0x2b9   :  { %5771 = vmatprep.subr.bf16.mxu1 %v9896_v26  ;;  %v9932_v26 = vld [vmem:[%s14033_s3 + $0x3cc] ss:$16 sps:$4 sm:$0xff]  }
 0x2bb   :  { %5257 = vmatpush1.bf16.msra.mxu0 %v9897_v11  ;;  %v9933_v11 = vld [vmem:[%s14033_s3 + $0x3c0] ss:$16 sps:$4 sm:$0xff]  }
 0x2bc   :  { %5772 = vmatpush1.bf16.msra.mxu1 %v9898_v41  ;;  %5258 = vmatprep.subr.bf16.mxu0 %v9899_v2  ;;  %v9934_v41 = vld [vmem:[%s14033_s3 + $0x3c8] ss:$16 sps:$4 sm:$0xff]   ;;  %v9935_v2 = vld [vmem:[%s14033_s3 + $0x3e4] ss:$16 sps:$4 sm:$0xff]  }
 0x2bd   :  { %5206 = vmatmul.mubr.bf16.gmra.mrb[152].mxu0 %v11777_v60  ;;  %5773 = vmatprep.subr.bf16.mxu1 %v9900_v24  ;;  %v9936_v24 = vld [vmem:[%s14033_s3 + $0x3ec] ss:$16 sps:$4 sm:$0xff]  }
 0x2be   :  { %5721 = vmatmul.mubr.bf16.gmra.mrb[152].mxu1 %v11777_v60  ;;  %5215 = vmatprep.mubr.bf16.mxu0 %v11801_v19 }
 0x2bf   :  { %5259 = vmatpush1.bf16.msra.mxu0 %v9901_v38  ;;  %5730 = vmatprep.mubr.bf16.mxu1 %v11801_v19  ;;  %v9937_v38 = vld [vmem:[%s14033_s3 + $0x3e0] ss:$16 sps:$4 sm:$0xff]  }
 0x2c0   :  { %5774 = vmatpush1.bf16.msra.mxu1 %v9902_v48  ;;  %5260 = vmatprep.subr.bf16.mxu0 %v9903_v44  ;;  %v9938_v48 = vld [vmem:[%s14033_s3 + $0x3e8] ss:$16 sps:$4 sm:$0xff]   ;;  %v9939_v44 = vld [vmem:[%s14033_s3 + $0x404] ss:$16 sps:$4 sm:$0xff]  }
 0x2c1   :  { %5775 = vmatprep.subr.bf16.mxu1 %v9904_v63  ;;  %v9940_v63 = vld [vmem:[%s14033_s3 + $0x40c] ss:$16 sps:$4 sm:$0xff]  }
 0x2c3   :  { %5261 = vmatpush1.bf16.msra.mxu0 %v9905_v22  ;;  %v9941_v22 = vld [vmem:[%s14033_s3 + $0x400] ss:$16 sps:$4 sm:$0xff]  }
 0x2c4   :  { %5776 = vmatpush1.bf16.msra.mxu1 %v9906_v8  ;;  %5262 = vmatprep.subr.bf16.mxu0 %v9907_v59  ;;  %v9942_v8 = vld [vmem:[%s14033_s3 + $0x408] ss:$16 sps:$4 sm:$0xff]   ;;  %v9943_v59 = vld [vmem:[%s14033_s3 + $0x424] ss:$16 sps:$4 sm:$0xff]  }
 0x2c5   :  { %5216 = vmatmul.mubr.bf16.gmra.mrb[156].mxu0 %v11797_v0  ;;  %5777 = vmatprep.subr.bf16.mxu1 %v9908_v62  ;;  %v9945_v62 = vld [vmem:[%s14033_s3 + $0x420] ss:$16 sps:$4 sm:$0xff]  }
 0x2c6   :  { %5731 = vmatmul.mubr.bf16.gmra.mrb[156].mxu1 %v11797_v0  ;;  %5225 = vmatprep.mubr.bf16.mxu0 %v11821_v3 }
 0x2c7   :  { %5263 = vmatpush1.bf16.msra.mxu0 %v9909_v50  ;;  %5740 = vmatprep.mubr.bf16.mxu1 %v11821_v3  ;;  %v9946_v50 = vld [vmem:[%s14033_s3 + $0x428] ss:$16 sps:$4 sm:$0xff]  }
 0x2c8   :  { %5778 = vmatpush1.bf16.msra.mxu1 %v9910_v58  ;;  %5264 = vmatprep.subr.bf16.mxu0 %v9911_v37  ;;  %v9947_v58 = vld [vmem:[%s14033_s3 + $0x444] ss:$16 sps:$4 sm:$0xff]   ;;  %v9948_v37 = vld [vmem:[%s14033_s3 + $0x44c] ss:$16 sps:$4 sm:$0xff]  }
 0x2c9   :  { %5779 = vmatprep.subr.bf16.mxu1 %v9912_v33  ;;  %v9949_v33 = vld [vmem:[%s14033_s3 + $0x440] ss:$16 sps:$4 sm:$0xff]  }
 0x2cb   :  { %5265 = vmatpush1.bf16.msra.mxu0 %v9913_v34  ;;  %v9950_v34 = vld [vmem:[%s14033_s3 + $0x448] ss:$16 sps:$4 sm:$0xff]  }
 0x2cc   :  { %5780 = vmatpush1.bf16.msra.mxu1 %v9914_v6  ;;  %5266 = vmatprep.subr.bf16.mxu0 %v9915_v23  ;;  %v9951_v6 = vld [vmem:[%s14033_s3 + $0x464] ss:$16 sps:$4 sm:$0xff]   ;;  %v9952_v23 = vld [vmem:[%s14033_s3 + $0x46c] ss:$16 sps:$4 sm:$0xff]  }
 0x2cd   :  { %5226 = vmatmul.mubr.bf16.gmra.mrb[160].mxu0 %v11817_v52  ;;  %5781 = vmatprep.subr.bf16.mxu1 %v9916_v20  ;;  %v9953_v20 = vld [vmem:[%s14033_s3 + $0x460] ss:$16 sps:$4 sm:$0xff]  }
 0x2ce   :  { %5741 = vmatmul.mubr.bf16.gmra.mrb[160].mxu1 %v11817_v52  ;;  %5235 = vmatprep.mubr.bf16.mxu0 %v11841_v53 }
 0x2cf   :  { %5267 = vmatpush1.bf16.msra.mxu0 %v9917_v54  ;;  %5750 = vmatprep.mubr.bf16.mxu1 %v11841_v53  ;;  %v9954_v54 = vld [vmem:[%s14033_s3 + $0x468] ss:$16 sps:$4 sm:$0xff]  }
 0x2d0   :  { %5782 = vmatpush1.bf16.msra.mxu1 %v9918_v55  ;;  %5268 = vmatprep.subr.bf16.mxu0 %v9919_v51  ;;  %v9955_v55 = vld [vmem:[%s14033_s3 + $0x484] ss:$16 sps:$4 sm:$0xff]   ;;  %v9956_v51 = vld [vmem:[%s14033_s3 + $0x48c] ss:$16 sps:$4 sm:$0xff]  }
 0x2d1   :  { %5783 = vmatprep.subr.bf16.mxu1 %v9920_v13  ;;  %v9957_v13 = vld [vmem:[%s14033_s3 + $0x480] ss:$16 sps:$4 sm:$0xff]  }
 0x2d3   :  { %5269 = vmatpush1.bf16.msra.mxu0 %v9921_v5  ;;  %v9958_v5 = vld [vmem:[%s14033_s3 + $0x488] ss:$16 sps:$4 sm:$0xff]  }
 0x2d4   :  { %5784 = vmatpush1.bf16.msra.mxu1 %v9922_v39  ;;  %5270 = vmatprep.subr.bf16.mxu0 %v9923_v29  ;;  %v9959_v39 = vld [vmem:[%s14033_s3 + $0x4a4] ss:$16 sps:$4 sm:$0xff]   ;;  %v9960_v29 = vld [vmem:[%s14033_s3 + $0x4ac] ss:$16 sps:$4 sm:$0xff]  }
 0x2d5   :  { %5236 = vmatmul.mubr.bf16.gmra.mrb[164].mxu0 %v11837_v12  ;;  %5785 = vmatprep.subr.bf16.mxu1 %v9924_v46  ;;  %v9961_v46 = vld [vmem:[%s14033_s3 + $0x4a0] ss:$16 sps:$4 sm:$0xff]  }
 0x2d6   :  { %5751 = vmatmul.mubr.bf16.gmra.mrb[164].mxu1 %v11837_v12  ;;  %5278 = vmatprep.mubr.bf16.mxu0 %v14138_v31 }
 0x2d7   :  { %5271 = vmatpush1.bf16.msra.mxu0 %v9925_v42  ;;  %5793 = vmatprep.mubr.bf16.mxu1 %v14138_v31  ;;  %v9930_v31 = vld [vmem:[%s14033_s3 + $0x3a8] ss:$16 sps:$4 sm:$0xff]  }
 0x2d8   :  { %5786 = vmatpush1.bf16.msra.mxu1 %v9926_v47  ;;  %5272 = vmatprep.subr.bf16.mxu0 %v9927_v1  ;;  %v9962_v42 = vld [vmem:[%s14033_s3 + $0x4a8] ss:$16 sps:$4 sm:$0xff]   ;;  %v9963_v47 = vld [vmem:[%s14033_s3 + $0x4c4] ss:$16 sps:$4 sm:$0xff]   ;;  %v9964_v1 = vld [vmem:[%s14033_s3 + $0x4cc] ss:$16 sps:$4 sm:$0xff]  }
 0x2d9   :  { %5787 = vmatprep.subr.bf16.mxu1 %v9928_v35  ;;  %v9965_v35 = vld [vmem:[%s14033_s3 + $0x4c0] ss:$16 sps:$4 sm:$0xff]  }
 0x2db   :  { %5273 = vmatpush1.bf16.msra.mxu0 %v9929_v28  ;;  %v9966_v28 = vld [vmem:[%s14033_s3 + $0x4c8] ss:$16 sps:$4 sm:$0xff]  }
 0x2dc   :  { %5788 = vmatpush1.bf16.msra.mxu1 %v9930_v31  ;;  %5274 = vmatprep.subr.bf16.mxu0 %v9931_v16  ;;  %v9967_v31 = vld [vmem:[%s14033_s3 + $0x4e4] ss:$16 sps:$4 sm:$0xff]   ;;  %v9968_v16 = vld [vmem:[%s14033_s3 + $0x4ec] ss:$16 sps:$4 sm:$0xff]  }
 0x2dd   :  { %5789 = vmatprep.subr.bf16.mxu1 %v9932_v26  ;;  %v9969_v26 = vld [vmem:[%s14033_s3 + $0x4e0] ss:$16 sps:$4 sm:$0xff]  }
 0x2df   :  { %5275 = vmatpush1.bf16.msra.mxu0 %v9933_v11  ;;  %v9970_v11 = vld [vmem:[%s14033_s3 + $0x4e8] ss:$16 sps:$4 sm:$0xff]  }
 0x2e0   :  { %5790 = vmatpush1.bf16.msra.mxu1 %v9934_v41  ;;  %5276 = vmatprep.subr.bf16.mxu0 %v9935_v2  ;;  %v9971_v41 = vld [vmem:[%s14033_s3 + $0x504] ss:$16 sps:$4 sm:$0xff]   ;;  %v9972_v2 = vld [vmem:[%s14033_s3 + $0x50c] ss:$16 sps:$4 sm:$0xff]  }
 0x2e1   :  { %5791 = vmatprep.subr.bf16.mxu1 %v9936_v24  ;;  %v9973_v24 = vld [vmem:[%s14033_s3 + $0x500] ss:$16 sps:$4 sm:$0xff]  }
 0x2e3   :  { %5277 = vmatpush1.bf16.msra.mxu0 %v9937_v38  ;;  %v9974_v38 = vld [vmem:[%s14033_s3 + $0x508] ss:$16 sps:$4 sm:$0xff]  }
 0x2e4   :  { %5792 = vmatpush1.bf16.msra.mxu1 %v9938_v48  ;;  %5349 = vmatprep.subr.bf16.mxu0 %v9939_v44  ;;  %v9975_v48 = vld [vmem:[%s14033_s3 + $0x524] ss:$16 sps:$4 sm:$0xff]   ;;  %v9976_v44 = vld [vmem:[%s14033_s3 + $0x52c] ss:$16 sps:$4 sm:$0xff]  }
 0x2e5   :  { %5864 = vmatprep.subr.bf16.mxu1 %v9940_v63  ;;  %v9977_v63 = vld [vmem:[%s14033_s3 + $0x520] ss:$16 sps:$4 sm:$0xff]  }
 0x2e6   :  { %5279 = vmatmul.mubr.bf16.vlgmr.msra.gmra.mrb[140].mxu0 %v14139_v43 }
 0x2e7   :  { %5794 = vmatmul.mubr.bf16.vlgmr.msra.gmra.mrb[140].mxu1 %v14139_v43  ;;  %5288 = vmatprep.mubr.bf16.mxu0 %v14140_v15  ;;  %v9944_v43 = vld [vmem:[%s14033_s3 + $0x42c] ss:$16 sps:$4 sm:$0xff]  }
 0x2e8   :  { %5350 = vmatpush1.bf16.msra.mxu0 %v9941_v22  ;;  %5803 = vmatprep.mubr.bf16.mxu1 %v14140_v15  ;;  %v9978_v22 = vld [vmem:[%s14033_s3 + $0x528] ss:$16 sps:$4 sm:$0xff]  }
 0x2e9   :  { %5865 = vmatpush1.bf16.msra.mxu1 %v9942_v8  ;;  %5351 = vmatprep.subr.bf16.mxu0 %v9943_v59  ;;  %v9979_v8 = vld [vmem:[%s14033_s3 + $0x544] ss:$16 sps:$4 sm:$0xff]   ;;  %v9980_v59 = vld [vmem:[%s14033_s3 + $0x54c] ss:$16 sps:$4 sm:$0xff]  }
 0x2ea   :  { %5866 = vmatprep.subr.bf16.mxu1 %v9944_v43  ;;  %v9981_v43 = vld [vmem:[%s14033_s3 + $0x540] ss:$16 sps:$4 sm:$0xff]  }
 0x2ec   :  { %5352 = vmatpush1.bf16.msra.mxu0 %v9945_v62  ;;  %v9982_v62 = vld [vmem:[%s14033_s3 + $0x548] ss:$16 sps:$4 sm:$0xff]  }
 0x2ed   :  { %5867 = vmatpush1.bf16.msra.mxu1 %v9946_v50  ;;  %5353 = vmatprep.subr.bf16.mxu0 %v9947_v58  ;;  %v9983_v50 = vld [vmem:[%s14033_s3 + $0x564] ss:$16 sps:$4 sm:$0xff]   ;;  %v9984_v58 = vld [vmem:[%s14033_s3 + $0x56c] ss:$16 sps:$4 sm:$0xff]  }
 0x2ee   :  { %5289 = vmatmul.mubr.bf16.gmra.mrb[144].mxu0 %v14141_v21  ;;  %5868 = vmatprep.subr.bf16.mxu1 %v9948_v37  ;;  %v9985_v37 = vld [vmem:[%s14033_s3 + $0x560] ss:$16 sps:$4 sm:$0xff]  }
 0x2ef   :  { %5804 = vmatmul.mubr.bf16.gmra.mrb[144].mxu1 %v14141_v21  ;;  %5298 = vmatprep.mubr.bf16.mxu0 %v14142_v45 }
 0x2f0   :  { %5354 = vmatpush1.bf16.msra.mxu0 %v9949_v33  ;;  %5813 = vmatprep.mubr.bf16.mxu1 %v14142_v45  ;;  %v9986_v33 = vld [vmem:[%s14033_s3 + $0x568] ss:$16 sps:$4 sm:$0xff]  }
 0x2f1   :  { %5869 = vmatpush1.bf16.msra.mxu1 %v9950_v34  ;;  %5355 = vmatprep.subr.bf16.mxu0 %v9951_v6  ;;  %v9987_v34 = vld [vmem:[%s14033_s3 + $0x584] ss:$16 sps:$4 sm:$0xff]   ;;  %v9988_v6 = vld [vmem:[%s14033_s3 + $0x58c] ss:$16 sps:$4 sm:$0xff]  }
 0x2f2   :  { %5870 = vmatprep.subr.bf16.mxu1 %v9952_v23  ;;  %v9989_v23 = vld [vmem:[%s14033_s3 + $0x580] ss:$16 sps:$4 sm:$0xff]  }
 0x2f4   :  { %5356 = vmatpush1.bf16.msra.mxu0 %v9953_v20  ;;  %v9990_v20 = vld [vmem:[%s14033_s3 + $0x588] ss:$16 sps:$4 sm:$0xff]  }
 0x2f5   :  { %5871 = vmatpush1.bf16.msra.mxu1 %v9954_v54  ;;  %5357 = vmatprep.subr.bf16.mxu0 %v9955_v55  ;;  %v9991_v54 = vld [vmem:[%s14033_s3 + $0x5a4] ss:$16 sps:$4 sm:$0xff]   ;;  %v9992_v55 = vld [vmem:[%s14033_s3 + $0x5ac] ss:$16 sps:$4 sm:$0xff]  }
 0x2f6   :  { %5299 = vmatmul.mubr.bf16.gmra.mrb[148].mxu0 %v14143_v36  ;;  %5872 = vmatprep.subr.bf16.mxu1 %v9956_v51  ;;  %v9993_v51 = vld [vmem:[%s14033_s3 + $0x5a0] ss:$16 sps:$4 sm:$0xff]  }
 0x2f7   :  { %5814 = vmatmul.mubr.bf16.gmra.mrb[148].mxu1 %v14143_v36  ;;  %5308 = vmatprep.mubr.bf16.mxu0 %v14144_v9 }
 0x2f8   :  { %5358 = vmatpush1.bf16.msra.mxu0 %v9957_v13  ;;  %5823 = vmatprep.mubr.bf16.mxu1 %v14144_v9  ;;  %v9995_v13 = vld [vmem:[%s14033_s3 + $0x5c4] ss:$16 sps:$4 sm:$0xff]  }
 0x2f9   :  { %5873 = vmatpush1.bf16.msra.mxu1 %v9958_v5  ;;  %5359 = vmatprep.subr.bf16.mxu0 %v9959_v39  ;;  %v9996_v5 = vld [vmem:[%s14033_s3 + $0x5cc] ss:$16 sps:$4 sm:$0xff]   ;;  %v9997_v39 = vld [vmem:[%s14033_s3 + $0x5c0] ss:$16 sps:$4 sm:$0xff]  }
 0x2fa   :  { %5874 = vmatprep.subr.bf16.mxu1 %v9960_v29  ;;  %v9998_v29 = vld [vmem:[%s14033_s3 + $0x5c8] ss:$16 sps:$4 sm:$0xff]  }
 0x2fc   :  { %5360 = vmatpush1.bf16.msra.mxu0 %v9961_v46  ;;  %v9999_v46 = vld [vmem:[%s14033_s3 + $0x5e4] ss:$16 sps:$4 sm:$0xff]  }
 0x2fd   :  { %5875 = vmatpush1.bf16.msra.mxu1 %v9962_v42  ;;  %5361 = vmatprep.subr.bf16.mxu0 %v9963_v47  ;;  %v10000_v42 = vld [vmem:[%s14033_s3 + $0x5ec] ss:$16 sps:$4 sm:$0xff]   ;;  %v10001_v47 = vld [vmem:[%s14033_s3 + $0x5e0] ss:$16 sps:$4 sm:$0xff]  }
 0x2fe   :  { %5309 = vmatmul.mubr.bf16.gmra.mrb[152].mxu0 %v14145_v32  ;;  %5876 = vmatprep.subr.bf16.mxu1 %v9964_v1  ;;  %v10002_v1 = vld [vmem:[%s14033_s3 + $0x5e8] ss:$16 sps:$4 sm:$0xff]  }
 0x2ff   :  { %5824 = vmatmul.mubr.bf16.gmra.mrb[152].mxu1 %v14145_v32  ;;  %5318 = vmatprep.mubr.bf16.mxu0 %v14146_v27 }
 0x300   :  { %5362 = vmatpush1.bf16.msra.mxu0 %v9965_v35  ;;  %5833 = vmatprep.mubr.bf16.mxu1 %v14146_v27  ;;  %v10003_v35 = vld [vmem:[%s14033_s3 + $0x604] ss:$16 sps:$4 sm:$0xff]  }
 0x301   :  { %5877 = vmatpush1.bf16.msra.mxu1 %v9966_v28  ;;  %5363 = vmatprep.subr.bf16.mxu0 %v9967_v31  ;;  %v10004_v28 = vld [vmem:[%s14033_s3 + $0x60c] ss:$16 sps:$4 sm:$0xff]   ;;  %v10005_v31 = vld [vmem:[%s14033_s3 + $0x600] ss:$16 sps:$4 sm:$0xff]  }
 0x302   :  { %5878 = vmatprep.subr.bf16.mxu1 %v9968_v16  ;;  %v10006_v16 = vld [vmem:[%s14033_s3 + $0x608] ss:$16 sps:$4 sm:$0xff]  }
 0x304   :  { %5364 = vmatpush1.bf16.msra.mxu0 %v9969_v26  ;;  %v10007_v26 = vld [vmem:[%s14033_s3 + $0x624] ss:$16 sps:$4 sm:$0xff]  }
 0x305   :  { %5879 = vmatpush1.bf16.msra.mxu1 %v9970_v11  ;;  %5365 = vmatprep.subr.bf16.mxu0 %v9971_v41  ;;  %v10009_v11 = vld [vmem:[%s14033_s3 + $0x620] ss:$16 sps:$4 sm:$0xff]   ;;  %v10010_v41 = vld [vmem:[%s14033_s3 + $0x628] ss:$16 sps:$4 sm:$0xff]  }
 0x306   :  { %5319 = vmatmul.mubr.bf16.gmra.mrb[156].mxu0 %v14147_v4  ;;  %5880 = vmatprep.subr.bf16.mxu1 %v9972_v2  ;;  %v10011_v2 = vld [vmem:[%s14033_s3 + $0x644] ss:$16 sps:$4 sm:$0xff]  }
 0x307   :  { %5834 = vmatmul.mubr.bf16.gmra.mrb[156].mxu1 %v14147_v4  ;;  %5328 = vmatprep.mubr.bf16.mxu0 %v14148_v61 }
 0x308   :  { %5366 = vmatpush1.bf16.msra.mxu0 %v9973_v24  ;;  %5843 = vmatprep.mubr.bf16.mxu1 %v14148_v61  ;;  %v10012_v24 = vld [vmem:[%s14033_s3 + $0x64c] ss:$16 sps:$4 sm:$0xff]  }
 0x309   :  { %5881 = vmatpush1.bf16.msra.mxu1 %v9974_v38  ;;  %5367 = vmatprep.subr.bf16.mxu0 %v9975_v48  ;;  %v10013_v38 = vld [vmem:[%s14033_s3 + $0x640] ss:$16 sps:$4 sm:$0xff]  }
 0x30a   :  { %5882 = vmatprep.subr.bf16.mxu1 %v9976_v44  ;;  %v68_v48 = vld [vmem:[%s14035_s4] sm:$0xf]  ;;  %v14153_v44 = vld [vmem:[#allocation13_spill] sm:$0xff] }
 0x30c   :  { %5368 = vmatpush1.bf16.msra.mxu0 %v9977_v63  ;;  %v2349_v63 = vsub.s32 2, %v14153_v44 }
 0x30d   :  { %5883 = vmatpush1.bf16.msra.mxu1 %v9978_v22  ;;  %5369 = vmatprep.subr.bf16.mxu0 %v9979_v8  ;;  %v10014_v22 = vld [vmem:[%s14033_s3 + $0x648] ss:$16 sps:$4 sm:$0xff]   ;;  %v10015_v8 = vld [vmem:[%s14033_s3 + $0x664] ss:$16 sps:$4 sm:$0xff]  }
 0x30e   :  { %5329 = vmatmul.mubr.bf16.gmra.mrb[160].mxu0 %v14149_v40  ;;  %5884 = vmatprep.subr.bf16.mxu1 %v9980_v59  ;;  %v2353_v59 = vsub.s32 3, %v14153_v44 }
 0x30f   :  { %5844 = vmatmul.mubr.bf16.gmra.mrb[160].mxu1 %v14149_v40  ;;  %5338 = vmatprep.mubr.bf16.mxu0 %v14150_v49 }
 0x310   :  { %5370 = vmatpush1.bf16.msra.mxu0 %v9981_v43  ;;  %5853 = vmatprep.mubr.bf16.mxu1 %v14150_v49  ;;  %v10016_v43 = vld [vmem:[%s14033_s3 + $0x66c] ss:$16 sps:$4 sm:$0xff]  }
 0x311   :  { %5885 = vmatpush1.bf16.msra.mxu1 %v9982_v62  ;;  %5371 = vmatprep.subr.bf16.mxu0 %v9983_v50  ;;  %v14154_v62 = vsub.s32 0, %v14153_v44 }
 0x312   :  { %5886 = vmatprep.subr.bf16.mxu1 %v9984_v58  ;;  %v10017_v58 = vld [vmem:[%s14033_s3 + $0x660] ss:$16 sps:$4 sm:$0xff]  }
 0x313   :  { %v13010_v50 = vrot.slane %v68_v48, %v14154_v62 }
 0x314   :  { %5372 = vmatpush1.bf16.msra.mxu0 %v9985_v37  ;;  %v13015_v37 = vrot.slane %v68_v48, %v2349_v63 }
 0x315   :  { %5887 = vmatpush1.bf16.msra.mxu1 %v9986_v33  ;;  %5373 = vmatprep.subr.bf16.mxu0 %v9987_v34  ;;  %v14155_v33 = vsub.s32 1, %v14153_v44 }
 0x316   :  { %5339 = vmatmul.mubr.bf16.gmra.mrb[164].mxu0 %v14151_v10  ;;  %5888 = vmatprep.subr.bf16.mxu1 %v9988_v6  ;;  %v10018_v6 = vld [vmem:[%s14033_s3 + $0x668] ss:$16 sps:$4 sm:$0xff]  }
 0x317   :  { %5854 = vmatmul.mubr.bf16.gmra.mrb[164].mxu1 %v14151_v10  ;;  %5381 = vmatprep.mubr.bf16.mxu0 %v11738_v17  ;;  %v13019_v34 = vrot.slane %v68_v48, %v14155_v33 }
 0x318   :  { %5374 = vmatpush1.bf16.msra.mxu0 %v9989_v23  ;;  %5896 = vmatprep.mubr.bf16.mxu1 %v11738_v17  ;;  %v9994_v17 = vld [vmem:[%s14033_s3 + $0x5a8] ss:$16 sps:$4 sm:$0xff]   ;;  %v10019_v23 = vld [vmem:[%s14033_s3 + $0x684] ss:$16 sps:$4 sm:$0xff]  }
 0x319   :  { %5889 = vmatpush1.bf16.msra.mxu1 %v9990_v20  ;;  %5375 = vmatprep.subr.bf16.mxu0 %v9991_v54  ;;  %v13027_v20 = vrot.slane %v68_v48, %v2353_v59  ;;  %v10020_v54 = vld [vmem:[%s14033_s3 + $0x68c] ss:$16 sps:$4 sm:$0xff]   ;;  %v10025_v59 = vld [vmem:[%s14033_s3 + $0x6a0] ss:$16 sps:$4 sm:$0xff]  }
 0x31a   :  { %5890 = vmatprep.subr.bf16.mxu1 %v9992_v55 }
 0x31c   :  { %5376 = vmatpush1.bf16.msra.mxu0 %v9993_v51 }
 0x31d   :  { %5891 = vmatpush1.bf16.msra.mxu1 %v9994_v17  ;;  %5377 = vmatprep.subr.bf16.mxu0 %v9995_v13 }
 0x31e   :  { %5892 = vmatprep.subr.bf16.mxu1 %v9996_v5  ;;  %v10021_v5 = vld [vmem:[%s14033_s3 + $0x680] ss:$16 sps:$4 sm:$0xff]  }
 0x320   :  { %5378 = vmatpush1.bf16.msra.mxu0 %v9997_v39 }
 0x321   :  { %5893 = vmatpush1.bf16.msra.mxu1 %v9998_v29  ;;  %5379 = vmatprep.subr.bf16.mxu0 %v9999_v46 }
 0x322   :  { %5894 = vmatprep.subr.bf16.mxu1 %v10000_v42 }
 0x324   :  { %5380 = vmatpush1.bf16.msra.mxu0 %v10001_v47  ;;  %v10022_v47 = vld [vmem:[%s14033_s3 + $0x688] ss:$16 sps:$4 sm:$0xff]  }
 0x325   :  { %5895 = vmatpush1.bf16.msra.mxu1 %v10002_v1  ;;  %5452 = vmatprep.subr.bf16.mxu0 %v10003_v35 }
 0x326   :  { %5967 = vmatprep.subr.bf16.mxu1 %v10004_v28  ;;  %v10023_v28 = vld [vmem:[%s14033_s3 + $0x6a4] ss:$16 sps:$4 sm:$0xff]  }
 0x327   :  { %5382 = vmatmul.mubr.bf16.vlgmr.msra.gmra.mrb[140].mxu0 %v11734_v56 }
 0x328   :  { %5897 = vmatmul.mubr.bf16.vlgmr.msra.gmra.mrb[140].mxu1 %v11734_v56  ;;  %5391 = vmatprep.mubr.bf16.mxu0 %v11761_v18  ;;  %v10008_v56 = vld [vmem:[%s14033_s3 + $0x62c] ss:$16 sps:$4 sm:$0xff]  }
 0x329   :  { %5453 = vmatpush1.bf16.msra.mxu0 %v10005_v31  ;;  %5906 = vmatprep.mubr.bf16.mxu1 %v11761_v18 }
 0x32a   :  { %5968 = vmatpush1.bf16.msra.mxu1 %v10006_v16  ;;  %5454 = vmatprep.subr.bf16.mxu0 %v10007_v26 }
 0x32b   :  { %5969 = vmatprep.subr.bf16.mxu1 %v10008_v56 }
 0x32d   :  { %5455 = vmatpush1.bf16.msra.mxu0 %v10009_v11 }
 0x32e   :  { %5970 = vmatpush1.bf16.msra.mxu1 %v10010_v41  ;;  %5456 = vmatprep.subr.bf16.mxu0 %v10011_v2  ;;  %v10024_v41 = vld [vmem:[%s14033_s3 + $0x6ac] ss:$16 sps:$4 sm:$0xff]  }
 0x32f   :  { %5392 = vmatmul.mubr.bf16.gmra.mrb[144].mxu0 %v11757_v7  ;;  %5971 = vmatprep.subr.bf16.mxu1 %v10012_v24 }
 0x330   :  { %5907 = vmatmul.mubr.bf16.gmra.mrb[144].mxu1 %v11757_v7  ;;  %5401 = vmatprep.mubr.bf16.mxu0 %v11781_v57 }
 0x331   :  { %5457 = vmatpush1.bf16.msra.mxu0 %v10013_v38  ;;  %5916 = vmatprep.mubr.bf16.mxu1 %v11781_v57 }
 0x332   :  { %5972 = vmatpush1.bf16.msra.mxu1 %v10014_v22  ;;  %5458 = vmatprep.subr.bf16.mxu0 %v10015_v8 }
 0x333   :  { %5973 = vmatprep.subr.bf16.mxu1 %v10016_v43 }
 0x335   :  { %5459 = vmatpush1.bf16.msra.mxu0 %v10017_v58  ;;  %v10026_v58 = vld [vmem:[%s14033_s3 + $0x6a8] ss:$16 sps:$4 sm:$0xff]  }
 0x336   :  { %5974 = vmatpush1.bf16.msra.mxu1 %v10018_v6  ;;  %5460 = vmatprep.subr.bf16.mxu0 %v10019_v23  ;;  %v10027_v6 = vld [vmem:[%s14033_s3 + $0x6c4] ss:$16 sps:$4 sm:$0xff]  }
 0x337   :  { %5402 = vmatmul.mubr.bf16.gmra.mrb[148].mxu0 %v11777_v60  ;;  %5975 = vmatprep.subr.bf16.mxu1 %v10020_v54  ;;  %v4405_v55 = vpop.f32.mrb[112].mxu0  ;;  %v10028_v54 = vld [vmem:[%s14033_s3 + $0x6cc] ss:$16 sps:$4 sm:$0xff]  }
 0x338   :  { %5917 = vmatmul.mubr.bf16.gmra.mrb[148].mxu1 %v11777_v60  ;;  %5411 = vmatprep.mubr.bf16.mxu0 %v11801_v19  ;;  %v8514_v51 = vadd.f32 %v4405_v55, %v13010_v50  ;;  %v4920_v17 = vpop.f32.mrb[112].mxu1  ;;  %v4407_v13 = vpop.f32.mrb[113].mxu0 }
 0x339   :  { %5461 = vmatpush1.bf16.msra.mxu0 %v10021_v5  ;;  %5926 = vmatprep.mubr.bf16.mxu1 %v11801_v19  ;;  %v8542_v39 = vadd.f32 %v4920_v17, %v13015_v37  ;;  %v8515_v29 = vadd.f32 %v4407_v13, %v13019_v34  ;;  %v4922_v46 = vpop.f32.mrb[113].mxu1  ;;  %v4409_v42 = vpop.f32.mrb[114].mxu0 }
 0x33a   :  { %5976 = vmatpush1.bf16.msra.mxu1 %v10022_v47  ;;  %v4989_v1 = vmax.f32 %v8514_v51, 0.0  ;;  %v8543_v35 = vadd.f32 %v4922_v46, %v13027_v20  ;;  %5462 = vmatprep.subr.bf16.mxu0 %v10023_v28  ;;  %v8516_v31 = vadd.f32 %v4409_v42, %v13010_v50  ;;  %v4924_v16 = vpop.f32.mrb[114].mxu1  ;;  %v4411_v26 = vpop.f32.mrb[115].mxu0 }
 0x33b   :  { %v4991_v56 = vmax.f32 %v8542_v39, 0.0  ;;  %v4990_v11 = vmax.f32 %v8515_v29, 0.0  ;;  %5977 = vmatprep.subr.bf16.mxu1 %v10024_v41  ;;  %v8544_v2 = vadd.f32 %v4924_v16, %v13015_v37  ;;  %v8517_v24 = vadd.f32 %v4411_v26, %v13019_v34  ;;  %v4926_v38 = vpop.f32.mrb[115].mxu1  ;;  %v10029_v39 = vld [vmem:[%s14033_s3 + $0x6c0] ss:$16 sps:$4 sm:$0xff]  }
 0x33c   :  { %v4992_v48 = vmax.f32 %v8543_v35, 0.0  ;;  %v4993_v44 = vmax.f32 %v8516_v31, 0.0  ;;  %v8545_v63 = vadd.f32 %v4926_v38, %v13027_v20  ;;  %v10031_v31 = vld [vmem:[%s14033_s3 + $0x6e4] ss:$16 sps:$4 sm:$0xff]  }
 0x33d   :  { %v13056_v22 = vadd.f32 %v4991_v56, %v4989_v1  ;;  %v4995_v8 = vmax.f32 %v8544_v2, 0.0  ;;  %5463 = vmatpush1.bf16.msra.mxu0 %v10025_v59  ;;  %v4994_v43 = vmax.f32 %v8517_v24, 0.0  ;;  %v10030_v1 = vld [vmem:[%s14033_s3 + $0x6c8] ss:$16 sps:$4 sm:$0xff]   ;;  %v10032_v2 = vld [vmem:[%s14033_s3 + $0x6ec] ss:$16 sps:$4 sm:$0xff]  }
 0x33e   :  { %v13061_v62 = vadd.f32 %v4992_v48, %v4990_v11  ;;  %5978 = vmatpush1.bf16.msra.mxu1 %v10026_v58  ;;  %v4996_v33 = vmax.f32 %v8545_v63, 0.0  ;;  %5464 = vmatprep.subr.bf16.mxu0 %v10027_v6  ;;  %v10033_v58 = vld [vmem:[%s14033_s3 + $0x6e0] ss:$16 sps:$4 sm:$0xff]  }
 0x33f   :  { %v13069_v23 = vadd.f32 %v4995_v8, %v4993_v44  ;;  %5412 = vmatmul.mubr.bf16.gmra.mrb[152].mxu0 %v11797_v0  ;;  %5979 = vmatprep.subr.bf16.mxu1 %v10028_v54  ;;  %v4415_v55 = vpop.f32.mrb[116].mxu0  ;;  %v10034_v54 = vld [vmem:[%s14033_s3 + $0x6e8] ss:$16 sps:$4 sm:$0xff]  }
 0x340   :  { %v13075_v51 = vadd.f32 %v4996_v33, %v4994_v43  ;;  %5927 = vmatmul.mubr.bf16.gmra.mrb[152].mxu1 %v11797_v0  ;;  %5421 = vmatprep.mubr.bf16.mxu0 %v11821_v3  ;;  %v8518_v17 = vadd.f32 %v4415_v55, %v13010_v50  ;;  %v4930_v13 = vpop.f32.mrb[116].mxu1  ;;  %v4417_v5 = vpop.f32.mrb[117].mxu0 }
 0x341   :  { %5465 = vmatpush1.bf16.msra.mxu0 %v10029_v39  ;;  %5936 = vmatprep.mubr.bf16.mxu1 %v11821_v3  ;;  %v8546_v29 = vadd.f32 %v4930_v13, %v13015_v37  ;;  %v8519_v46 = vadd.f32 %v4417_v5, %v13019_v34  ;;  %v4932_v42 = vpop.f32.mrb[117].mxu1  ;;  %v4419_v47 = vpop.f32.mrb[118].mxu0  ;;  %v10036_v5 = vld [vmem:[%s14033_s3 + $0x70c] ss:$16 sps:$4 sm:$0xff]  }
 0x342   :  { %5980 = vmatpush1.bf16.msra.mxu1 %v10030_v1  ;;  %v4997_v35 = vmax.f32 %v8518_v17, 0.0  ;;  %v8547_v28 = vadd.f32 %v4932_v42, %v13027_v20  ;;  %5466 = vmatprep.subr.bf16.mxu0 %v10031_v31  ;;  %v8520_v16 = vadd.f32 %v4419_v47, %v13010_v50  ;;  %v4934_v26 = vpop.f32.mrb[118].mxu1  ;;  %v4421_v56 = vpop.f32.mrb[119].mxu0  ;;  %v10035_v17 = vld [vmem:[%s14033_s3 + $0x704] ss:$16 sps:$4 sm:$0xff]  }
 0x343   :  { %v4999_v11 = vmax.f32 %v8546_v29, 0.0  ;;  %v4998_v41 = vmax.f32 %v8519_v46, 0.0  ;;  %5981 = vmatprep.subr.bf16.mxu1 %v10032_v2  ;;  %v8548_v24 = vadd.f32 %v4934_v26, %v13015_v37  ;;  %v8521_v38 = vadd.f32 %v4421_v56, %v13019_v34  ;;  %v4936_v48 = vpop.f32.mrb[119].mxu1  ;;  %v10037_v1 = vld [vmem:[%s14033_s3 + $0x700] ss:$16 sps:$4 sm:$0xff]  }
 0x344   :  { %v5000_v44 = vmax.f32 %v8547_v28, 0.0  ;;  %v5001_v63 = vmax.f32 %v8520_v16, 0.0  ;;  %v8549_v8 = vadd.f32 %v4936_v48, %v13027_v20  ;;  %v10038_v26 = vld [vmem:[%s14033_s3 + $0x708] ss:$16 sps:$4 sm:$0xff]  }
 0x345   :  { %v13100_v59 = vadd.f32 %v4999_v11, %v4997_v35  ;;  %v5003_v43 = vmax.f32 %v8548_v24, 0.0  ;;  %5467 = vmatpush1.bf16.msra.mxu0 %v10033_v58  ;;  %v5002_v33 = vmax.f32 %v8521_v38, 0.0 }
 0x346   :  { %v13105_v6 = vadd.f32 %v5000_v44, %v4998_v41  ;;  %5982 = vmatpush1.bf16.msra.mxu1 %v10034_v54  ;;  %v5004_v55 = vmax.f32 %v8549_v8, 0.0  ;;  %5468 = vmatprep.subr.bf16.mxu0 %v10035_v17  ;;  %v10039_v41 = vld [vmem:[%s14033_s3 + $0x724] ss:$16 sps:$4 sm:$0xff]  }
 0x347   :  { %v13113_v13 = vadd.f32 %v5003_v43, %v5001_v63  ;;  %5422 = vmatmul.mubr.bf16.gmra.mrb[156].mxu0 %v11817_v52  ;;  %5983 = vmatprep.subr.bf16.mxu1 %v10036_v5  ;;  %v4425_v39 = vpop.f32.mrb[120].mxu0  ;;  %v10040_v63 = vld [vmem:[%s14033_s3 + $0x72c] ss:$16 sps:$4 sm:$0xff]  }
 0x348   :  { %v13119_v29 = vadd.f32 %v5004_v55, %v5002_v33  ;;  %5937 = vmatmul.mubr.bf16.gmra.mrb[156].mxu1 %v11817_v52  ;;  %5431 = vmatprep.mubr.bf16.mxu0 %v11841_v53  ;;  %v8522_v46 = vadd.f32 %v4425_v39, %v13010_v50  ;;  %v4940_v42 = vpop.f32.mrb[120].mxu1  ;;  %v4427_v47 = vpop.f32.mrb[121].mxu0  ;;  %v10041_v39 = vld [vmem:[%s14033_s3 + $0x720] ss:$16 sps:$4 sm:$0xff]  }
 0x349   :  { %5469 = vmatpush1.bf16.msra.mxu0 %v10037_v1  ;;  %5946 = vmatprep.mubr.bf16.mxu1 %v11841_v53  ;;  %v8550_v35 = vadd.f32 %v4940_v42, %v13015_v37  ;;  %v8523_v28 = vadd.f32 %v4427_v47, %v13019_v34  ;;  %v4942_v31 = vpop.f32.mrb[121].mxu1  ;;  %v4429_v16 = vpop.f32.mrb[122].mxu0  ;;  %v10042_v47 = vld [vmem:[%s14033_s3 + $0x728] ss:$16 sps:$4 sm:$0xff]  }
 0x34a   :  { %5984 = vmatpush1.bf16.msra.mxu1 %v10038_v26  ;;  %v5005_v56 = vmax.f32 %v8522_v46, 0.0  ;;  %v8551_v11 = vadd.f32 %v4942_v31, %v13027_v20  ;;  %5470 = vmatprep.subr.bf16.mxu0 %v10039_v41  ;;  %v8524_v2 = vadd.f32 %v4429_v16, %v13010_v50  ;;  %v4944_v24 = vpop.f32.mrb[122].mxu1  ;;  %v4431_v38 = vpop.f32.mrb[123].mxu0  ;;  %v10044_v31 = vld [vmem:[%s14033_s3 + $0x74c] ss:$16 sps:$4 sm:$0xff]  }
 0x34b   :  { %v5007_v48 = vmax.f32 %v8550_v35, 0.0  ;;  %v5006_v44 = vmax.f32 %v8523_v28, 0.0  ;;  %5985 = vmatprep.subr.bf16.mxu1 %v10040_v63  ;;  %v8552_v8 = vadd.f32 %v4944_v24, %v13015_v37  ;;  %v8525_v43 = vadd.f32 %v4431_v38, %v13019_v34  ;;  %v4946_v58 = vpop.f32.mrb[123].mxu1  ;;  %v10043_v35 = vld [vmem:[%s14033_s3 + $0x744] ss:$16 sps:$4 sm:$0xff]  }
 0x34c   :  { %v5008_v33 = vmax.f32 %v8551_v11, 0.0  ;;  %v5009_v54 = vmax.f32 %v8524_v2, 0.0  ;;  %v8553_v55 = vadd.f32 %v4946_v58, %v13027_v20  ;;  %v10045_v2 = vld [vmem:[%s14033_s3 + $0x740] ss:$16 sps:$4 sm:$0xff]   ;;  %v10046_v63 = vld [vmem:[%s14033_s3 + $0x748] ss:$16 sps:$4 sm:$0xff]  }
 0x34d   :  { %v13144_v17 = vadd.f32 %v5007_v48, %v5005_v56  ;;  %v5011_v5 = vmax.f32 %v8552_v8, 0.0  ;;  %5471 = vmatpush1.bf16.msra.mxu0 %v10041_v39  ;;  %v5010_v46 = vmax.f32 %v8525_v43, 0.0  ;;  %v10047_v58 = vld [vmem:[%s14033_s3 + $0x764] ss:$16 sps:$4 sm:$0xff]  }
 0x34e   :  { %v13149_v42 = vadd.f32 %v5008_v33, %v5006_v44  ;;  %5986 = vmatpush1.bf16.msra.mxu1 %v10042_v47  ;;  %v5012_v1 = vmax.f32 %v8553_v55, 0.0  ;;  %5472 = vmatprep.subr.bf16.mxu0 %v10043_v35 }
 0x34f   :  { %v13157_v28 = vadd.f32 %v5011_v5, %v5009_v54  ;;  %5432 = vmatmul.mubr.bf16.gmra.mrb[160].mxu0 %v11837_v12  ;;  %5987 = vmatprep.subr.bf16.mxu1 %v10044_v31  ;;  %v4435_v16 = vpop.f32.mrb[124].mxu0 }
 0x350   :  { %v13163_v26 = vadd.f32 %v5012_v1, %v5010_v46  ;;  %5947 = vmatmul.mubr.bf16.gmra.mrb[160].mxu1 %v11837_v12  ;;  %5441 = vmatprep.mubr.bf16.mxu0 %v11857_v30  ;;  %v8526_v56 = vadd.f32 %v4435_v16, %v13010_v50  ;;  %v4950_v11 = vpop.f32.mrb[124].mxu1  ;;  %v4437_v41 = vpop.f32.mrb[125].mxu0  ;;  %v10048_v46 = vld [vmem:[%s14033_s3 + $0x76c] ss:$16 sps:$4 sm:$0xff]  }
 0x351   :  { %5473 = vmatpush1.bf16.msra.mxu0 %v10045_v2  ;;  %5956 = vmatprep.mubr.bf16.mxu1 %v11857_v30  ;;  %v8554_v24 = vadd.f32 %v4950_v11, %v13015_v37  ;;  %v8527_v38 = vadd.f32 %v4437_v41, %v13019_v34  ;;  %v4952_v48 = vpop.f32.mrb[125].mxu1  ;;  %v4439_v44 = vpop.f32.mrb[126].mxu0  ;;  %v10049_v2 = vld [vmem:[%s14033_s3 + $0x760] ss:$16 sps:$4 sm:$0xff]  }
 0x352   :  { %5988 = vmatpush1.bf16.msra.mxu1 %v10046_v63  ;;  %v5013_v8 = vmax.f32 %v8526_v56, 0.0  ;;  %v8555_v43 = vadd.f32 %v4952_v48, %v13027_v20  ;;  %5474 = vmatprep.subr.bf16.mxu0 %v10047_v58  ;;  %v8528_v33 = vadd.f32 %v4439_v44, %v13010_v50  ;;  %v4954_v54 = vpop.f32.mrb[126].mxu1  ;;  %v4441_v55 = vpop.f32.mrb[127].mxu0  ;;  %v10050_v48 = vld [vmem:[%s14033_s3 + $0x768] ss:$16 sps:$4 sm:$0xff]  }
 0x353   :  { %v5015_v5 = vmax.f32 %v8554_v24, 0.0  ;;  %v5014_v39 = vmax.f32 %v8527_v38, 0.0  ;;  %5989 = vmatprep.subr.bf16.mxu1 %v10048_v46  ;;  %v8556_v47 = vadd.f32 %v4954_v54, %v13015_v37  ;;  %v8529_v1 = vadd.f32 %v4441_v55, %v13019_v34  ;;  %v4956_v35 = vpop.f32.mrb[127].mxu1  ;;  %v10051_v63 = vld [vmem:[%s14033_s3 + $0x784] ss:$16 sps:$4 sm:$0xff]  }
 0x354   :  { %v5016_v31 = vmax.f32 %v8555_v43, 0.0  ;;  %v5017_v16 = vmax.f32 %v8528_v33, 0.0  ;;  %v8557_v56 = vadd.f32 %v4956_v35, %v13027_v20  ;;  %v10052_v43 = vld [vmem:[%s14033_s3 + $0x78c] ss:$16 sps:$4 sm:$0xff]  }
 0x355   :  { %v13188_v11 = vadd.f32 %v5015_v5, %v5013_v8  ;;  %v5019_v41 = vmax.f32 %v8556_v47, 0.0  ;;  %5475 = vmatpush1.bf16.msra.mxu0 %v10049_v2  ;;  %v5018_v24 = vmax.f32 %v8529_v1, 0.0 }
 0x356   :  { %v13193_v38 = vadd.f32 %v5016_v31, %v5014_v39  ;;  %5990 = vmatpush1.bf16.msra.mxu1 %v10050_v48  ;;  %v5020_v44 = vmax.f32 %v8557_v56, 0.0  ;;  %5476 = vmatprep.subr.bf16.mxu0 %v10051_v63  ;;  %v10053_v39 = vld [vmem:[%s14033_s3 + $0x780] ss:$16 sps:$4 sm:$0xff]   ;;  %v10054_v31 = vld [vmem:[%s14033_s3 + $0x788] ss:$16 sps:$4 sm:$0xff]  }
 0x357   :  { %v13201_v8 = vadd.f32 %v5019_v41, %v5017_v16  ;;  %5442 = vmatmul.mubr.bf16.gmra.mrb[164].mxu0 %v11855_v14  ;;  %5991 = vmatprep.subr.bf16.mxu1 %v10052_v43  ;;  %v4445_v58 = vpop.f32.mrb[128].mxu0  ;;  %v10055_v41 = vld [vmem:[%s14033_s3 + $0x7a4] ss:$16 sps:$4 sm:$0xff]   ;;  %v10056_v63 = vld [vmem:[%s14033_s3 + $0x7ac] ss:$16 sps:$4 sm:$0xff]  }
 0x358   :  { %v13207_v33 = vadd.f32 %v5020_v44, %v5018_v24  ;;  %5957 = vmatmul.mubr.bf16.gmra.mrb[164].mxu1 %v11855_v14  ;;  %5484 = vmatprep.mubr.bf16.mxu0 %v14140_v15  ;;  %v8530_v54 = vadd.f32 %v4445_v58, %v13010_v50  ;;  %v4960_v55 = vpop.f32.mrb[128].mxu1  ;;  %v4447_v5 = vpop.f32.mrb[129].mxu0 }
 0x359   :  { %5477 = vmatpush1.bf16.msra.mxu0 %v10053_v39  ;;  %5999 = vmatprep.mubr.bf16.mxu1 %v14140_v15  ;;  %v8558_v46 = vadd.f32 %v4960_v55, %v13015_v37  ;;  %v8531_v47 = vadd.f32 %v4447_v5, %v13019_v34  ;;  %v4962_v1 = vpop.f32.mrb[129].mxu1  ;;  %v4449_v35 = vpop.f32.mrb[130].mxu0 }
 0x35a   :  { %5992 = vmatpush1.bf16.msra.mxu1 %v10054_v31  ;;  %v5021_v16 = vmax.f32 %v8530_v54, 0.0  ;;  %v8559_v56 = vadd.f32 %v4962_v1, %v13027_v20  ;;  %5478 = vmatprep.subr.bf16.mxu0 %v10055_v41  ;;  %v8532_v15 = vadd.f32 %v4449_v35, %v13010_v50  ;;  %v4964_v2 = vpop.f32.mrb[130].mxu1  ;;  %v4451_v24 = vpop.f32.mrb[131].mxu0  ;;  %v10058_v41 = vld [vmem:[%s14033_s3 + $0x7a8] ss:$16 sps:$4 sm:$0xff]  }
 0x35b   :  { %v5023_v48 = vmax.f32 %v8558_v46, 0.0  ;;  %v5022_v44 = vmax.f32 %v8531_v47, 0.0  ;;  %5993 = vmatprep.subr.bf16.mxu1 %v10056_v63  ;;  %v8560_v43 = vadd.f32 %v4964_v2, %v13015_v37  ;;  %v8533_v58 = vadd.f32 %v4451_v24, %v13019_v34  ;;  %v4966_v54 = vpop.f32.mrb[131].mxu1  ;;  %v10057_v46 = vld [vmem:[%s14033_s3 + $0x7a0] ss:$16 sps:$4 sm:$0xff]  }
 0x35c   :  { %v5024_v55 = vmax.f32 %v8559_v56, 0.0  ;;  %v5025_v5 = vmax.f32 %v8532_v15, 0.0  ;;  %v8561_v39 = vadd.f32 %v4966_v54, %v13027_v20  ;;  %v10060_v2 = vld [vmem:[%s14033_s3 + $0x7cc] ss:$16 sps:$4 sm:$0xff]  }
 0x35d   :  { %v13232_v1 = vadd.f32 %v5023_v48, %v5021_v16  ;;  %v5027_v35 = vmax.f32 %v8560_v43, 0.0  ;;  %5479 = vmatpush1.bf16.msra.mxu0 %v10057_v46  ;;  %v5026_v47 = vmax.f32 %v8533_v58, 0.0  ;;  %v10059_v16 = vld [vmem:[%s14033_s3 + $0x7c4] ss:$16 sps:$4 sm:$0xff]   ;;  %v10061_v58 = vld [vmem:[%s14033_s3 + $0x7c0] ss:$16 sps:$4 sm:$0xff]  }
 0x35e   :  { %v13237_v31 = vadd.f32 %v5024_v55, %v5022_v44  ;;  %5994 = vmatpush1.bf16.msra.mxu1 %v10058_v41  ;;  %v5028_v56 = vmax.f32 %v8561_v39, 0.0  ;;  %5480 = vmatprep.subr.bf16.mxu0 %v10059_v16  ;;  %v10063_v41 = vld [vmem:[%s14033_s3 + $0x7e4] ss:$16 sps:$4 sm:$0xff]  }
 0x35f   :  { %v13245_v15 = vadd.f32 %v5027_v35, %v5025_v5  ;;  %5995 = vmatprep.subr.bf16.mxu1 %v10060_v2  ;;  %v4455_v24 = vpop.f32.mrb[132].mxu0  ;;  %v10062_v35 = vld [vmem:[%s14033_s3 + $0x7c8] ss:$16 sps:$4 sm:$0xff]  }
 0x360   :  { %14156 = vst [vmem:[#allocation10_spill] sm:$0xff] %v13237_v31  ;;  %v13250_v48 = vadd.f32 %v5028_v56, %v5026_v47  ;;  %v8534_v44 = vadd.f32 %v4455_v24, %v13010_v50  ;;  %v4970_v63 = vpop.f32.mrb[132].mxu1  ;;  %v4457_v43 = vpop.f32.mrb[133].mxu0 }
 0x361   :  { %14157 = vst [vmem:[#allocation11_spill] sm:$0xff] %v13245_v15  ;;  %5481 = vmatpush1.bf16.msra.mxu0 %v10061_v58  ;;  %v8562_v54 = vadd.f32 %v4970_v63, %v13015_v37  ;;  %v8535_v55 = vadd.f32 %v4457_v43, %v13019_v34  ;;  %v4972_v5 = vpop.f32.mrb[133].mxu1  ;;  %v4459_v39 = vpop.f32.mrb[134].mxu0  ;;  %v10064_v43 = vld [vmem:[%s14033_s3 + $0x7ec] ss:$16 sps:$4 sm:$0xff]  }
 0x362   :  { %14158 = vst [vmem:[#allocation12_spill] sm:$0xff] %v13250_v48  ;;  %5996 = vmatpush1.bf16.msra.mxu1 %v10062_v35  ;;  %v5029_v46 = vmax.f32 %v8534_v44, 0.0  ;;  %v8563_v47 = vadd.f32 %v4972_v5, %v13027_v20  ;;  %5482 = vmatprep.subr.bf16.mxu0 %v10063_v41  ;;  %v8536_v56 = vadd.f32 %v4459_v39, %v13010_v50  ;;  %v4974_v16 = vpop.f32.mrb[134].mxu1  ;;  %v4461_v2 = vpop.f32.mrb[135].mxu0 }
 0x363   :  { %v5031_v24 = vmax.f32 %v8562_v54, 0.0  ;;  %v5030_v63 = vmax.f32 %v8535_v55, 0.0  ;;  %5997 = vmatprep.subr.bf16.mxu1 %v10064_v43  ;;  %v8564_v44 = vadd.f32 %v4974_v16, %v13015_v37  ;;  %v8537_v58 = vadd.f32 %v4461_v2, %v13019_v34  ;;  %v4976_v5 = vpop.f32.mrb[135].mxu1  ;;  %v10065_v54 = vld [vmem:[%s14033_s3 + $0x7e0] ss:$16 sps:$4 sm:$0xff]  }
 0x364   :  { %v5032_v35 = vmax.f32 %v8563_v47, 0.0  ;;  %v5033_v48 = vmax.f32 %v8536_v56, 0.0  ;;  %v8565_v41 = vadd.f32 %v4976_v5, %v13027_v20  ;;  %v10066_v16 = vld [vmem:[%s14033_s3 + $0x7e8] ss:$16 sps:$4 sm:$0xff]   ;;  %v10068_v2 = vld [vmem:[%s14033_s3 + $0x80c] ss:$16 sps:$4 sm:$0xff]  }
 0x365   :  { %v13272_v15 = vadd.f32 %v5031_v24, %v5029_v46  ;;  %v5035_v39 = vmax.f32 %v8564_v44, 0.0  ;;  %5483 = vmatpush1.bf16.msra.mxu0 %v10065_v54  ;;  %v5034_v55 = vmax.f32 %v8537_v58, 0.0  ;;  %v10067_v46 = vld [vmem:[%s14033_s3 + $0x804] ss:$16 sps:$4 sm:$0xff]  }
 0x366   :  { %v13277_v31 = vadd.f32 %v5032_v35, %v5030_v63  ;;  %5998 = vmatpush1.bf16.msra.mxu1 %v10066_v16  ;;  %v5036_v47 = vmax.f32 %v8565_v41, 0.0  ;;  %5555 = vmatprep.subr.bf16.mxu0 %v10067_v46  ;;  %v10070_v46 = vld [vmem:[%s14033_s3 + $0x808] ss:$16 sps:$4 sm:$0xff]  }
 0x367   :  { %v13285_v56 = vadd.f32 %v5035_v39, %v5033_v48  ;;  %6070 = vmatprep.subr.bf16.mxu1 %v10068_v2  ;;  %v4465_v24 = vpop.f32.mrb[136].mxu0  ;;  %v10069_v39 = vld [vmem:[%s14033_s3 + $0x800] ss:$16 sps:$4 sm:$0xff]  }
 0x368   :  { %v13290_v63 = vadd.f32 %v5036_v47, %v5034_v55  ;;  %5485 = vmatmul.mubr.bf16.vlgmr.msra.gmra.mrb[140].mxu0 %v14141_v21  ;;  %v8538_v43 = vadd.f32 %v4465_v24, %v13010_v50  ;;  %v4980_v44 = vpop.f32.mrb[136].mxu1  ;;  %v4467_v58 = vpop.f32.mrb[137].mxu0 }
 0x369   :  { %14159 = vst [vmem:[#allocation14_spill] sm:$0xff] %v13285_v56  ;;  %6000 = vmatmul.mubr.bf16.vlgmr.msra.gmra.mrb[140].mxu1 %v14141_v21  ;;  %5494 = vmatprep.mubr.bf16.mxu0 %v14142_v45  ;;  %v8566_v48 = vadd.f32 %v4980_v44, %v13015_v37  ;;  %v8539_v5 = vadd.f32 %v4467_v58, %v13019_v34  ;;  %v4982_v35 = vpop.f32.mrb[137].mxu1  ;;  %v4469_v41 = vpop.f32.mrb[138].mxu0  ;;  %v10071_v44 = vld [vmem:[%s14033_s3 + $0x824] ss:$16 sps:$4 sm:$0xff]  }
 0x36a   :  { %14160 = vst [vmem:[#allocation15_spill] sm:$0xff] %v13290_v63  ;;  %5556 = vmatpush1.bf16.msra.mxu0 %v10069_v39  ;;  %6009 = vmatprep.mubr.bf16.mxu1 %v14142_v45  ;;  %v5037_v54 = vmax.f32 %v8538_v43, 0.0  ;;  %v8567_v55 = vadd.f32 %v4982_v35, %v13027_v20  ;;  %v8540_v21 = vadd.f32 %v4469_v41, %v13010_v50  ;;  %v4984_v16 = vpop.f32.mrb[138].mxu1  ;;  %v4471_v47 = vpop.f32.mrb[139].mxu0  ;;  %v10072_v41 = vld [vmem:[%s14033_s3 + $0x82c] ss:$16 sps:$4 sm:$0xff]  }
 0x36b   :  { %6071 = vmatpush1.bf16.msra.mxu1 %v10070_v46  ;;  %v5039_v2 = vmax.f32 %v8566_v48, 0.0  ;;  %v5038_v24 = vmax.f32 %v8539_v5, 0.0  ;;  %5557 = vmatprep.subr.bf16.mxu0 %v10071_v44  ;;  %v8568_v45 = vadd.f32 %v4984_v16, %v13015_v37  ;;  %v8541_v43 = vadd.f32 %v4471_v47, %v13019_v34  ;;  %v4986_v58 = vpop.f32.mrb[139].mxu1  ;;  %v10073_v16 = vld [vmem:[%s14033_s3 + $0x820] ss:$16 sps:$4 sm:$0xff]  }
 0x36c   :  { %v5040_v35 = vmax.f32 %v8567_v55, 0.0  ;;  %6072 = vmatprep.subr.bf16.mxu1 %v10072_v41  ;;  %v5041_v39 = vmax.f32 %v8540_v21, 0.0  ;;  %v8569_v48 = vadd.f32 %v4986_v58, %v13027_v20  ;;  %v10074_v21 = vld [vmem:[%s14033_s3 + $0x828] ss:$16 sps:$4 sm:$0xff]   ;;  %v10077_v44 = vld [vmem:[%s14033_s3 + $0x840] ss:$16 sps:$4 sm:$0xff]  }
 0x36d   :  { %v13316_v5 = vadd.f32 %v5039_v2, %v5037_v54  ;;  %v5043_v46 = vmax.f32 %v8568_v45, 0.0  ;;  %v5042_v63 = vmax.f32 %v8541_v43, 0.0  ;;  %v10075_v54 = vld [vmem:[%s14033_s3 + $0x844] ss:$16 sps:$4 sm:$0xff]   ;;  %v10081_v43 = vld [vmem:[%s14033_s3 + $0x860] ss:$16 sps:$4 sm:$0xff]  }
 0x36e   :  { %v13318_v56 = vadd.f32 %v5040_v35, %v5038_v24  ;;  %5558 = vmatpush1.bf16.msra.mxu0 %v10073_v16  ;;  %v5044_v55 = vmax.f32 %v8569_v48, 0.0  ;;  %v10076_v24 = vld [vmem:[%s14033_s3 + $0x84c] ss:$16 sps:$4 sm:$0xff]   ;;  %v10079_v45 = vld [vmem:[%s14033_s3 + $0x864] ss:$16 sps:$4 sm:$0xff]  }
 0x36f   :  { %v13323_v47 = vadd.f32 %v5043_v46, %v5041_v39  ;;  %6073 = vmatpush1.bf16.msra.mxu1 %v10074_v21  ;;  %5559 = vmatprep.subr.bf16.mxu0 %v10075_v54  ;;  %v10083_v58 = vld [vmem:[%s14033_s3 + $0x884] ss:$16 sps:$4 sm:$0xff]   ;;  %v10084_v35 = vld [vmem:[%s14033_s3 + $0x88c] ss:$16 sps:$4 sm:$0xff]   ;;  %v10085_v41 = vld [vmem:[%s14033_s3 + $0x880] ss:$16 sps:$4 sm:$0xff]  }
 0x370   :  { %v13331_v2 = vadd.f32 %v5044_v55, %v5042_v63  ;;  %5495 = vmatmul.mubr.bf16.gmra.mrb[144].mxu0 %v14143_v36  ;;  %6074 = vmatprep.subr.bf16.mxu1 %v10076_v24  ;;  %v10078_v63 = vld [vmem:[%s14033_s3 + $0x848] ss:$16 sps:$4 sm:$0xff]   ;;  %v10087_v48 = vld [vmem:[%s14033_s3 + $0x8a4] ss:$16 sps:$4 sm:$0xff]   ;;  %v10089_v46 = vld [vmem:[%s14033_s3 + $0x8a0] ss:$16 sps:$4 sm:$0xff]  }
 0x371   :  { %6010 = vmatmul.mubr.bf16.gmra.mrb[144].mxu1 %v14143_v36  ;;  %5504 = vmatprep.mubr.bf16.mxu0 %v14144_v9  ;;  %v10080_v36 = vld [vmem:[%s14033_s3 + $0x86c] ss:$16 sps:$4 sm:$0xff]   ;;  %v10086_v39 = vld [vmem:[%s14033_s3 + $0x888] ss:$16 sps:$4 sm:$0xff]   ;;  %v10091_v16 = vld [vmem:[%s14033_s3 + $0x8c4] ss:$16 sps:$4 sm:$0xff]  }
 0x372   :  { %5560 = vmatpush1.bf16.msra.mxu0 %v10077_v44  ;;  %6019 = vmatprep.mubr.bf16.mxu1 %v14144_v9  ;;  %v10082_v9 = vld [vmem:[%s14033_s3 + $0x868] ss:$16 sps:$4 sm:$0xff]   ;;  %v10092_v55 = vld [vmem:[%s14033_s3 + $0x8cc] ss:$16 sps:$4 sm:$0xff]   ;;  %v10093_v21 = vld [vmem:[%s14033_s3 + $0x8c0] ss:$16 sps:$4 sm:$0xff]  }
 0x373   :  { %6075 = vmatpush1.bf16.msra.mxu1 %v10078_v63  ;;  %5561 = vmatprep.subr.bf16.mxu0 %v10079_v45  ;;  %v10094_v54 = vld [vmem:[%s14033_s3 + $0x8c8] ss:$16 sps:$4 sm:$0xff]   ;;  %v10095_v24 = vld [vmem:[%s14033_s3 + $0x8e4] ss:$16 sps:$4 sm:$0xff]   ;;  %v10097_v44 = vld [vmem:[%s14033_s3 + $0x8e0] ss:$16 sps:$4 sm:$0xff]  }
 0x374   :  { %6076 = vmatprep.subr.bf16.mxu1 %v10080_v36  ;;  %v10099_v63 = vld [vmem:[%s14033_s3 + $0x904] ss:$16 sps:$4 sm:$0xff]   ;;  %v10100_v45 = vld [vmem:[%s14033_s3 + $0x90c] ss:$16 sps:$4 sm:$0xff]   ;;  %v10101_v36 = vld [vmem:[%s14033_s3 + $0x900] ss:$16 sps:$4 sm:$0xff]  }
 0x376   :  { %5562 = vmatpush1.bf16.msra.mxu0 %v10081_v43  ;;  %v10102_v43 = vld [vmem:[%s14033_s3 + $0x908] ss:$16 sps:$4 sm:$0xff]  }
 0x377   :  { %6077 = vmatpush1.bf16.msra.mxu1 %v10082_v9  ;;  %5563 = vmatprep.subr.bf16.mxu0 %v10083_v58  ;;  %v10103_v9 = vld [vmem:[%s14033_s3 + $0x924] ss:$16 sps:$4 sm:$0xff]   ;;  %v10105_v58 = vld [vmem:[%s14033_s3 + $0x920] ss:$16 sps:$4 sm:$0xff]  }
 0x378   :  { %5505 = vmatmul.mubr.bf16.gmra.mrb[148].mxu0 %v14145_v32  ;;  %6078 = vmatprep.subr.bf16.mxu1 %v10084_v35  ;;  %v10107_v35 = vld [vmem:[%s14033_s3 + $0x944] ss:$16 sps:$4 sm:$0xff]  }
 0x379   :  { %6020 = vmatmul.mubr.bf16.gmra.mrb[148].mxu1 %v14145_v32  ;;  %5514 = vmatprep.mubr.bf16.mxu0 %v14146_v27  ;;  %v10088_v32 = vld [vmem:[%s14033_s3 + $0x8ac] ss:$16 sps:$4 sm:$0xff]  }
 0x37a   :  { %5564 = vmatpush1.bf16.msra.mxu0 %v10085_v41  ;;  %6029 = vmatprep.mubr.bf16.mxu1 %v14146_v27  ;;  %v10090_v27 = vld [vmem:[%s14033_s3 + $0x8a8] ss:$16 sps:$4 sm:$0xff]   ;;  %v10108_v41 = vld [vmem:[%s14033_s3 + $0x94c] ss:$16 sps:$4 sm:$0xff]  }
 0x37b   :  { %6079 = vmatpush1.bf16.msra.mxu1 %v10086_v39  ;;  %5565 = vmatprep.subr.bf16.mxu0 %v10087_v48  ;;  %v10109_v39 = vld [vmem:[%s14033_s3 + $0x940] ss:$16 sps:$4 sm:$0xff]   ;;  %v10110_v48 = vld [vmem:[%s14033_s3 + $0x948] ss:$16 sps:$4 sm:$0xff]  }
 0x37c   :  { %6080 = vmatprep.subr.bf16.mxu1 %v10088_v32  ;;  %v10111_v32 = vld [vmem:[%s14033_s3 + $0x964] ss:$16 sps:$4 sm:$0xff]  }
 0x37e   :  { %5566 = vmatpush1.bf16.msra.mxu0 %v10089_v46  ;;  %v10113_v46 = vld [vmem:[%s14033_s3 + $0x960] ss:$16 sps:$4 sm:$0xff]  }
 0x37f   :  { %6081 = vmatpush1.bf16.msra.mxu1 %v10090_v27  ;;  %5567 = vmatprep.subr.bf16.mxu0 %v10091_v16  ;;  %v10114_v27 = vld [vmem:[%s14033_s3 + $0x968] ss:$16 sps:$4 sm:$0xff]   ;;  %v10115_v16 = vld [vmem:[%s14033_s3 + $0x984] ss:$16 sps:$4 sm:$0xff]  }
 0x380   :  { %5515 = vmatmul.mubr.bf16.gmra.mrb[152].mxu0 %v14147_v4  ;;  %6082 = vmatprep.subr.bf16.mxu1 %v10092_v55  ;;  %v10116_v55 = vld [vmem:[%s14033_s3 + $0x98c] ss:$16 sps:$4 sm:$0xff]  }
 0x381   :  { %6030 = vmatmul.mubr.bf16.gmra.mrb[152].mxu1 %v14147_v4  ;;  %5524 = vmatprep.mubr.bf16.mxu0 %v14148_v61  ;;  %v10096_v4 = vld [vmem:[%s14033_s3 + $0x8ec] ss:$16 sps:$4 sm:$0xff]  }
 0x382   :  { %5568 = vmatpush1.bf16.msra.mxu0 %v10093_v21  ;;  %6039 = vmatprep.mubr.bf16.mxu1 %v14148_v61  ;;  %v10098_v61 = vld [vmem:[%s14033_s3 + $0x8e8] ss:$16 sps:$4 sm:$0xff]   ;;  %v10117_v21 = vld [vmem:[%s14033_s3 + $0x980] ss:$16 sps:$4 sm:$0xff]  }
 0x383   :  { %6083 = vmatpush1.bf16.msra.mxu1 %v10094_v54  ;;  %5569 = vmatprep.subr.bf16.mxu0 %v10095_v24  ;;  %v10118_v54 = vld [vmem:[%s14033_s3 + $0x988] ss:$16 sps:$4 sm:$0xff]   ;;  %v10119_v24 = vld [vmem:[%s14033_s3 + $0x9a4] ss:$16 sps:$4 sm:$0xff]  }
 0x384   :  { %6084 = vmatprep.subr.bf16.mxu1 %v10096_v4  ;;  %v10120_v4 = vld [vmem:[%s14033_s3 + $0x9ac] ss:$16 sps:$4 sm:$0xff]  }
 0x386   :  { %5570 = vmatpush1.bf16.msra.mxu0 %v10097_v44  ;;  %v10121_v44 = vld [vmem:[%s14033_s3 + $0x9a0] ss:$16 sps:$4 sm:$0xff]  }
 0x387   :  { %6085 = vmatpush1.bf16.msra.mxu1 %v10098_v61  ;;  %5571 = vmatprep.subr.bf16.mxu0 %v10099_v63  ;;  %v10123_v61 = vld [vmem:[%s14033_s3 + $0x9c4] ss:$16 sps:$4 sm:$0xff]   ;;  %v10124_v63 = vld [vmem:[%s14033_s3 + $0x9cc] ss:$16 sps:$4 sm:$0xff]  }
 0x388   :  { %5525 = vmatmul.mubr.bf16.gmra.mrb[156].mxu0 %v14149_v40  ;;  %6086 = vmatprep.subr.bf16.mxu1 %v10100_v45  ;;  %v9699_v45 = vld [vmem:[%s14036_s5 + $0xc0] sm:$0xff]  }
 0x389   :  { %6040 = vmatmul.mubr.bf16.gmra.mrb[156].mxu1 %v14149_v40  ;;  %5534 = vmatprep.mubr.bf16.mxu0 %v14150_v49  ;;  %v10104_v40 = vld [vmem:[%s14033_s3 + $0x92c] ss:$16 sps:$4 sm:$0xff]  }
 0x38a   :  { %5572 = vmatpush1.bf16.msra.mxu0 %v10101_v36  ;;  %6049 = vmatprep.mubr.bf16.mxu1 %v14150_v49  ;;  %v10106_v49 = vld [vmem:[%s14033_s3 + $0x928] ss:$16 sps:$4 sm:$0xff]   ;;  %v10125_v36 = vld [vmem:[%s14033_s3 + $0x9c0] ss:$16 sps:$4 sm:$0xff]  }
 0x38b   :  { %6087 = vmatpush1.bf16.msra.mxu1 %v10102_v43  ;;  %5573 = vmatprep.subr.bf16.mxu0 %v10103_v9  ;;  %v9705_v43 = vld [vmem:[%s14036_s5 + $0x40] sm:$0xff]   ;;  %v10126_v9 = vld [vmem:[%s14033_s3 + $0x9c8] ss:$16 sps:$4 sm:$0xff]  }
 0x38c   :  { %6088 = vmatprep.subr.bf16.mxu1 %v10104_v40  ;;  %v10127_v40 = vld [vmem:[%s14033_s3 + $0x9e4] ss:$16 sps:$4 sm:$0xff]  }
 0x38e   :  { %5574 = vmatpush1.bf16.msra.mxu0 %v10105_v58  ;;  %v10128_v58 = vld [vmem:[%s14033_s3 + $0x9ec] ss:$16 sps:$4 sm:$0xff]  }
 0x38f   :  { %6089 = vmatpush1.bf16.msra.mxu1 %v10106_v49  ;;  %5575 = vmatprep.subr.bf16.mxu0 %v10107_v35  ;;  %v9700_v49 = vld [vmem:[%s14036_s5 + $0x80] sm:$0xff]  }
 0x390   :  { %5535 = vmatmul.mubr.bf16.gmra.mrb[160].mxu0 %v14151_v10  ;;  %6090 = vmatprep.subr.bf16.mxu1 %v10108_v41  ;;  %v10129_v35 = vld [vmem:[%s14033_s3 + $0x9e0] ss:$16 sps:$4 sm:$0xff]   ;;  %v9701_v41 = vld [vmem:[%s14036_s5 + $0xc8] sm:$0xff]  }
 0x391   :  { %6050 = vmatmul.mubr.bf16.gmra.mrb[160].mxu1 %v14151_v10  ;;  %5544 = vmatprep.mubr.bf16.mxu0 %v14152_v25  ;;  %v10112_v10 = vld [vmem:[%s14033_s3 + $0x96c] ss:$16 sps:$4 sm:$0xff]  }
 0x392   :  { %5576 = vmatpush1.bf16.msra.mxu0 %v10109_v39  ;;  %6059 = vmatprep.mubr.bf16.mxu1 %v14152_v25  ;;  %v9706_v39 = vld [vmem:[%s14036_s5] sm:$0xff]  }
 0x393   :  { %6091 = vmatpush1.bf16.msra.mxu1 %v10110_v48  ;;  %5577 = vmatprep.subr.bf16.mxu0 %v10111_v32  ;;  %v10130_v48 = vld [vmem:[%s14033_s3 + $0x9e8] ss:$16 sps:$4 sm:$0xff]  }
 0x394   :  { %6092 = vmatprep.subr.bf16.mxu1 %v10112_v10  ;;  %v9707_v32 = vld [vmem:[%s14036_s5 + $0x48] sm:$0xff]  }
 0x395   :  { %v9702_v10 = vld [vmem:[%s14036_s5 + $0x88] sm:$0xff]  }
 0x396   :  { %5578 = vmatpush1.bf16.msra.mxu0 %v10113_v46  ;;  %v9703_v46 = vld [vmem:[%s14036_s5 + $0xd0] sm:$0xff]  }
 0x397   :  { %6093 = vmatpush1.bf16.msra.mxu1 %v10114_v27  ;;  %5579 = vmatprep.subr.bf16.mxu0 %v10115_v16  ;;  %v9708_v27 = vld [vmem:[%s14036_s5 + $0x8] sm:$0xff]   ;;  %v9711_v16 = vld [vmem:[%s14036_s5 + $0x50] sm:$0xff]  }
 0x398   :  { %5545 = vmatmul.mubr.bf16.gmra.mrb[164].mxu0 %v14152_v25  ;;  %6094 = vmatprep.subr.bf16.mxu1 %v10116_v55  ;;  %v9709_v55 = vld [vmem:[%s14036_s5 + $0xd8] sm:$0xff]  }
 0x399   :  { %6060 = vmatmul.mubr.bf16.gmra.mrb[164].mxu1 %v14152_v25  ;;  %5587 = vmatprep.mubr.bf16.mxu0 %v11761_v18 }
 0x39a   :  { %5580 = vmatpush1.bf16.msra.mxu0 %v10117_v21  ;;  %6102 = vmatprep.mubr.bf16.mxu1 %v11761_v18  ;;  %v10122_v18 = vld [vmem:[%s14033_s3 + $0x9a8] ss:$16 sps:$4 sm:$0xff]  }
 0x39b   :  { %6095 = vmatpush1.bf16.msra.mxu1 %v10118_v54  ;;  %5581 = vmatprep.subr.bf16.mxu0 %v10119_v24  ;;  %v9713_v21 = vld [vmem:[%s14036_s5 + $0x58] sm:$0xff]   ;;  %v9714_v24 = vld [vmem:[%s14036_s5 + $0xe0] sm:$0xff]  }
 0x39c   :  { %6096 = vmatprep.subr.bf16.mxu1 %v10120_v4  ;;  %v9710_v54 = vld [vmem:[%s14036_s5 + $0x98] sm:$0xff]  }
 0x39d   :  { %v9715_v4 = vld [vmem:[%s14036_s5 + $0x18] sm:$0xff]  }
 0x39e   :  { %5582 = vmatpush1.bf16.msra.mxu0 %v10121_v44  ;;  %v9728_v44 = vld [vmem:[%s14036_s5 + $0x38] sm:$0xff]  }
 0x39f   :  { %6097 = vmatpush1.bf16.msra.mxu1 %v10122_v18  ;;  %5583 = vmatprep.subr.bf16.mxu0 %v10123_v61  ;;  %v9725_v18 = vld [vmem:[%s14036_s5 + $0xf0] sm:$0xff]   ;;  %v9729_v61 = vld [vmem:[%s14036_s5 + $0x1c0] sm:$0xff]  }
 0x3a0   :  { %6098 = vmatprep.subr.bf16.mxu1 %v10124_v63  ;;  %v9726_v63 = vld [vmem:[%s14036_s5 + $0xb0] sm:$0xff]  }
 0x3a2   :  { %5584 = vmatpush1.bf16.msra.mxu0 %v10125_v36  ;;  %v9732_v36 = vld [vmem:[%s14036_s5 + $0xb8] sm:$0xff]  }
 0x3a3   :  { %6099 = vmatpush1.bf16.msra.mxu1 %v10126_v9  ;;  %5585 = vmatprep.subr.bf16.mxu0 %v10127_v40 }
 0x3a4   :  { %6100 = vmatprep.subr.bf16.mxu1 %v10128_v58 }
 0x3a6   :  { %5586 = vmatpush1.bf16.msra.mxu0 %v10129_v35 }
 0x3a7   :  { %6101 = vmatpush1.bf16.msra.mxu1 %v10130_v48  ;;  %8360 = vmatprep.subr.bf16.mxu0 %v9699_v45  ;;  %v9731_v45 = vld [vmem:[%s14036_s5 + $0xf8] sm:$0xff]  }
 0x3a8   :  { %8382 = vmatprep.subr.bf16.mxu1 %v9705_v43  ;;  %v9735_v43 = vld [vmem:[%s14036_s5 + $0x140] sm:$0xff]  }
 0x3a9   :  { %5588 = vmatmul.mubr.bf16.vlgmr.msra.gmra.mrb[140].mxu0 %v11757_v7 }
 0x3aa   :  { %6103 = vmatmul.mubr.bf16.vlgmr.msra.gmra.mrb[140].mxu1 %v11757_v7  ;;  %5597 = vmatprep.mubr.bf16.mxu0 %v11781_v57  ;;  %v9704_v7 = vld [vmem:[%s14036_s5 + $0x90] sm:$0xff]  }
 0x3ab   :  { %6112 = vmatprep.mubr.bf16.mxu1 %v11781_v57  ;;  %8361 = vmatpush3.bf16.msra.mxu0 %v9700_v49  ;;  %v9712_v57 = vld [vmem:[%s14036_s5 + $0x10] sm:$0xff]  }
 0x3ac   :  { %8362 = vmatprep.subr.bf16.mxu0 %v9701_v41  ;;  %8383 = vmatpush3.bf16.msra.mxu1 %v9706_v39 }
 0x3ad   :  { %8384 = vmatprep.subr.bf16.mxu1 %v9707_v32 }
 0x3af   :  { %8363 = vmatpush3.bf16.msra.mxu0 %v9702_v10 }
 0x3b0   :  { %8364 = vmatprep.subr.bf16.mxu0 %v9703_v46  ;;  %8385 = vmatpush3.bf16.msra.mxu1 %v9708_v27 }
 0x3b1   :  { %5598 = vmatmul.mubr.bf16.gmra.mrb[144].mxu0 %v11777_v60  ;;  %8386 = vmatprep.subr.bf16.mxu1 %v9711_v16 }
 0x3b2   :  { %6113 = vmatmul.mubr.bf16.gmra.mrb[144].mxu1 %v11777_v60  ;;  %5607 = vmatprep.mubr.bf16.mxu0 %v11801_v19  ;;  %v9716_v60 = vld [vmem:[%s14036_s5 + $0xa0] sm:$0xff]  }
 0x3b3   :  { %6122 = vmatprep.mubr.bf16.mxu1 %v11801_v19  ;;  %8365 = vmatpush3.bf16.msra.mxu0 %v9704_v7  ;;  %v9718_v19 = vld [vmem:[%s14036_s5 + $0x20] sm:$0xff]  }
 0x3b4   :  { %8366 = vmatprep.subr.bf16.mxu0 %v9709_v55  ;;  %8387 = vmatpush3.bf16.msra.mxu1 %v9712_v57 }
 0x3b5   :  { %8388 = vmatprep.subr.bf16.mxu1 %v9713_v21 }
 0x3b7   :  { %8367 = vmatpush3.bf16.msra.mxu0 %v9710_v54 }
 0x3b8   :  { %8368 = vmatprep.subr.bf16.mxu0 %v9714_v24  ;;  %8389 = vmatpush3.bf16.msra.mxu1 %v9715_v4 }
 0x3b9   :  { %5608 = vmatmul.mubr.bf16.gmra.mrb[148].mxu0 %v11797_v0 }
 0x3ba   :  { %6123 = vmatmul.mubr.bf16.gmra.mrb[148].mxu1 %v11797_v0  ;;  %5617 = vmatprep.mubr.bf16.mxu0 %v11821_v3  ;;  %v9717_v0 = vld [vmem:[%s14036_s5 + $0x60] sm:$0xff]  }
 0x3bb   :  { %6132 = vmatprep.mubr.bf16.mxu1 %v11821_v3  ;;  %8369 = vmatpush3.bf16.msra.mxu0 %v9716_v60  ;;  %v9722_v3 = vld [vmem:[%s14036_s5 + $0x28] sm:$0xff]  }
 0x3bc   :  { %8390 = vmatprep.subr.bf16.mxu1 %v9717_v0 }
 0x3bd   :  { %8391 = vmatpush3.bf16.msra.mxu1 %v9718_v19 }
 0x3c1   :  { %5618 = vmatmul.mubr.bf16.gmra.mrb[152].mxu0 %v11817_v52 }
 0x3c2   :  { %6133 = vmatmul.mubr.bf16.gmra.mrb[152].mxu1 %v11817_v52  ;;  %5627 = vmatprep.mubr.bf16.mxu0 %v11841_v53  ;;  %v9720_v52 = vld [vmem:[%s14036_s5 + $0x68] sm:$0xff]  }
 0x3c3   :  { %6142 = vmatprep.mubr.bf16.mxu1 %v11841_v53  ;;  %8392 = vmatprep.subr.bf16.mxu1 %v9720_v52  ;;  %v9724_v53 = vld [vmem:[%s14036_s5 + $0x30] sm:$0xff]  }
 0x3c4   :  { %8393 = vmatpush3.bf16.msra.mxu1 %v9722_v3 }
 0x3c9   :  { %5628 = vmatmul.mubr.bf16.gmra.mrb[156].mxu0 %v11837_v12 }
 0x3ca   :  { %6143 = vmatmul.mubr.bf16.gmra.mrb[156].mxu1 %v11837_v12  ;;  %5637 = vmatprep.mubr.bf16.mxu0 %v11857_v30  ;;  %v9723_v12 = vld [vmem:[%s14036_s5 + $0x70] sm:$0xff]  }
 0x3cb   :  { %6152 = vmatprep.mubr.bf16.mxu1 %v11857_v30  ;;  %8394 = vmatprep.subr.bf16.mxu1 %v9723_v12  ;;  %v9721_v30 = vld [vmem:[%s14036_s5 + $0xa8] sm:$0xff]  }
 0x3cc   :  { %8395 = vmatpush3.bf16.msra.mxu1 %v9724_v53 }
 0x3d1   :  { %5638 = vmatmul.mubr.bf16.gmra.mrb[160].mxu0 %v11855_v14 }
 0x3d2   :  { %6153 = vmatmul.mubr.bf16.gmra.mrb[160].mxu1 %v11855_v14  ;;  %5647 = vmatprep.mubr.bf16.mxu0 %v14152_v25  ;;  %v9719_v14 = vld [vmem:[%s14036_s5 + $0xe8] sm:$0xff]  }
 0x3d3   :  { %6162 = vmatprep.mubr.bf16.mxu1 %v14152_v25  ;;  %8370 = vmatprep.subr.bf16.mxu0 %v9719_v14 }
 0x3d4   :  { %8371 = vmatpush3.bf16.msra.mxu0 %v9721_v30 }
 0x3d5   :  { %8372 = vmatprep.subr.bf16.mxu0 %v9725_v18 }
 0x3d8   :  { %8373 = vmatpush3.bf16.msra.mxu0 %v9726_v63 }
 0x3d9   :  { %5648 = vmatmul.mubr.bf16.gmra.mrb[164].mxu0 %v14152_v25  ;;  %8374 = vmatprep.subr.bf16.mxu0 %v9731_v45 }
 0x3da   :  { %6163 = vmatmul.mubr.bf16.gmra.mrb[164].mxu1 %v14152_v25  ;;  %v9727_v25 = vld [vmem:[%s14036_s5 + $0x78] sm:$0xff]  }
 0x3db   :  { %8396 = vmatprep.subr.bf16.mxu1 %v9727_v25 }
 0x3dc   :  { %8397 = vmatpush3.bf16.msra.mxu1 %v9728_v44  ;;  %8375 = vmatpush3.bf16.msra.mxu0 %v9732_v36 }
 0x3dd   :  { %8426 = vmatprep.subr.bf16.mxu1 %v9729_v61  ;;  %8404 = vmatprep.subr.bf16.mxu0 %v9735_v43 }
 0x47c   :  { %v5589_v9 = vpop.f32.mrb[140].mxu0 }
 0x47d   :  { %v8570_v40 = vadd.f32 %v5589_v9, %v13010_v50  ;;  %v6104_v58 = vpop.f32.mrb[140].mxu1  ;;  %v5591_v49 = vpop.f32.mrb[141].mxu0 }
 0x47e   :  { %v8598_v35 = vadd.f32 %v6104_v58, %v13015_v37  ;;  %v8571_v41 = vadd.f32 %v5591_v49, %v13019_v34  ;;  %v6106_v39 = vpop.f32.mrb[141].mxu1  ;;  %v5593_v48 = vpop.f32.mrb[142].mxu0 }
 0x47f   :  { %v6173_v32 = vmax.f32 %v8570_v40, 0.0  ;;  %v8599_v10 = vadd.f32 %v6106_v39, %v13027_v20  ;;  %v8572_v46 = vadd.f32 %v5593_v48, %v13010_v50  ;;  %v6108_v27 = vpop.f32.mrb[142].mxu1  ;;  %v5595_v16 = vpop.f32.mrb[143].mxu0 }
 0x480   :  { %v6174_v7 = vmax.f32 %v8571_v41, 0.0  ;;  %v8600_v55 = vadd.f32 %v6108_v27, %v13015_v37  ;;  %v8573_v57 = vadd.f32 %v5595_v16, %v13019_v34  ;;  %v6110_v21 = vpop.f32.mrb[143].mxu1  ;;  %v6175_v24 = vmax.f32 %v8598_v35, 0.0 }
 0x481   :  { %v6229_v54 = vadd.f32 %v6173_v32, %v13056_v22  ;;  %v6177_v4 = vmax.f32 %v8572_v46, 0.0  ;;  %v8601_v60 = vadd.f32 %v6110_v21, %v13027_v20  ;;  %v6176_v19 = vmax.f32 %v8599_v10, 0.0 }
 0x482   :  { %v6230_v0 = vadd.f32 %v6174_v7, %v13061_v62  ;;  %v6178_v52 = vmax.f32 %v8573_v57, 0.0  ;;  %v6179_v53 = vmax.f32 %v8600_v55, 0.0 }
 0x483   :  { %v6257_v3 = vadd.f32 %v6229_v54, %v6175_v24  ;;  %v6231_v12 = vadd.f32 %v6177_v4, %v13069_v23  ;;  %v6180_v25 = vmax.f32 %v8601_v60, 0.0 }
 0x484   :  { %v6258_v14 = vadd.f32 %v6230_v0, %v6176_v19  ;;  %v6232_v30 = vadd.f32 %v6178_v52, %v13075_v51  ;;  %v5599_v44 = vpop.f32.mrb[144].mxu0  ;;  %v9730_v52 = vld [vmem:[%s14036_s5 + $0x180] sm:$0xff]  }
 0x485   :  { %v6259_v18 = vadd.f32 %v6231_v12, %v6179_v53  ;;  %v8574_v22 = vadd.f32 %v5599_v44, %v13010_v50  ;;  %v6114_v61 = vpop.f32.mrb[144].mxu1  ;;  %v5601_v63 = vpop.f32.mrb[145].mxu0  ;;  %v6285_v45 = vmul.f32 0.25, %v6257_v3 }
 0x486   :  { %v6260_v36 = vadd.f32 %v6232_v30, %v6180_v25  ;;  %v8602_v62 = vadd.f32 %v6114_v61, %v13015_v37  ;;  %v8575_v43 = vadd.f32 %v5601_v63, %v13019_v34  ;;  %v6116_v9 = vpop.f32.mrb[145].mxu1  ;;  %v5603_v40 = vpop.f32.mrb[146].mxu0  ;;  %v6286_v39 = vmul.f32 0.25, %v6258_v14 }
 0x487   :  { %v6287_v23 = vmul.f32 0.25, %v6259_v18  ;;  %v6181_v58 = vmax.f32 %v8574_v22, 0.0  ;;  %v8603_v49 = vadd.f32 %v6116_v9, %v13027_v20  ;;  %v8576_v51 = vadd.f32 %v5603_v40, %v13010_v50  ;;  %v6118_v35 = vpop.f32.mrb[146].mxu1  ;;  %v5605_v41 = vpop.f32.mrb[147].mxu0 }
 0x488   :  { %v6288_v48 = vmul.f32 0.25, %v6260_v36  ;;  %v6182_v32 = vmax.f32 %v8575_v43, 0.0  ;;  %v8604_v10 = vadd.f32 %v6118_v35, %v13015_v37  ;;  %v6120_v46 = vpop.f32.mrb[147].mxu1  ;;  %v6183_v7 = vmax.f32 %v8602_v62, 0.0 }
 0x489   :  { %v6313_v27 = vpack.c.bf16 %v6287_v23, %v6285_v45  ;;  %v6233_v16 = vadd.f32 %v6181_v58, %v13100_v59  ;;  %v6185_v55 = vmax.f32 %v8576_v51, 0.0  ;;  %v6184_v21 = vmax.f32 %v8603_v49, 0.0 }
 0x48a   :  { %v6234_v57 = vadd.f32 %v6182_v32, %v13105_v6  ;;  %v8577_v54 = vadd.f32 %v5605_v41, %v13019_v34  ;;  %v8605_v24 = vadd.f32 %v6120_v46, %v13027_v20  ;;  %v6187_v0 = vmax.f32 %v8604_v10, 0.0  ;;  %v9733_v6 = vld [vmem:[%s14036_s5 + $0x1c8] sm:$0xff]  }
 0x48b   :  { %v6261_v4 = vadd.f32 %v6233_v16, %v6183_v7  ;;  %v6235_v60 = vadd.f32 %v6185_v55, %v13113_v13  ;;  %v6314_v19 = vpack.c.bf16 %v6288_v48, %v6286_v39  ;;  %v9736_v39 = vld [vmem:[%s14036_s5 + $0x1d0] sm:$0xff]  }
 0x48c   :  { %v6262_v3 = vadd.f32 %v6234_v57, %v6184_v21  ;;  %v6186_v59 = vmax.f32 %v8577_v54, 0.0  ;;  %v5609_v12 = vpop.f32.mrb[148].mxu0  ;;  %v6188_v14 = vmax.f32 %v8605_v24, 0.0 }
 0x48d   :  { %v6263_v53 = vadd.f32 %v6235_v60, %v6187_v0  ;;  %v8578_v30 = vadd.f32 %v5609_v12, %v13010_v50  ;;  %v6124_v25 = vpop.f32.mrb[148].mxu1  ;;  %6657 = vmatprep.mubr.bf16.mxu1 %v6314_v19  ;;  %v5611_v13 = vpop.f32.mrb[149].mxu0  ;;  %v6289_v44 = vmul.f32 0.25, %v6261_v4  ;;  %v9738_v4 = vld [vmem:[%s14036_s5 + $0x190] sm:$0xff]  }
 0x48e   :  { %v6236_v18 = vadd.f32 %v6186_v59, %v13119_v29  ;;  %v8606_v22 = vadd.f32 %v6124_v25, %v13015_v37  ;;  %v8579_v61 = vadd.f32 %v5611_v13, %v13019_v34  ;;  %v6126_v63 = vpop.f32.mrb[149].mxu1  ;;  %6658 = vmatmul.mubr.bf16.vlgmr.msra.gmra.mrb[168].mxu1 %v6313_v27  ;;  %v5613_v45 = vpop.f32.mrb[150].mxu0  ;;  %v9734_v29 = vld [vmem:[%s14036_s5 + $0x188] sm:$0xff]   ;;  %v6290_v58 = vmul.f32 0.25, %v6262_v3 }
 0x48f   :  { %v6291_v36 = vmul.f32 0.25, %v6263_v53  ;;  %v6189_v62 = vmax.f32 %v8578_v30, 0.0  ;;  %v8607_v43 = vadd.f32 %v6126_v63, %v13027_v20  ;;  %8427 = vmatpush3.bf16.msra.mxu1 %v9730_v52  ;;  %v8580_v9 = vadd.f32 %v5613_v45, %v13010_v50  ;;  %v6128_v40 = vpop.f32.mrb[150].mxu1  ;;  %v5615_v23 = vpop.f32.mrb[151].mxu0  ;;  %v9739_v53 = vld [vmem:[%s14036_s5 + $0x148] sm:$0xff]  }
 0x490   :  { %v6264_v49 = vadd.f32 %v6236_v18, %v6188_v14  ;;  %v6190_v51 = vmax.f32 %v8579_v61, 0.0  ;;  %v8608_v35 = vadd.f32 %v6128_v40, %v13015_v37  ;;  %v6130_v41 = vpop.f32.mrb[151].mxu1  ;;  %8428 = vmatprep.subr.bf16.mxu1 %v9733_v6  ;;  %v6191_v10 = vmax.f32 %v8606_v22, 0.0 }
 0x491   :  { %v6315_v48 = vpack.c.bf16 %v6291_v36, %v6289_v44  ;;  %v6237_v32 = vadd.f32 %v6189_v62, %v13144_v17  ;;  %v6193_v46 = vmax.f32 %v8580_v9, 0.0  ;;  %v6192_v7 = vmax.f32 %v8607_v43, 0.0 }
 0x492   :  { %v6292_v27 = vmul.f32 0.25, %v6264_v49  ;;  %v6238_v16 = vadd.f32 %v6190_v51, %v13149_v42  ;;  %v8581_v55 = vadd.f32 %v5615_v23, %v13019_v34  ;;  %v6195_v54 = vmax.f32 %v8608_v35, 0.0  ;;  %v9737_v42 = vld [vmem:[%s14036_s5 + $0x100] sm:$0xff]  }
 0x493   :  { %v6265_v57 = vadd.f32 %v6237_v32, %v6191_v10  ;;  %v6239_v21 = vadd.f32 %v6193_v46, %v13157_v28  ;;  %v8609_v24 = vadd.f32 %v6130_v41, %v13027_v20  ;;  %8429 = vmatpush3.bf16.msra.mxu1 %v9734_v29  ;;  %v9740_v28 = vld [vmem:[%s14036_s5 + $0x1d8] sm:$0xff]   ;;  %v9744_v49 = vld [vmem:[%s14036_s5 + $0x1e0] sm:$0xff]  }
 0x494   :  { %v6266_v17 = vadd.f32 %v6238_v16, %v6192_v7  ;;  %v6194_v60 = vmax.f32 %v8581_v55, 0.0  ;;  %v5619_v0 = vpop.f32.mrb[152].mxu0  ;;  %v6316_v19 = vpack.c.bf16 %v6292_v27, %v6290_v58  ;;  %8430 = vmatprep.subr.bf16.mxu1 %v9736_v39  ;;  %v9741_v58 = vld [vmem:[%s14036_s5 + $0x108] sm:$0xff]  }
 0x495   :  { %v13706_v52 = vmul.f32 0.25, %v6265_v57  ;;  %v6267_v3 = vadd.f32 %v6239_v21, %v6195_v54  ;;  %v8582_v59 = vadd.f32 %v5619_v0, %v13010_v50  ;;  %v6134_v12 = vpop.f32.mrb[152].mxu1  ;;  %v5621_v6 = vpop.f32.mrb[153].mxu0  ;;  %v6196_v30 = vmax.f32 %v8609_v24, 0.0 }
 0x496   :  { %v6240_v14 = vadd.f32 %v6194_v60, %v13163_v26  ;;  %v8610_v25 = vadd.f32 %v6134_v12, %v13015_v37  ;;  %6520 = vmatprep.mubr.bf16.mxu0 %v6316_v19  ;;  %v8583_v13 = vadd.f32 %v5621_v6, %v13019_v34  ;;  %v6136_v44 = vpop.f32.mrb[153].mxu1  ;;  %v5623_v18 = vpop.f32.mrb[154].mxu0  ;;  %v9742_v26 = vld [vmem:[%s14036_s5 + $0x198] sm:$0xff]   ;;  %v6294_v43 = vmul.f32 0.25, %v6266_v17 }
 0x497   :  { %v13715_v22 = vmul.f32 0.25, %v6267_v3  ;;  %v6197_v61 = vmax.f32 %v8582_v59, 0.0  ;;  %v8611_v63 = vadd.f32 %v6136_v44, %v13027_v20  ;;  %6521 = vmatmul.mubr.bf16.vlgmr.msra.gmra.mrb[168].mxu0 %v6315_v48  ;;  %8431 = vmatpush3.bf16.msra.mxu1 %v9738_v4  ;;  %v8584_v45 = vadd.f32 %v5623_v18, %v13010_v50  ;;  %v6138_v36 = vpop.f32.mrb[154].mxu1  ;;  %v5625_v62 = vpop.f32.mrb[155].mxu0  ;;  %v9743_v48 = vld [vmem:[%s14036_s5 + $0x150] sm:$0xff]  }
 0x498   :  { %v6268_v9 = vadd.f32 %v6240_v14, %v6196_v30  ;;  %v6198_v40 = vmax.f32 %v8583_v13, 0.0  ;;  %8405 = vmatpush3.bf16.msra.mxu0 %v9737_v42  ;;  %v8612_v23 = vadd.f32 %v6138_v36, %v13015_v37  ;;  %v6140_v29 = vpop.f32.mrb[155].mxu1  ;;  %8432 = vmatprep.subr.bf16.mxu1 %v9740_v28  ;;  %v6199_v41 = vmax.f32 %v8610_v25, 0.0  ;;  %v9747_v28 = vld [vmem:[%s14036_s5 + $0x158] sm:$0xff]  }
 0x499   :  { %v6317_v51 = vpack.c.bf16 %v13715_v22, %v13706_v52  ;;  %v6241_v35 = vadd.f32 %v6197_v61, %v13188_v11  ;;  %v6201_v39 = vmax.f32 %v8584_v45, 0.0  ;;  %8406 = vmatprep.subr.bf16.mxu0 %v9739_v53  ;;  %v6200_v46 = vmax.f32 %v8611_v63, 0.0  ;;  %v9746_v11 = vld [vmem:[%s14036_s5 + $0x1a0] sm:$0xff]  }
 0x49a   :  { %v6296_v32 = vmul.f32 0.25, %v6268_v9  ;;  %v6242_v10 = vadd.f32 %v6198_v40, %v13193_v38  ;;  %v8585_v27 = vadd.f32 %v5625_v62, %v13019_v34  ;;  %v6203_v55 = vmax.f32 %v8612_v23, 0.0  ;;  %v9745_v38 = vld [vmem:[%s14036_s5 + $0x110] sm:$0xff]   ;;  %v9776_v52 = vld [vmem:[%s14036_s5 + $0x2e0] sm:$0xff]  }
 0x49b   :  { %v6269_v16 = vadd.f32 %v6241_v35, %v6199_v41  ;;  %v6243_v7 = vadd.f32 %v6201_v39, %v13201_v8  ;;  %v8613_v57 = vadd.f32 %v6140_v29, %v13027_v20  ;;  %8433 = vmatpush3.bf16.msra.mxu1 %v9742_v26  ;;  %v9748_v8 = vld [vmem:[%s14036_s5 + $0x1e8] sm:$0xff]   ;;  %v9752_v9 = vld [vmem:[%s14036_s5 + $0x1f0] sm:$0xff]  }
 0x49c   :  { %v6270_v21 = vadd.f32 %v6242_v10, %v6200_v46  ;;  %v6202_v54 = vmax.f32 %v8585_v27, 0.0  ;;  %8407 = vmatpush3.bf16.msra.mxu0 %v9741_v58  ;;  %v5629_v24 = vpop.f32.mrb[156].mxu0  ;;  %v6318_v4 = vpack.c.bf16 %v6296_v32, %v6294_v43  ;;  %8434 = vmatprep.subr.bf16.mxu1 %v9744_v49  ;;  %v9749_v43 = vld [vmem:[%s14036_s5 + $0x118] sm:$0xff]   ;;  %v9751_v49 = vld [vmem:[%s14036_s5 + $0x160] sm:$0xff]   ;;  %v14161_v41 = vld [vmem:[#allocation10_spill] sm:$0xff] }
 0x49d   :  { %v13748_v17 = vmul.f32 0.25, %v6269_v16  ;;  %v6271_v60 = vadd.f32 %v6243_v7, %v6203_v55  ;;  %v8586_v0 = vadd.f32 %v5629_v24, %v13010_v50  ;;  %v6144_v19 = vpop.f32.mrb[156].mxu1  ;;  %8408 = vmatprep.subr.bf16.mxu0 %v9743_v48  ;;  %v5631_v42 = vpop.f32.mrb[157].mxu0  ;;  %v6204_v59 = vmax.f32 %v8613_v57, 0.0  ;;  %v14162_v46 = vld [vmem:[#allocation11_spill] sm:$0xff] }
 0x49e   :  { %v6244_v3 = vadd.f32 %v6202_v54, %v13207_v33  ;;  %v8614_v12 = vadd.f32 %v6144_v19, %v13015_v37  ;;  %6827 = vmatprep.mubr.bf16.mxu0 %v6318_v4  ;;  %v8587_v6 = vadd.f32 %v5631_v42, %v13019_v34  ;;  %v6146_v53 = vpop.f32.mrb[157].mxu1  ;;  %v5633_v14 = vpop.f32.mrb[158].mxu0  ;;  %v9750_v33 = vld [vmem:[%s14036_s5 + $0x1a8] sm:$0xff]   ;;  %v6298_v63 = vmul.f32 0.25, %v6270_v21  ;;  %v9753_v54 = vld [vmem:[%s14036_s5 + $0x120] sm:$0xff]   ;;  %v9756_v24 = vld [vmem:[%s14036_s5 + $0x1f8] sm:$0xff]  }
 0x49f   :  { %v13757_v30 = vmul.f32 0.25, %v6271_v60  ;;  %v6205_v25 = vmax.f32 %v8586_v0, 0.0  ;;  %v8615_v13 = vadd.f32 %v6146_v53, %v13027_v20  ;;  %8435 = vmatpush3.bf16.msra.mxu1 %v9746_v11  ;;  %v8588_v44 = vadd.f32 %v5633_v14, %v13010_v50  ;;  %v6148_v18 = vpop.f32.mrb[158].mxu1  ;;  %v5635_v61 = vpop.f32.mrb[159].mxu0  ;;  %v9755_v19 = vld [vmem:[%s14036_s5 + $0x168] sm:$0xff]   ;;  %v14163_v42 = vld [vmem:[#allocation12_spill] sm:$0xff] }
 0x4a0   :  { %v6272_v45 = vadd.f32 %v6244_v3, %v6204_v59  ;;  %v6206_v36 = vmax.f32 %v8587_v6, 0.0  ;;  %8409 = vmatpush3.bf16.msra.mxu0 %v9745_v38  ;;  %v8616_v62 = vadd.f32 %v6148_v18, %v13015_v37  ;;  %v6150_v26 = vpop.f32.mrb[159].mxu1  ;;  %8436 = vmatprep.subr.bf16.mxu1 %v9748_v8  ;;  %v6207_v29 = vmax.f32 %v8614_v12, 0.0 }
 0x4a1   :  { %v6319_v40 = vpack.c.bf16 %v13757_v30, %v13748_v17  ;;  %v6245_v23 = vadd.f32 %v6205_v25, %v13232_v1  ;;  %v6209_v58 = vmax.f32 %v8588_v44, 0.0  ;;  %8410 = vmatprep.subr.bf16.mxu0 %v9747_v28  ;;  %v6208_v48 = vmax.f32 %v8615_v13, 0.0  ;;  %v9754_v1 = vld [vmem:[%s14036_s5 + $0x1b0] sm:$0xff]  }
 0x4a2   :  { %v6300_v35 = vmul.f32 0.25, %v6272_v45  ;;  %v6246_v39 = vadd.f32 %v6206_v36, %v14161_v41  ;;  %v8589_v32 = vadd.f32 %v5635_v61, %v13019_v34  ;;  %v6211_v16 = vmax.f32 %v8616_v62, 0.0 }
 0x4a3   :  { %v6273_v10 = vadd.f32 %v6245_v23, %v6207_v29  ;;  %v6247_v27 = vadd.f32 %v6209_v58, %v14162_v46  ;;  %v8617_v7 = vadd.f32 %v6150_v26, %v13027_v20  ;;  %8437 = vmatpush3.bf16.msra.mxu1 %v9750_v33  ;;  %v9758_v33 = vld [vmem:[%s14036_s5 + $0x1b8] sm:$0xff]   ;;  %v14164_v46 = vld [vmem:[#allocation14_spill] sm:$0xff] }
 0x4a4   :  { %v6274_v55 = vadd.f32 %v6246_v39, %v6208_v48  ;;  %v6210_v57 = vmax.f32 %v8589_v32, 0.0  ;;  %8411 = vmatpush3.bf16.msra.mxu0 %v9749_v43  ;;  %v5639_v11 = vpop.f32.mrb[160].mxu0  ;;  %8438 = vmatprep.subr.bf16.mxu1 %v9752_v9  ;;  %v6320_v21 = vpack.c.bf16 %v6300_v35, %v6298_v63  ;;  %v9757_v43 = vld [vmem:[%s14036_s5 + $0x128] sm:$0xff]   ;;  %v9760_v9 = vld [vmem:[%s14036_s5 + $0x2c0] sm:$0xff]   ;;  %v9759_v35 = vld [vmem:[%s14036_s5 + $0x170] sm:$0xff]  }
 0x4a5   :  { %v13790_v4 = vmul.f32 0.25, %v6273_v10  ;;  %v6275_v38 = vadd.f32 %v6247_v27, %v6211_v16  ;;  %v8590_v8 = vadd.f32 %v5639_v11, %v13010_v50  ;;  %v6154_v60 = vpop.f32.mrb[160].mxu1  ;;  %8412 = vmatprep.subr.bf16.mxu0 %v9751_v49  ;;  %v5641_v0 = vpop.f32.mrb[161].mxu0  ;;  %v6212_v3 = vmax.f32 %v8617_v7, 0.0  ;;  %v9762_v7 = vld [vmem:[%s14036_s5 + $0x280] sm:$0xff]   ;;  %v9764_v11 = vld [vmem:[%s14036_s5 + $0x2c8] sm:$0xff]  }
 0x4a6   :  { %v6248_v28 = vadd.f32 %v6210_v57, %v14163_v42  ;;  %v8618_v59 = vadd.f32 %v6154_v60, %v13015_v37  ;;  %6999 = vmatprep.mubr.bf16.mxu1 %v6320_v21  ;;  %v8591_v12 = vadd.f32 %v5641_v0, %v13019_v34  ;;  %v6156_v6 = vpop.f32.mrb[161].mxu1  ;;  %v5643_v53 = vpop.f32.mrb[162].mxu0  ;;  %v13806_v63 = vmul.f32 0.25, %v6274_v55  ;;  %v9763_v0 = vld [vmem:[%s14036_s5 + $0x178] sm:$0xff]  }
 0x4a7   :  { %v13799_v14 = vmul.f32 0.25, %v6275_v38  ;;  %v6213_v25 = vmax.f32 %v8590_v8, 0.0  ;;  %v8619_v13 = vadd.f32 %v6156_v6, %v13027_v20  ;;  %8439 = vmatpush3.bf16.msra.mxu1 %v9754_v1  ;;  %v8592_v44 = vadd.f32 %v5643_v53, %v13010_v50  ;;  %v6158_v18 = vpop.f32.mrb[162].mxu1  ;;  %v5645_v61 = vpop.f32.mrb[163].mxu0 }
 0x4a8   :  { %v6276_v45 = vadd.f32 %v6248_v28, %v6212_v3  ;;  %v6214_v36 = vmax.f32 %v8591_v12, 0.0  ;;  %8413 = vmatpush3.bf16.msra.mxu0 %v9753_v54  ;;  %v8620_v62 = vadd.f32 %v6158_v18, %v13015_v37  ;;  %v6160_v26 = vpop.f32.mrb[163].mxu1  ;;  %8440 = vmatprep.subr.bf16.mxu1 %v9756_v24  ;;  %v6215_v58 = vmax.f32 %v8618_v59, 0.0 }
 0x4a9   :  { %v6321_v23 = vpack.c.bf16 %v13799_v14, %v13790_v4  ;;  %v6249_v29 = vadd.f32 %v6213_v25, %v13272_v15  ;;  %v6217_v49 = vmax.f32 %v8592_v44, 0.0  ;;  %8414 = vmatprep.subr.bf16.mxu0 %v9755_v19  ;;  %v6216_v48 = vmax.f32 %v8619_v13, 0.0  ;;  %v14165_v19 = vld [vmem:[#allocation15_spill] sm:$0xff] }
 0x4aa   :  { %v13821_v41 = vmul.f32 0.25, %v6276_v45  ;;  %v6250_v39 = vadd.f32 %v6214_v36, %v13277_v31  ;;  %v8593_v32 = vadd.f32 %v5645_v61, %v13019_v34  ;;  %v6219_v16 = vmax.f32 %v8620_v62, 0.0  ;;  %v9761_v31 = vld [vmem:[%s14036_s5 + $0x130] sm:$0xff]   ;;  %v9765_v62 = vld [vmem:[%s14036_s5 + $0x138] sm:$0xff]  }
 0x4ab   :  { %v6277_v10 = vadd.f32 %v6249_v29, %v6215_v58  ;;  %v6251_v27 = vadd.f32 %v6217_v49, %v14164_v46  ;;  %v8621_v15 = vadd.f32 %v6160_v26, %v13027_v20  ;;  %8441 = vmatpush3.bf16.msra.mxu1 %v9758_v33  ;;  %v9766_v33 = vld [vmem:[%s14036_s5 + $0x288] sm:$0xff]   ;;  %v9801_v4 = vld [vmem:[%s14036_s5 + $0x358] sm:$0xff]  }
 0x4ac   :  { %v6278_v1 = vadd.f32 %v6250_v39, %v6216_v48  ;;  %v6218_v55 = vmax.f32 %v8593_v32, 0.0  ;;  %8415 = vmatpush3.bf16.msra.mxu0 %v9757_v43  ;;  %v5649_v57 = vpop.f32.mrb[164].mxu0  ;;  %8470 = vmatprep.subr.bf16.mxu1 %v9760_v9  ;;  %v6322_v21 = vpack.c.bf16 %v13821_v41, %v13806_v63  ;;  %v9778_v41 = vld [vmem:[%s14036_s5 + $0x2a0] sm:$0xff]   ;;  %v9802_v14 = vld [vmem:[%s14036_s5 + $0x318] sm:$0xff]  }
 0x4ad   :  { %v13838_v54 = vmul.f32 0.25, %v6277_v10  ;;  %v6279_v24 = vadd.f32 %v6251_v27, %v6219_v16  ;;  %v8594_v38 = vadd.f32 %v5649_v57, %v13010_v50  ;;  %v6164_v8 = vpop.f32.mrb[164].mxu1  ;;  %8416 = vmatprep.subr.bf16.mxu0 %v9759_v35  ;;  %v5651_v60 = vpop.f32.mrb[165].mxu0  ;;  %v6220_v28 = vmax.f32 %v8621_v15, 0.0 }
 0x4ae   :  { %v6252_v42 = vadd.f32 %v6218_v55, %v14165_v19  ;;  %v8622_v3 = vadd.f32 %v6164_v8, %v13015_v37  ;;  %7000 = vmatmul.mubr.bf16.vlgmr.msra.gmra.mrb[172].mxu1 %v6319_v40  ;;  %v8595_v59 = vadd.f32 %v5651_v60, %v13019_v34  ;;  %v6166_v12 = vpop.f32.mrb[165].mxu1  ;;  %v5653_v6 = vpop.f32.mrb[166].mxu0  ;;  %v6306_v17 = vmul.f32 0.25, %v6278_v1  ;;  %v9779_v60 = vld [vmem:[%s14036_s5 + $0x258] sm:$0xff]  }
 0x4af   :  { %v13850_v53 = vmul.f32 0.25, %v6279_v24  ;;  %v6221_v25 = vmax.f32 %v8594_v38, 0.0  ;;  %v8623_v13 = vadd.f32 %v6166_v12, %v13027_v20  ;;  %8471 = vmatpush3.bf16.msra.mxu1 %v9762_v7  ;;  %v8596_v44 = vadd.f32 %v5653_v6, %v13010_v50  ;;  %v6168_v18 = vpop.f32.mrb[166].mxu1  ;;  %v5655_v61 = vpop.f32.mrb[167].mxu0  ;;  %v9768_v50 = vld [vmem:[%s14036_s5 + $0x2d0] sm:$0xff]   ;;  %v9780_v38 = vld [vmem:[%s14036_s5 + $0x2e8] sm:$0xff]  }
 0x4b0   :  { %v6280_v30 = vadd.f32 %v6252_v42, %v6220_v28  ;;  %v6222_v40 = vmax.f32 %v8595_v59, 0.0  ;;  %8417 = vmatpush3.bf16.msra.mxu0 %v9761_v31  ;;  %v8624_v45 = vadd.f32 %v6168_v18, %v13015_v37  ;;  %v6170_v36 = vpop.f32.mrb[167].mxu1  ;;  %8472 = vmatprep.subr.bf16.mxu1 %v9764_v11  ;;  %v6223_v9 = vmax.f32 %v8622_v3, 0.0  ;;  %v9767_v37 = vld [vmem:[%s14036_s5 + $0x240] sm:$0xff]   ;;  %v9774_v31 = vld [vmem:[%s14036_s5 + $0x298] sm:$0xff]   ;;  %v9784_v42 = vld [vmem:[%s14036_s5 + $0x2f0] sm:$0xff]  }
 0x4b1   :  { %v6323_v26 = vpack.c.bf16 %v13850_v53, %v13838_v54  ;;  %v6253_v43 = vadd.f32 %v6221_v25, %v13316_v5  ;;  %v6225_v29 = vmax.f32 %v8596_v44, 0.0  ;;  %8418 = vmatprep.subr.bf16.mxu0 %v9763_v0  ;;  %v6224_v35 = vmax.f32 %v8623_v13, 0.0  ;;  %v9770_v5 = vld [vmem:[%s14036_s5 + $0x290] sm:$0xff]   ;;  %v9782_v0 = vld [vmem:[%s14036_s5 + $0x2a8] sm:$0xff]   ;;  %v9781_v19 = vld [vmem:[%s14036_s5 + $0x218] sm:$0xff]  }
 0x4b2   :  { %v6308_v58 = vmul.f32 0.25, %v6280_v30  ;;  %v6254_v49 = vadd.f32 %v6222_v40, %v13318_v56  ;;  %v8597_v39 = vadd.f32 %v5655_v61, %v13019_v34  ;;  %v6227_v10 = vmax.f32 %v8624_v45, 0.0  ;;  %v9769_v34 = vld [vmem:[%s14036_s5 + $0x200] sm:$0xff]   ;;  %v9786_v3 = vld [vmem:[%s14036_s5 + $0x2b0] sm:$0xff]   ;;  %v9788_v12 = vld [vmem:[%s14036_s5 + $0x2f8] sm:$0xff]  }
 0x4b3   :  { %v6281_v48 = vadd.f32 %v6253_v43, %v6223_v9  ;;  %v6255_v32 = vadd.f32 %v6225_v29, %v13323_v47  ;;  %v8625_v46 = vadd.f32 %v6170_v36, %v13027_v20  ;;  %8473 = vmatpush3.bf16.msra.mxu1 %v9766_v33  ;;  %v9771_v20 = vld [vmem:[%s14036_s5 + $0x248] sm:$0xff]   ;;  %v9772_v47 = vld [vmem:[%s14036_s5 + $0x2d8] sm:$0xff]   ;;  %v9783_v28 = vld [vmem:[%s14036_s5 + $0x260] sm:$0xff]  }
 0x4b4   :  { %v6282_v27 = vadd.f32 %v6254_v49, %v6224_v35  ;;  %v6226_v16 = vmax.f32 %v8597_v39, 0.0  ;;  %8419 = vmatpush3.bf16.msra.mxu0 %v9765_v62  ;;  %8474 = vmatprep.subr.bf16.mxu1 %v9768_v50  ;;  %v6324_v15 = vpack.c.bf16 %v6308_v58, %v6306_v17  ;;  %v9785_v59 = vld [vmem:[%s14036_s5 + $0x220] sm:$0xff]   ;;  %v9787_v6 = vld [vmem:[%s14036_s5 + $0x268] sm:$0xff]   ;;  %v9790_v25 = vld [vmem:[%s14036_s5 + $0x2b8] sm:$0xff]  }
 0x4b5   :  { %v6283_v56 = vadd.f32 %v6255_v32, %v6227_v10  ;;  %8448 = vmatprep.subr.bf16.mxu0 %v9767_v37  ;;  %v6228_v1 = vmax.f32 %v8625_v46, 0.0  ;;  %v13887_v55 = vmul.f32 0.25, %v6281_v48  ;;  %v9789_v13 = vld [vmem:[%s14036_s5 + $0x228] sm:$0xff]   ;;  %v9791_v44 = vld [vmem:[%s14036_s5 + $0x270] sm:$0xff]   ;;  %v9793_v61 = vld [vmem:[%s14036_s5 + $0x278] sm:$0xff]  }
 0x4b6   :  { %v6256_v7 = vadd.f32 %v6226_v16, %v13331_v2  ;;  %7343 = vmatprep.mubr.bf16.mxu1 %v6324_v15  ;;  %v9773_v2 = vld [vmem:[%s14036_s5 + $0x208] sm:$0xff]   ;;  %v6310_v24 = vmul.f32 0.25, %v6282_v27  ;;  %v9792_v18 = vld [vmem:[%s14036_s5 + $0x230] sm:$0xff]   ;;  %v9794_v33 = vld [vmem:[%s14036_s5 + $0x238] sm:$0xff]  }
 0x4b7   :  { %v13889_v57 = vmul.f32 0.25, %v6283_v56  ;;  %6828 = vmatmul.mubr.bf16.vlgmr.msra.gmra.mrb[172].mxu0 %v6317_v51  ;;  %8475 = vmatpush3.bf16.msra.mxu1 %v9770_v5  ;;  %v9775_v51 = vld [vmem:[%s14036_s5 + $0x250] sm:$0xff]   ;;  %v9795_v17 = vld [vmem:[%s14036_s5 + $0x340] sm:$0xff]   ;;  %v9797_v54 = vld [vmem:[%s14036_s5 + $0x348] sm:$0xff]  }
 0x4b8   :  { %v6284_v11 = vadd.f32 %v6256_v7, %v6228_v1  ;;  %8449 = vmatpush3.bf16.msra.mxu0 %v9769_v34  ;;  %7171 = vmatprep.mubr.bf16.mxu0 %v6322_v21  ;;  %v9777_v21 = vld [vmem:[%s14036_s5 + $0x210] sm:$0xff]   ;;  %v9796_v30 = vld [vmem:[%s14036_s5 + $0x300] sm:$0xff]   ;;  %v9798_v53 = vld [vmem:[%s14036_s5 + $0x308] sm:$0xff]  }
 0x4b9   :  { %v6325_v22 = vpack.c.bf16 %v13889_v57, %v13887_v55  ;;  %8450 = vmatprep.subr.bf16.mxu0 %v9771_v20  ;;  %8476 = vmatprep.subr.bf16.mxu1 %v9772_v47  ;;  %v9799_v40 = vld [vmem:[%s14036_s5 + $0x350] sm:$0xff]   ;;  %v9804_v36 = vld [vmem:[%s14036_s5 + $0x320] sm:$0xff]   ;;  %v9805_v62 = vld [vmem:[%s14036_s5 + $0x368] sm:$0xff]  }
 0x4ba   :  { %v6312_v63 = vmul.f32 0.25, %v6284_v11  ;;  %v9800_v45 = vld [vmem:[%s14036_s5 + $0x310] sm:$0xff]   ;;  %v9806_v50 = vld [vmem:[%s14036_s5 + $0x328] sm:$0xff]   ;;  %v9809_v9 = vld [vmem:[%s14036_s5 + $0x378] sm:$0xff]  }
 0x4bb   :  { %8477 = vmatpush3.bf16.msra.mxu1 %v9774_v31  ;;  %v9808_v43 = vld [vmem:[%s14036_s5 + $0x330] sm:$0xff]   ;;  %v9810_v29 = vld [vmem:[%s14036_s5 + $0x338] sm:$0xff]  }
 0x4bc   :  { %8451 = vmatpush3.bf16.msra.mxu0 %v9773_v2  ;;  %8478 = vmatprep.subr.bf16.mxu1 %v9776_v52  ;;  %v6326_v8 = vpack.c.bf16 %v6312_v63, %v6310_v24 }
 0x4bd   :  { %8452 = vmatprep.subr.bf16.mxu0 %v9775_v51 }
 0x4bf   :  { %8479 = vmatpush3.bf16.msra.mxu1 %v9778_v41 }
 0x4c0   :  { %8453 = vmatpush3.bf16.msra.mxu0 %v9777_v21  ;;  %8480 = vmatprep.subr.bf16.mxu1 %v9780_v38 }
 0x4c1   :  { %8454 = vmatprep.subr.bf16.mxu0 %v9779_v60 }
 0x4c3   :  { %8481 = vmatpush3.bf16.msra.mxu1 %v9782_v0 }
 0x4c4   :  { %8455 = vmatpush3.bf16.msra.mxu0 %v9781_v19  ;;  %8482 = vmatprep.subr.bf16.mxu1 %v9784_v42 }
 0x4c5   :  { %8456 = vmatprep.subr.bf16.mxu0 %v9783_v28 }
 0x4c7   :  { %8483 = vmatpush3.bf16.msra.mxu1 %v9786_v3 }
 0x4c8   :  { %8457 = vmatpush3.bf16.msra.mxu0 %v9785_v59  ;;  %8484 = vmatprep.subr.bf16.mxu1 %v9788_v12 }
 0x4c9   :  { %8458 = vmatprep.subr.bf16.mxu0 %v9787_v6 }
 0x4cb   :  { %8485 = vmatpush3.bf16.msra.mxu1 %v9790_v25 }
 0x4cc   :  { %8459 = vmatpush3.bf16.msra.mxu0 %v9789_v13 }
 0x4cd   :  { %8460 = vmatprep.subr.bf16.mxu0 %v9791_v44 }
 0x4ce   :  { %7344 = vmatmul.mubr.bf16.vlgmr.msra.gmra.mrb[176].mxu1 %v6323_v26  ;;  %v9807_v26 = vld [vmem:[%s14036_s5 + $0x370] sm:$0xff]  }
 0x4d0   :  { %8461 = vmatpush3.bf16.msra.mxu0 %v9792_v18 }
 0x4d1   :  { %8462 = vmatprep.subr.bf16.mxu0 %v9793_v61 }
 0x4d4   :  { %8463 = vmatpush3.bf16.msra.mxu0 %v9794_v33 }
 0x4d5   :  { %8492 = vmatprep.subr.bf16.mxu0 %v9795_v17 }
 0x4d7   :  { %7172 = vmatmul.mubr.bf16.vlgmr.msra.gmra.mrb[176].mxu0 %v6321_v23  ;;  %v9803_v23 = vld [vmem:[%s14036_s5 + $0x360] sm:$0xff]  }
 0x4d8   :  { %8493 = vmatpush3.bf16.msra.mxu0 %v9796_v30  ;;  %7515 = vmatprep.mubr.bf16.mxu0 %v6326_v8 }
 0x4d9   :  { %8494 = vmatprep.subr.bf16.mxu0 %v9797_v54  ;;  %v8359_v54 = vld [vmem:[%s14037_s6] ss:$0 sm:$0xff] }
 0x4dc   :  { %8495 = vmatpush3.bf16.msra.mxu0 %v9798_v53 }
 0x4dd   :  { %8496 = vmatprep.subr.bf16.mxu0 %v9799_v40 }
 0x4e0   :  { %8497 = vmatpush3.bf16.msra.mxu0 %v9800_v45 }
 0x4e1   :  { %8498 = vmatprep.subr.bf16.mxu0 %v9801_v4 }
 0x4e4   :  { %8499 = vmatpush3.bf16.msra.mxu0 %v9802_v14 }
 0x4e5   :  { %8500 = vmatprep.subr.bf16.mxu0 %v9803_v23 }
 0x4e8   :  { %8501 = vmatpush3.bf16.msra.mxu0 %v9804_v36 }
 0x4e9   :  { %8502 = vmatprep.subr.bf16.mxu0 %v9805_v62 }
 0x4ec   :  { %8503 = vmatpush3.bf16.msra.mxu0 %v9806_v50 }
 0x4ed   :  { %8504 = vmatprep.subr.bf16.mxu0 %v9807_v26 }
 0x4f0   :  { %8505 = vmatpush3.bf16.msra.mxu0 %v9808_v43 }
 0x4f1   :  { %8506 = vmatprep.subr.bf16.mxu0 %v9809_v9 }
 0x4f4   :  { %8507 = vmatpush3.bf16.msra.mxu0 %v9810_v29 }
 0x4f7   :  { %7516 = vmatmul.mubr.bf16.vlgmr.msra.gmra.mrb[180].mxu0 %v6325_v22 }
 0x561   :  { %v8398_v37 = vpop.f32.mrb[168].mxu1 }
 0x562   :  { %v8399_v58 = vpop.f32.mrb[169].mxu1 }
 0x563   :  { %v8400_v49 = vadd.f32 %v8399_v58, %v8398_v37  ;;  %v8401_v35 = vpop.f32.mrb[170].mxu1 }
 0x564   :  { %v8402_v39 = vpop.f32.mrb[171].mxu1 }
 0x565   :  { %v8403_v48 = vadd.f32 %v8402_v39, %v8401_v35 }
 0x56a   :  { %v8376_v32 = vpop.f32.mrb[168].mxu0 }
 0x56b   :  { %v8377_v10 = vpop.f32.mrb[169].mxu0 }
 0x56c   :  { %v8378_v46 = vadd.f32 %v8377_v10, %v8376_v32  ;;  %v8379_v5 = vpop.f32.mrb[170].mxu0 }
 0x56d   :  { %v8380_v27 = vpop.f32.mrb[171].mxu0 }
 0x56e   :  { %v6660_v16 = vadd.f32 %v8400_v49, %v8378_v46  ;;  %v8381_v15 = vadd.f32 %v8380_v27, %v8379_v5 }
 0x570   :  { %v6663_v34 = vadd.f32 %v8403_v48, %v8381_v15 }
 0x581   :  { %v8442_v56 = vpop.f32.mrb[172].mxu1 }
 0x582   :  { %v8443_v20 = vpop.f32.mrb[173].mxu1 }
 0x583   :  { %v8444_v47 = vadd.f32 %v8443_v20, %v8442_v56  ;;  %v8445_v7 = vpop.f32.mrb[174].mxu1 }
 0x584   :  { %v8446_v1 = vpop.f32.mrb[175].mxu1 }
 0x585   :  { %v8447_v55 = vadd.f32 %v8446_v1, %v8445_v7 }
 0x58a   :  { %v8420_v57 = vpop.f32.mrb[172].mxu0 }
 0x58b   :  { %v8421_v31 = vpop.f32.mrb[173].mxu0 }
 0x58c   :  { %v8422_v11 = vadd.f32 %v8421_v31, %v8420_v57  ;;  %v8423_v2 = vpop.f32.mrb[174].mxu0 }
 0x58d   :  { %v8424_v52 = vpop.f32.mrb[175].mxu0 }
 0x58e   :  { %v6836_v22 = vadd.f32 %v8422_v11, %v6660_v16  ;;  %v8425_v51 = vadd.f32 %v8424_v52, %v8423_v2 }
 0x590   :  { %v6837_v24 = vadd.f32 %v8425_v51, %v6663_v34  ;;  %v7008_v63 = vadd.f32 %v8444_v47, %v6836_v22 }
 0x592   :  { %v7009_v41 = vadd.f32 %v8447_v55, %v6837_v24 }
 0x5a1   :  { %v8486_v21 = vpop.f32.mrb[176].mxu1 }
 0x5a2   :  { %v8487_v38 = vpop.f32.mrb[177].mxu1 }
 0x5a3   :  { %v8488_v8 = vadd.f32 %v8487_v38, %v8486_v21  ;;  %v8489_v60 = vpop.f32.mrb[178].mxu1 }
 0x5a4   :  { %v8490_v0 = vpop.f32.mrb[179].mxu1 }
 0x5a5   :  { %v8491_v19 = vadd.f32 %v8490_v0, %v8489_v60 }
 0x5aa   :  { %v8464_v42 = vpop.f32.mrb[176].mxu0 }
 0x5ab   :  { %v8465_v28 = vpop.f32.mrb[177].mxu0 }
 0x5ac   :  { %v8466_v3 = vadd.f32 %v8465_v28, %v8464_v42  ;;  %v8467_v59 = vpop.f32.mrb[178].mxu0 }
 0x5ad   :  { %v8468_v12 = vpop.f32.mrb[179].mxu0 }
 0x5ae   :  { %v7180_v6 = vadd.f32 %v8466_v3, %v7008_v63  ;;  %v8469_v25 = vadd.f32 %v8468_v12, %v8467_v59 }
 0x5b0   :  { %v7181_v13 = vadd.f32 %v8469_v25, %v7009_v41  ;;  %v7352_v44 = vadd.f32 %v8488_v8, %v7180_v6 }
 0x5b2   :  { %v7353_v18 = vadd.f32 %v8491_v19, %v7181_v13 }
 0x5ca   :  { %v8508_v61 = vpop.f32.mrb[180].mxu0 }
 0x5cb   :  { %v8509_v33 = vpop.f32.mrb[181].mxu0 }
 0x5cc   :  { %v8510_v17 = vadd.f32 %v8509_v33, %v8508_v61  ;;  %v8511_v30 = vpop.f32.mrb[182].mxu0 }
 0x5cd   :  { %v8512_v53 = vpop.f32.mrb[183].mxu0 }
 0x5ce   :  { %v7524_v40 = vadd.f32 %v8510_v17, %v7352_v44  ;;  %v8513_v45 = vadd.f32 %v8512_v53, %v8511_v30 }
 0x5d0   :  { %v7533_v4 = vadd.f32 %v8359_v54, %v7524_v40  ;;  %v7525_v14 = vadd.f32 %v8513_v45, %v7353_v18 }
 0x5d2   :  { %7535 = vst [vmem:[%s14038_s7] sm:$0xff] %v7533_v4  ;;  %v7534_v23 = vadd.f32 %v8359_v54, %v7525_v14 }
 0x5d4   :  { %7536 = vst [vmem:[%s14038_s7 + $0x8] sm:$0xff] %v7534_v23 }

</bundles_post_ra>
